<compile_context>
chip_gen: v6e
topology: v6e:2x2x1
jax: 0.10.0
libtpu: 0.0.40
codegen_flags: <defaults>
</compile_context>

<pallas_src>
import math
import jax
import jax.numpy as jnp
from jax import lax
from jax.experimental import pallas as pl
from jax.experimental.pallas import tpu as pltpu

# ----------------------------- config (t5-small, shrunk) -----------------------------
VOCAB = 128
D_MODEL = 32
N_HEADS = 4
D_KV = 8
D_INNER = N_HEADS * D_KV     # 32
D_FF = 64
N_LAYERS = 2
NUM_BUCKETS = 32
MAX_DIST = 128
LN_EPS = 1e-6
MASK_FILL = -1e9
COLUMNS = ['page', 'event', 'category', 'subcategory']
N_LOGITS = len(COLUMNS) * VOCAB   # 512 -> lane-dense output store

# contraction of the LAST dims of both operands (q @ k^T without an in-kernel transpose)
_NT_DIMS = (((1,), (1,)), ((), ()))


# ----------------------------- in-kernel helpers -----------------------------
def _rmsnorm(x, w):
    # x: (S, D) f32, w: (1, D) f32  (stats kept in f32)
    var = jnp.mean(x * x, axis=-1, keepdims=True)
    return x * lax.rsqrt(var + LN_EPS) * w


def _softmax_rows(s):
    # rows always contain at least one unmasked entry, so denom >= 1 after max-subtraction.
    p = jnp.exp(s - jnp.max(s, axis=-1, keepdims=True))
    return p * pl.reciprocal(jnp.sum(p, axis=-1, keepdims=True), approx=True)


def _mm(x, w):
    """MXU matmul: cast the activation to the weight dtype (bf16 for projection weights),
    accumulate in f32."""
    return jnp.dot(x.astype(w.dtype), w, preferred_element_type=jnp.float32)


def _mha(q, k, v, bias_fn, wo, d_kv, n_heads):
    """Multi-head attention for one batch element.

    q: (Sq, n_heads*d_kv), k/v: (Sk, n_heads*d_kv) (f32), bias_fn(h): (Sq, Sk) or broadcastable,
    wo: (n_heads*d_kv, D) bf16.  Per-head scores/softmax/PV, then ONE concat-heads @ wo matmul.
    """
    heads = []
    for h in range(n_heads):
        sl = slice(h * d_kv, (h + 1) * d_kv)
        s = lax.dot_general(q[:, sl], k[:, sl], _NT_DIMS,
                            preferred_element_type=jnp.float32)            # (Sq, Sk)
        p = _softmax_rows(s + bias_fn(h))
        heads.append(jnp.dot(p, v[:, sl], preferred_element_type=jnp.float32))   # (Sq, d_kv)
    o = jnp.concatenate(heads, axis=-1)                                     # (Sq, n_heads*d_kv)
    return _mm(o, wo)                                                       # (Sq, D)


# ----------------------------- fused Pallas kernel (encoder + decoder + heads) -----------------------------
def _t5_kernel(enc_emb_ref, dec_emb_ref, enc_maskb_ref, enc_pos_bias_ref, dec_self_bias_ref,
               e_ln_sa_ref, e_wqkv_ref, e_wo_ref, e_ln_ff_ref, e_wi_ref, e_wff_ref, e_ln_f_ref,
               d_ln_sa_ref, d_wqkv_ref, d_wo_sa_ref, d_ln_ca_ref, d_wq_ca_ref, d_wkv_ca_ref,
               d_wo_ca_ref, d_ln_ff_ref, d_wi_ref, d_wff_ref, d_ln_f_ref,
               wh_ref, bh_ref, vmask_ref, out_ref):
    n_layers = e_wqkv_ref.shape[0]
    d_inner = e_wo_ref.shape[1]
    n_heads = enc_pos_bias_ref.shape[0]
    d_kv = d_inner // n_heads

    enc_mask = enc_maskb_ref[0]                          # (1, Se) additive padding bias
    # hoisted combined encoder self-attn bias: computed ONCE, reused across layers & heads
    enc_bias = enc_pos_bias_ref[...] + enc_mask          # (H, Se, Se)
    dec_bias = dec_self_bias_ref[...]                    # (H, Sd, Sd) rel-pos + causal

    # ------------------------------- encoder -------------------------------
    h = enc_emb_ref[0]                                   # (Se, D) f32
    for l in range(n_layers):
        normed = _rmsnorm(h, e_ln_sa_ref[l])
        qkv = _mm(normed, e_wqkv_ref[l])                 # (Se, 3*d_inner) f32
        q = qkv[:, :d_inner]
        k = qkv[:, d_inner:2 * d_inner]
        v = qkv[:, 2 * d_inner:]
        h = h + _mha(q, k, v, lambda hh: enc_bias[hh], e_wo_ref[l], d_kv, n_heads)
        normed = _rmsnorm(h, e_ln_ff_ref[l])
        ffh = jnp.maximum(_mm(normed, e_wi_ref[l]), 0.0)
        h = h + _mm(ffh, e_wff_ref[l])
    enc_h = _rmsnorm(h, e_ln_f_ref[...])                 # encoder output stays in VMEM/vregs

    # ------------------------------- decoder -------------------------------
    h = dec_emb_ref[0]                                   # (Sd, D) f32
    for l in range(n_layers):
        # causal self attention (rel-pos + causal bias precomputed per head)
        normed = _rmsnorm(h, d_ln_sa_ref[l])
        qkv = _mm(normed, d_wqkv_ref[l])
        q = qkv[:, :d_inner]
        k = qkv[:, d_inner:2 * d_inner]
        v = qkv[:, 2 * d_inner:]
        h = h + _mha(q, k, v, lambda hh: dec_bias[hh], d_wo_sa_ref[l], d_kv, n_heads)
        # cross attention (K/V from in-kernel encoder output, padding mask only)
        normed = _rmsnorm(h, d_ln_ca_ref[l])
        q = _mm(normed, d_wq_ca_ref[l])                  # (Sd, d_inner)
        kv = _mm(enc_h, d_wkv_ca_ref[l])                 # (Se, 2*d_inner)
        k = kv[:, :d_inner]
        v = kv[:, d_inner:]
        h = h + _mha(q, k, v, lambda hh: enc_mask, d_wo_ca_ref[l], d_kv, n_heads)
        # feed forward
        normed = _rmsnorm(h, d_ln_ff_ref[l])
        ffh = jnp.maximum(_mm(normed, d_wi_ref[l]), 0.0)
        h = h + _mm(ffh, d_wff_ref[l])

    # decoder_hidden_states[-1] -> fused concatenated heads + vocab mask (lane-dense 512-wide store)
    hd = _rmsnorm(h, d_ln_f_ref[...])
    logits = _mm(hd, wh_ref[...]) + bh_ref[...]
    out_ref[0] = jnp.where(vmask_ref[...] != 0, logits, MASK_FILL)


# ----------------------------- BlockSpec helpers -----------------------------
def _rep(shape):
    """Full-array block, replicated across the batch grid (block index constant 0)."""
    return pl.BlockSpec(shape, lambda b: (0,) * len(shape))


def _per_batch(shape):
    """Block indexed by the batch grid axis on the leading dim."""
    return pl.BlockSpec(shape, lambda b: (b,) + (0,) * (len(shape) - 1))


# ----------------------------- relative position bias (tiny, host/XLA glue; hoisted) -----------------------------
def _relative_position_bucket(relative_position, bidirectional, num_buckets, max_distance):
    relative_buckets = jnp.zeros_like(relative_position)
    if bidirectional:
        num_buckets //= 2
        relative_buckets = relative_buckets + (relative_position > 0).astype(jnp.int32) * num_buckets
        relative_position = jnp.abs(relative_position)
    else:
        relative_position = -jnp.minimum(relative_position, 0)
    max_exact = num_buckets // 2
    is_small = relative_position < max_exact
    rp = jnp.maximum(relative_position, 1).astype(jnp.float32)
    rel_if_large = max_exact + (
        jnp.log(rp / max_exact) / math.log(max_distance / max_exact) * (num_buckets - max_exact)
    ).astype(jnp.int32)
    rel_if_large = jnp.minimum(rel_if_large, num_buckets - 1)
    return relative_buckets + jnp.where(is_small, relative_position, rel_if_large)


def compute_position_bias(rel_emb, q_len, k_len, bidirectional):
    ctx = jnp.arange(q_len)[:, None]
    mem = jnp.arange(k_len)[None, :]
    rel_pos = mem - ctx
    buckets = _relative_position_bucket(rel_pos, bidirectional, NUM_BUCKETS, MAX_DIST)
    values = rel_emb[buckets]                       # (q, k, H)
    return jnp.transpose(values, (2, 0, 1))         # (H, q, k)


# ----------------------------- forward (jitted; eval mode, dropout = identity) -----------------------------
def _t5_pallas(params, enc_emb, dec_emb, enc_mask_bias, enc_pos_bias, dec_self_bias):
    B, Se, _ = enc_emb.shape
    Sd = dec_emb.shape[1]
    return pl.pallas_call(
        _t5_kernel,
        out_shape=jax.ShapeDtypeStruct((B, Sd, N_LOGITS), jnp.float32),
        grid=(B,),
        in_specs=[
            _per_batch((1, Se, D_MODEL)),               # embedded encoder inputs
            _per_batch((1, Sd, D_MODEL)),               # embedded decoder inputs
            _per_batch((1, 1, Se)),                     # encoder padding-mask bias
            _rep((N_HEADS, Se, Se)),                    # encoder rel-pos bias
            _rep((N_HEADS, Sd, Sd)),                    # decoder rel-pos + causal bias
            # encoder weights (layer axis leading; matmul weights bf16, LN f32)
            _rep((N_LAYERS, 1, D_MODEL)),               # ln_sa
            _rep((N_LAYERS, D_MODEL, 3 * D_INNER)),     # fused QKV
            _rep((N_LAYERS, D_INNER, D_MODEL)),         # attn output proj
            _rep((N_LAYERS, 1, D_MODEL)),               # ln_ff
            _rep((N_LAYERS, D_MODEL, D_FF)),            # wi
            _rep((N_LAYERS, D_FF, D_MODEL)),            # wff
            _rep((1, D_MODEL)),                         # final RMSNorm
            # decoder weights
            _rep((N_LAYERS, 1, D_MODEL)),               # ln_sa
            _rep((N_LAYERS, D_MODEL, 3 * D_INNER)),     # fused QKV (self)
            _rep((N_LAYERS, D_INNER, D_MODEL)),         # self-attn output proj
            _rep((N_LAYERS, 1, D_MODEL)),               # ln_ca
            _rep((N_LAYERS, D_MODEL, D_INNER)),         # cross Q
            _rep((N_LAYERS, D_MODEL, 2 * D_INNER)),     # fused cross K/V
            _rep((N_LAYERS, D_INNER, D_MODEL)),         # cross-attn output proj
            _rep((N_LAYERS, 1, D_MODEL)),               # ln_ff
            _rep((N_LAYERS, D_MODEL, D_FF)),            # wi
            _rep((N_LAYERS, D_FF, D_MODEL)),            # wff
            _rep((1, D_MODEL)),                         # final RMSNorm
            # concatenated classification heads
            _rep((D_MODEL, N_LOGITS)),                  # heads weight (bf16)
            _rep((1, N_LOGITS)),                        # heads bias
            _rep((1, N_LOGITS)),                        # vocab masks
        ],
        out_specs=_per_batch((1, Sd, N_LOGITS)),
        compiler_params=pltpu.CompilerParams(dimension_semantics=("parallel",)),
    )(enc_emb, dec_emb, enc_mask_bias, enc_pos_bias, dec_self_bias,
      params['enc_ln_sa'], params['enc_wqkv'], params['enc_wo'],
      params['enc_ln_ff'], params['enc_wi'], params['enc_wff'], params['enc_final_ln'],
      params['dec_ln_sa'], params['dec_wqkv'], params['dec_wo_sa'],
      params['dec_ln_ca'], params['dec_wq_ca'], params['dec_wkv_ca'], params['dec_wo_ca'],
      params['dec_ln_ff'], params['dec_wi'], params['dec_wff'], params['dec_final_ln'],
      params['heads_w'], params['heads_b'], params['heads_mask'])


@jax.jit
def t5_forward(params, input_ids, attention_mask, decoder_input_ids, enc_pos_bias, dec_self_bias):
    B, Se = input_ids.shape
    enc_emb = jnp.take(params['shared'], input_ids, axis=0)            # (B, Se, D)
    dec_emb = jnp.take(params['shared'], decoder_input_ids, axis=0)    # (B, Sd, D)
    enc_mask_bias = ((1.0 - attention_mask.astype(jnp.float32)) * MASK_FILL).reshape(B, 1, Se)
    logits_all = _t5_pallas(params, enc_emb, dec_emb, enc_mask_bias, enc_pos_bias, dec_self_bias)
    return {f'logits_{col}': logits_all[:, :, i * VOCAB:(i + 1) * VOCAB]
            for i, col in enumerate(COLUMNS)}


# ----------------------------- deterministic parameter init -----------------------------
def init_params(key):
    keys = iter(jax.random.split(key, 64))

    def nrm(shape, scale=0.02, dtype=jnp.float32):
        return (scale * jax.random.normal(next(keys), shape)).astype(dtype)

    def stack(shape, dtype=jnp.bfloat16):
        # projection weights stored as bf16 (MXU-native operands; f32 accumulation in-kernel)
        return jnp.stack([nrm(shape, dtype=dtype) for _ in range(N_LAYERS)], axis=0)

    params = {
        'shared': nrm((VOCAB, D_MODEL), 1.0),
        'enc_rel_bias': nrm((NUM_BUCKETS, N_HEADS)),
        'dec_rel_bias': nrm((NUM_BUCKETS, N_HEADS)),
        'enc_final_ln': jnp.ones((1, D_MODEL), jnp.float32),
        'dec_final_ln': jnp.ones((1, D_MODEL), jnp.float32),
        # encoder stacks (layer axis leading)
        'enc_ln_sa': jnp.ones((N_LAYERS, 1, D_MODEL), jnp.float32),
        'enc_ln_ff': jnp.ones((N_LAYERS, 1, D_MODEL), jnp.float32),
        'enc_wqkv': stack((D_MODEL, 3 * D_INNER)),
        'enc_wo':   stack((D_INNER, D_MODEL)),
        'enc_wi':   stack((D_MODEL, D_FF)),
        'enc_wff':  stack((D_FF, D_MODEL)),
        # decoder stacks
        'dec_ln_sa': jnp.ones((N_LAYERS, 1, D_MODEL), jnp.float32),
        'dec_ln_ca': jnp.ones((N_LAYERS, 1, D_MODEL), jnp.float32),
        'dec_ln_ff': jnp.ones((N_LAYERS, 1, D_MODEL), jnp.float32),
        'dec_wqkv':  stack((D_MODEL, 3 * D_INNER)),
        'dec_wo_sa': stack((D_INNER, D_MODEL)),
        'dec_wq_ca': stack((D_MODEL, D_INNER)),
        'dec_wkv_ca': stack((D_MODEL, 2 * D_INNER)),
        'dec_wo_ca': stack((D_INNER, D_MODEL)),
        'dec_wi':    stack((D_MODEL, D_FF)),
        'dec_wff':   stack((D_FF, D_MODEL)),
    }
    # per-column heads (nn.Linear with bias) + deterministic tokenizer.mask(col) boolean masks,
    # concatenated along the vocab axis for a single lane-dense (D, 4*VOCAB) matmul.
    tok_idx = jnp.arange(VOCAB)
    ws, bs, ms = [], [], []
    for i, _col in enumerate(COLUMNS):
        ws.append(nrm((D_MODEL, VOCAB)))
        bs.append(nrm((1, VOCAB)))
        vmask = ((tok_idx % len(COLUMNS)) == i) | (tok_idx < 4)   # synthetic column vocab mask
        ms.append(vmask.astype(jnp.int32).reshape(1, VOCAB))
    params['heads_w'] = jnp.concatenate(ws, axis=1).astype(jnp.bfloat16)   # (D, 4*VOCAB)
    params['heads_b'] = jnp.concatenate(bs, axis=1)                        # (1, 4*VOCAB) f32
    params['heads_mask'] = jnp.concatenate(ms, axis=1)                     # (1, 4*VOCAB) int32
    return params


# ----------------------------- main -----------------------------
if __name__ == "__main__":
    # TODO(synk): dropout layers of HF T5 are omitted (eval-mode semantics); training-mode RNG dropout
    # has no meaningful Pallas equivalent for this synthetic check.
    key = jax.random.PRNGKey(0)
    k_params, k_in, k_dec = jax.random.split(key, 3)
    params = init_params(k_params)

    B, S_ENC, S_DEC = 2, 8, 8
    input_ids = jax.random.randint(k_in, (B, S_ENC), 0, VOCAB, dtype=jnp.int32)
    decoder_input_ids = jax.random.randint(k_dec, (B, S_DEC), 0, VOCAB, dtype=jnp.int32)
    attention_mask = jnp.ones((B, S_ENC), jnp.int32).at[1, -2:].set(0)   # pad last 2 tokens of batch 1

    # Position-bias tables and causal mask depend only on params + static sequence lengths:
    # computed ONCE here, hoisted out of the (jitted) per-call path.
    enc_pos_bias = compute_position_bias(params['enc_rel_bias'], S_ENC, S_ENC, True)     # (H,Se,Se)
    dec_pos_bias = compute_position_bias(params['dec_rel_bias'], S_DEC, S_DEC, False)    # (H,Sd,Sd)
    causal = jnp.where(jnp.arange(S_DEC)[None, :] > jnp.arange(S_DEC)[:, None], MASK_FILL, 0.0)
    dec_self_bias = (dec_pos_bias + causal[None]).astype(jnp.float32)

    outputs = t5_forward(params, input_ids, attention_mask, decoder_input_ids,
                         enc_pos_bias, dec_self_bias)
    for col in COLUMNS:
        logits = jax.block_until_ready(outputs[f'logits_{col}'])
        assert logits.shape == (B, S_DEC, VOCAB)
        assert logits.dtype == jnp.float32
        assert bool(jnp.all(jnp.isfinite(logits)))
    print("KERNEL_OK")
</pallas_src>

<mosaic_0001>
module attributes {stable_mosaic.version = 11 : i64} {
  func.func @_t5_kernel(%arg0: i32, %arg1: memref<1x8x32xf32, #tpu.memory_space<vmem>>, %arg2: memref<1x8x32xf32, #tpu.memory_space<vmem>>, %arg3: memref<1x1x8xf32, #tpu.memory_space<vmem>>, %arg4: memref<4x8x8xf32, #tpu.memory_space<vmem>>, %arg5: memref<4x8x8xf32, #tpu.memory_space<vmem>>, %arg6: memref<2x1x32xf32, #tpu.memory_space<vmem>>, %arg7: memref<2x32x96xbf16, #tpu.memory_space<vmem>>, %arg8: memref<2x32x32xbf16, #tpu.memory_space<vmem>>, %arg9: memref<2x1x32xf32, #tpu.memory_space<vmem>>, %arg10: memref<2x32x64xbf16, #tpu.memory_space<vmem>>, %arg11: memref<2x64x32xbf16, #tpu.memory_space<vmem>>, %arg12: memref<1x32xf32, #tpu.memory_space<vmem>>, %arg13: memref<2x1x32xf32, #tpu.memory_space<vmem>>, %arg14: memref<2x32x96xbf16, #tpu.memory_space<vmem>>, %arg15: memref<2x32x32xbf16, #tpu.memory_space<vmem>>, %arg16: memref<2x1x32xf32, #tpu.memory_space<vmem>>, %arg17: memref<2x32x32xbf16, #tpu.memory_space<vmem>>, %arg18: memref<2x32x64xbf16, #tpu.memory_space<vmem>>, %arg19: memref<2x32x32xbf16, #tpu.memory_space<vmem>>, %arg20: memref<2x1x32xf32, #tpu.memory_space<vmem>>, %arg21: memref<2x32x64xbf16, #tpu.memory_space<vmem>>, %arg22: memref<2x64x32xbf16, #tpu.memory_space<vmem>>, %arg23: memref<1x32xf32, #tpu.memory_space<vmem>>, %arg24: memref<32x512xbf16, #tpu.memory_space<vmem>>, %arg25: memref<1x512xf32, #tpu.memory_space<vmem>>, %arg26: memref<1x512xi32, #tpu.memory_space<vmem>>, %arg27: memref<1x8x512xf32, #tpu.memory_space<vmem>>) attributes {dimension_semantics = [#tpu.dimension_semantics<parallel>], iteration_bounds = array<i64: 2>, scalar_prefetch = 0 : i64, scratch_operands = 0 : i64, tpu.core_type = #tpu.core_type<tc>, window_params = [{transform_indices = @transform_0, window_bounds = array<i64: 1, 8, 32>}, {transform_indices = @transform_1, window_bounds = array<i64: 1, 8, 32>}, {transform_indices = @transform_2, window_bounds = array<i64: 1, 1, 8>}, {pipeline_mode = #tpu.pipeline_mode<synchronous>, transform_indices = @transform_3, window_bounds = array<i64: 4, 8, 8>}, {pipeline_mode = #tpu.pipeline_mode<synchronous>, transform_indices = @transform_4, window_bounds = array<i64: 4, 8, 8>}, {pipeline_mode = #tpu.pipeline_mode<synchronous>, transform_indices = @transform_5, window_bounds = array<i64: 2, 1, 32>}, {pipeline_mode = #tpu.pipeline_mode<synchronous>, transform_indices = @transform_6, window_bounds = array<i64: 2, 32, 96>}, {pipeline_mode = #tpu.pipeline_mode<synchronous>, transform_indices = @transform_7, window_bounds = array<i64: 2, 32, 32>}, {pipeline_mode = #tpu.pipeline_mode<synchronous>, transform_indices = @transform_8, window_bounds = array<i64: 2, 1, 32>}, {pipeline_mode = #tpu.pipeline_mode<synchronous>, transform_indices = @transform_9, window_bounds = array<i64: 2, 32, 64>}, {pipeline_mode = #tpu.pipeline_mode<synchronous>, transform_indices = @transform_10, window_bounds = array<i64: 2, 64, 32>}, {pipeline_mode = #tpu.pipeline_mode<synchronous>, transform_indices = @transform_11, window_bounds = array<i64: 1, 32>}, {pipeline_mode = #tpu.pipeline_mode<synchronous>, transform_indices = @transform_12, window_bounds = array<i64: 2, 1, 32>}, {pipeline_mode = #tpu.pipeline_mode<synchronous>, transform_indices = @transform_13, window_bounds = array<i64: 2, 32, 96>}, {pipeline_mode = #tpu.pipeline_mode<synchronous>, transform_indices = @transform_14, window_bounds = array<i64: 2, 32, 32>}, {pipeline_mode = #tpu.pipeline_mode<synchronous>, transform_indices = @transform_15, window_bounds = array<i64: 2, 1, 32>}, {pipeline_mode = #tpu.pipeline_mode<synchronous>, transform_indices = @transform_16, window_bounds = array<i64: 2, 32, 32>}, {pipeline_mode = #tpu.pipeline_mode<synchronous>, transform_indices = @transform_17, window_bounds = array<i64: 2, 32, 64>}, {pipeline_mode = #tpu.pipeline_mode<synchronous>, transform_indices = @transform_18, window_bounds = array<i64: 2, 32, 32>}, {pipeline_mode = #tpu.pipeline_mode<synchronous>, transform_indices = @transform_19, window_bounds = array<i64: 2, 1, 32>}, {pipeline_mode = #tpu.pipeline_mode<synchronous>, transform_indices = @transform_20, window_bounds = array<i64: 2, 32, 64>}, {pipeline_mode = #tpu.pipeline_mode<synchronous>, transform_indices = @transform_21, window_bounds = array<i64: 2, 64, 32>}, {pipeline_mode = #tpu.pipeline_mode<synchronous>, transform_indices = @transform_22, window_bounds = array<i64: 1, 32>}, {pipeline_mode = #tpu.pipeline_mode<synchronous>, transform_indices = @transform_23, window_bounds = array<i64: 32, 512>}, {pipeline_mode = #tpu.pipeline_mode<synchronous>, transform_indices = @transform_24, window_bounds = array<i64: 1, 512>}, {pipeline_mode = #tpu.pipeline_mode<synchronous>, transform_indices = @transform_25, window_bounds = array<i64: 1, 512>}, {transform_indices = @transform_26, window_bounds = array<i64: 1, 8, 512>}]} {
    %c0 = arith.constant 0 : index
    %c0_0 = arith.constant 0 : index
    %c0_1 = arith.constant 0 : index
    %0 = vector.load %arg3[%c0, %c0_0, %c0_1] : memref<1x1x8xf32, #tpu.memory_space<vmem>>, vector<1x1x8xf32>
    %1 = vector.shape_cast %0 : vector<1x1x8xf32> to vector<1x8xf32>
    %c0_2 = arith.constant 0 : index
    %c0_3 = arith.constant 0 : index
    %c0_4 = arith.constant 0 : index
    %2 = vector.load %arg4[%c0_2, %c0_3, %c0_4] : memref<4x8x8xf32, #tpu.memory_space<vmem>>, vector<4x8x8xf32>
    %3 = vector.shape_cast %1 : vector<1x8xf32> to vector<1x1x8xf32>
    %4 = vector.broadcast %3 : vector<1x1x8xf32> to vector<4x8x8xf32>
    %5 = arith.addf %2, %4 : vector<4x8x8xf32>
    %c0_5 = arith.constant 0 : index
    %c0_6 = arith.constant 0 : index
    %c0_7 = arith.constant 0 : index
    %6 = vector.load %arg5[%c0_5, %c0_6, %c0_7] : memref<4x8x8xf32, #tpu.memory_space<vmem>>, vector<4x8x8xf32>
    %c0_8 = arith.constant 0 : index
    %c0_9 = arith.constant 0 : index
    %c0_10 = arith.constant 0 : index
    %7 = vector.load %arg1[%c0_8, %c0_9, %c0_10] : memref<1x8x32xf32, #tpu.memory_space<vmem>>, vector<1x8x32xf32>
    %8 = vector.shape_cast %7 : vector<1x8x32xf32> to vector<8x32xf32>
    %c0_11 = arith.constant 0 : index
    %c0_12 = arith.constant 0 : index
    %c0_13 = arith.constant 0 : index
    %9 = vector.load %arg6[%c0_11, %c0_12, %c0_13] : memref<2x1x32xf32, #tpu.memory_space<vmem>>, vector<1x1x32xf32>
    %10 = vector.shape_cast %9 : vector<1x1x32xf32> to vector<1x32xf32>
    %11 = arith.mulf %8, %8 : vector<8x32xf32>
    %cst = arith.constant dense<0.000000e+00> : vector<8xf32>
    %12 = vector.multi_reduction <add>, %11, %cst [1] : vector<8x32xf32> to vector<8xf32>
    %13 = vector.shape_cast %12 : vector<8xf32> to vector<8x1xf32>
    %cst_14 = arith.constant 3.200000e+01 : f32
    %14 = vector.broadcast %cst_14 : f32 to vector<8x1xf32>
    %15 = arith.divf %13, %14 : vector<8x1xf32>
    %cst_15 = arith.constant 9.99999997E-7 : f32
    %16 = vector.broadcast %cst_15 : f32 to vector<8x1xf32>
    %17 = arith.addf %15, %16 : vector<8x1xf32>
    %18 = math.rsqrt %17 : vector<8x1xf32>
    %19 = vector.broadcast %18 : vector<8x1xf32> to vector<8x32xf32>
    %20 = arith.mulf %8, %19 : vector<8x32xf32>
    %21 = vector.broadcast %10 : vector<1x32xf32> to vector<8x32xf32>
    %22 = arith.mulf %20, %21 : vector<8x32xf32>
    %c0_16 = arith.constant 0 : index
    %c0_17 = arith.constant 0 : index
    %c0_18 = arith.constant 0 : index
    %23 = vector.load %arg7[%c0_16, %c0_17, %c0_18] : memref<2x32x96xbf16, #tpu.memory_space<vmem>>, vector<1x32x96xbf16>
    %24 = vector.shape_cast %23 : vector<1x32x96xbf16> to vector<32x96xbf16>
    %25 = arith.truncf %22 : vector<8x32xf32> to vector<8x32xbf16>
    %cst_19 = arith.constant dense<0.000000e+00> : vector<8x96xf32>
    %26 = tpu.matmul %25, %24, %cst_19 {dimension_numbers = #tpu.dot_dimension_numbers<[1], [0], [0], [1], [0, 0, 1, 1], [], []>} : vector<8x32xbf16>, vector<32x96xbf16>, vector<8x96xf32> -> vector<8x96xf32>
    %27 = vector.extract_strided_slice %26 {offsets = [0, 0], sizes = [8, 32], strides = [1, 1]} : vector<8x96xf32> to vector<8x32xf32>
    %28 = vector.extract_strided_slice %26 {offsets = [0, 32], sizes = [8, 32], strides = [1, 1]} : vector<8x96xf32> to vector<8x32xf32>
    %29 = vector.extract_strided_slice %26 {offsets = [0, 64], sizes = [8, 32], strides = [1, 1]} : vector<8x96xf32> to vector<8x32xf32>
    %c0_20 = arith.constant 0 : index
    %c0_21 = arith.constant 0 : index
    %c0_22 = arith.constant 0 : index
    %30 = vector.load %arg8[%c0_20, %c0_21, %c0_22] : memref<2x32x32xbf16, #tpu.memory_space<vmem>>, vector<1x32x32xbf16>
    %31 = vector.shape_cast %30 : vector<1x32x32xbf16> to vector<32x32xbf16>
    %32 = vector.extract_strided_slice %27 {offsets = [0, 0], sizes = [8, 8], strides = [1, 1]} : vector<8x32xf32> to vector<8x8xf32>
    %33 = vector.extract_strided_slice %28 {offsets = [0, 0], sizes = [8, 8], strides = [1, 1]} : vector<8x32xf32> to vector<8x8xf32>
    %cst_23 = arith.constant dense<0.000000e+00> : vector<8x8xf32>
    %34 = tpu.matmul %32, %33, %cst_23 {dimension_numbers = #tpu.dot_dimension_numbers<[1], [1], [0], [0], [0, 0, 1, 0], [], []>} : vector<8x8xf32>, vector<8x8xf32>, vector<8x8xf32> -> vector<8x8xf32>
    %35 = vector.extract_strided_slice %5 {offsets = [0, 0, 0], sizes = [1, 8, 8], strides = [1, 1, 1]} : vector<4x8x8xf32> to vector<1x8x8xf32>
    %36 = vector.shape_cast %35 : vector<1x8x8xf32> to vector<8x8xf32>
    %37 = arith.addf %34, %36 : vector<8x8xf32>
    %cst_24 = arith.constant dense<0xFF800000> : vector<8xf32>
    %38 = vector.multi_reduction <maximumf>, %37, %cst_24 [1] : vector<8x8xf32> to vector<8xf32>
    %39 = vector.shape_cast %38 : vector<8xf32> to vector<8x1xf32>
    %40 = vector.broadcast %39 : vector<8x1xf32> to vector<8x8xf32>
    %41 = arith.subf %37, %40 : vector<8x8xf32>
    %42 = math.exp %41 : vector<8x8xf32>
    %cst_25 = arith.constant dense<0.000000e+00> : vector<8xf32>
    %43 = vector.multi_reduction <add>, %42, %cst_25 [1] : vector<8x8xf32> to vector<8xf32>
    %44 = vector.shape_cast %43 : vector<8xf32> to vector<8x1xf32>
    %45 = tpu.reciprocal %44 {approx = true} : vector<8x1xf32> -> vector<8x1xf32>
    %46 = vector.broadcast %45 : vector<8x1xf32> to vector<8x8xf32>
    %47 = arith.mulf %42, %46 : vector<8x8xf32>
    %48 = vector.extract_strided_slice %29 {offsets = [0, 0], sizes = [8, 8], strides = [1, 1]} : vector<8x32xf32> to vector<8x8xf32>
    %cst_26 = arith.constant dense<0.000000e+00> : vector<8x8xf32>
    %49 = tpu.matmul %47, %48, %cst_26 {dimension_numbers = #tpu.dot_dimension_numbers<[1], [0], [0], [1], [0, 0, 1, 1], [], []>} : vector<8x8xf32>, vector<8x8xf32>, vector<8x8xf32> -> vector<8x8xf32>
    %50 = vector.extract_strided_slice %27 {offsets = [0, 8], sizes = [8, 8], strides = [1, 1]} : vector<8x32xf32> to vector<8x8xf32>
    %51 = vector.extract_strided_slice %28 {offsets = [0, 8], sizes = [8, 8], strides = [1, 1]} : vector<8x32xf32> to vector<8x8xf32>
    %cst_27 = arith.constant dense<0.000000e+00> : vector<8x8xf32>
    %52 = tpu.matmul %50, %51, %cst_27 {dimension_numbers = #tpu.dot_dimension_numbers<[1], [1], [0], [0], [0, 0, 1, 0], [], []>} : vector<8x8xf32>, vector<8x8xf32>, vector<8x8xf32> -> vector<8x8xf32>
    %53 = vector.extract_strided_slice %5 {offsets = [1, 0, 0], sizes = [1, 8, 8], strides = [1, 1, 1]} : vector<4x8x8xf32> to vector<1x8x8xf32>
    %54 = vector.shape_cast %53 : vector<1x8x8xf32> to vector<8x8xf32>
    %55 = arith.addf %52, %54 : vector<8x8xf32>
    %cst_28 = arith.constant dense<0xFF800000> : vector<8xf32>
    %56 = vector.multi_reduction <maximumf>, %55, %cst_28 [1] : vector<8x8xf32> to vector<8xf32>
    %57 = vector.shape_cast %56 : vector<8xf32> to vector<8x1xf32>
    %58 = vector.broadcast %57 : vector<8x1xf32> to vector<8x8xf32>
    %59 = arith.subf %55, %58 : vector<8x8xf32>
    %60 = math.exp %59 : vector<8x8xf32>
    %cst_29 = arith.constant dense<0.000000e+00> : vector<8xf32>
    %61 = vector.multi_reduction <add>, %60, %cst_29 [1] : vector<8x8xf32> to vector<8xf32>
    %62 = vector.shape_cast %61 : vector<8xf32> to vector<8x1xf32>
    %63 = tpu.reciprocal %62 {approx = true} : vector<8x1xf32> -> vector<8x1xf32>
    %64 = vector.broadcast %63 : vector<8x1xf32> to vector<8x8xf32>
    %65 = arith.mulf %60, %64 : vector<8x8xf32>
    %66 = vector.extract_strided_slice %29 {offsets = [0, 8], sizes = [8, 8], strides = [1, 1]} : vector<8x32xf32> to vector<8x8xf32>
    %cst_30 = arith.constant dense<0.000000e+00> : vector<8x8xf32>
    %67 = tpu.matmul %65, %66, %cst_30 {dimension_numbers = #tpu.dot_dimension_numbers<[1], [0], [0], [1], [0, 0, 1, 1], [], []>} : vector<8x8xf32>, vector<8x8xf32>, vector<8x8xf32> -> vector<8x8xf32>
    %68 = vector.extract_strided_slice %27 {offsets = [0, 16], sizes = [8, 8], strides = [1, 1]} : vector<8x32xf32> to vector<8x8xf32>
    %69 = vector.extract_strided_slice %28 {offsets = [0, 16], sizes = [8, 8], strides = [1, 1]} : vector<8x32xf32> to vector<8x8xf32>
    %cst_31 = arith.constant dense<0.000000e+00> : vector<8x8xf32>
    %70 = tpu.matmul %68, %69, %cst_31 {dimension_numbers = #tpu.dot_dimension_numbers<[1], [1], [0], [0], [0, 0, 1, 0], [], []>} : vector<8x8xf32>, vector<8x8xf32>, vector<8x8xf32> -> vector<8x8xf32>
    %71 = vector.extract_strided_slice %5 {offsets = [2, 0, 0], sizes = [1, 8, 8], strides = [1, 1, 1]} : vector<4x8x8xf32> to vector<1x8x8xf32>
    %72 = vector.shape_cast %71 : vector<1x8x8xf32> to vector<8x8xf32>
    %73 = arith.addf %70, %72 : vector<8x8xf32>
    %cst_32 = arith.constant dense<0xFF800000> : vector<8xf32>
    %74 = vector.multi_reduction <maximumf>, %73, %cst_32 [1] : vector<8x8xf32> to vector<8xf32>
    %75 = vector.shape_cast %74 : vector<8xf32> to vector<8x1xf32>
    %76 = vector.broadcast %75 : vector<8x1xf32> to vector<8x8xf32>
    %77 = arith.subf %73, %76 : vector<8x8xf32>
    %78 = math.exp %77 : vector<8x8xf32>
    %cst_33 = arith.constant dense<0.000000e+00> : vector<8xf32>
    %79 = vector.multi_reduction <add>, %78, %cst_33 [1] : vector<8x8xf32> to vector<8xf32>
    %80 = vector.shape_cast %79 : vector<8xf32> to vector<8x1xf32>
    %81 = tpu.reciprocal %80 {approx = true} : vector<8x1xf32> -> vector<8x1xf32>
    %82 = vector.broadcast %81 : vector<8x1xf32> to vector<8x8xf32>
    %83 = arith.mulf %78, %82 : vector<8x8xf32>
    %84 = vector.extract_strided_slice %29 {offsets = [0, 16], sizes = [8, 8], strides = [1, 1]} : vector<8x32xf32> to vector<8x8xf32>
    %cst_34 = arith.constant dense<0.000000e+00> : vector<8x8xf32>
    %85 = tpu.matmul %83, %84, %cst_34 {dimension_numbers = #tpu.dot_dimension_numbers<[1], [0], [0], [1], [0, 0, 1, 1], [], []>} : vector<8x8xf32>, vector<8x8xf32>, vector<8x8xf32> -> vector<8x8xf32>
    %86 = vector.extract_strided_slice %27 {offsets = [0, 24], sizes = [8, 8], strides = [1, 1]} : vector<8x32xf32> to vector<8x8xf32>
    %87 = vector.extract_strided_slice %28 {offsets = [0, 24], sizes = [8, 8], strides = [1, 1]} : vector<8x32xf32> to vector<8x8xf32>
    %cst_35 = arith.constant dense<0.000000e+00> : vector<8x8xf32>
    %88 = tpu.matmul %86, %87, %cst_35 {dimension_numbers = #tpu.dot_dimension_numbers<[1], [1], [0], [0], [0, 0, 1, 0], [], []>} : vector<8x8xf32>, vector<8x8xf32>, vector<8x8xf32> -> vector<8x8xf32>
    %89 = vector.extract_strided_slice %5 {offsets = [3, 0, 0], sizes = [1, 8, 8], strides = [1, 1, 1]} : vector<4x8x8xf32> to vector<1x8x8xf32>
    %90 = vector.shape_cast %89 : vector<1x8x8xf32> to vector<8x8xf32>
    %91 = arith.addf %88, %90 : vector<8x8xf32>
    %cst_36 = arith.constant dense<0xFF800000> : vector<8xf32>
    %92 = vector.multi_reduction <maximumf>, %91, %cst_36 [1] : vector<8x8xf32> to vector<8xf32>
    %93 = vector.shape_cast %92 : vector<8xf32> to vector<8x1xf32>
    %94 = vector.broadcast %93 : vector<8x1xf32> to vector<8x8xf32>
    %95 = arith.subf %91, %94 : vector<8x8xf32>
    %96 = math.exp %95 : vector<8x8xf32>
    %cst_37 = arith.constant dense<0.000000e+00> : vector<8xf32>
    %97 = vector.multi_reduction <add>, %96, %cst_37 [1] : vector<8x8xf32> to vector<8xf32>
    %98 = vector.shape_cast %97 : vector<8xf32> to vector<8x1xf32>
    %99 = tpu.reciprocal %98 {approx = true} : vector<8x1xf32> -> vector<8x1xf32>
    %100 = vector.broadcast %99 : vector<8x1xf32> to vector<8x8xf32>
    %101 = arith.mulf %96, %100 : vector<8x8xf32>
    %102 = vector.extract_strided_slice %29 {offsets = [0, 24], sizes = [8, 8], strides = [1, 1]} : vector<8x32xf32> to vector<8x8xf32>
    %cst_38 = arith.constant dense<0.000000e+00> : vector<8x8xf32>
    %103 = tpu.matmul %101, %102, %cst_38 {dimension_numbers = #tpu.dot_dimension_numbers<[1], [0], [0], [1], [0, 0, 1, 1], [], []>} : vector<8x8xf32>, vector<8x8xf32>, vector<8x8xf32> -> vector<8x8xf32>
    %104 = tpu.concatenate %49, %67, %85, %103 in 1 : vector<8x8xf32>, vector<8x8xf32>, vector<8x8xf32>, vector<8x8xf32> -> vector<8x32xf32>
    %105 = arith.truncf %104 : vector<8x32xf32> to vector<8x32xbf16>
    %cst_39 = arith.constant dense<0.000000e+00> : vector<8x32xf32>
    %106 = tpu.matmul %105, %31, %cst_39 {dimension_numbers = #tpu.dot_dimension_numbers<[1], [0], [0], [1], [0, 0, 1, 1], [], []>} : vector<8x32xbf16>, vector<32x32xbf16>, vector<8x32xf32> -> vector<8x32xf32>
    %107 = arith.addf %8, %106 : vector<8x32xf32>
    %c0_40 = arith.constant 0 : index
    %c0_41 = arith.constant 0 : index
    %c0_42 = arith.constant 0 : index
    %108 = vector.load %arg9[%c0_40, %c0_41, %c0_42] : memref<2x1x32xf32, #tpu.memory_space<vmem>>, vector<1x1x32xf32>
    %109 = vector.shape_cast %108 : vector<1x1x32xf32> to vector<1x32xf32>
    %110 = arith.mulf %107, %107 : vector<8x32xf32>
    %cst_43 = arith.constant dense<0.000000e+00> : vector<8xf32>
    %111 = vector.multi_reduction <add>, %110, %cst_43 [1] : vector<8x32xf32> to vector<8xf32>
    %112 = vector.shape_cast %111 : vector<8xf32> to vector<8x1xf32>
    %cst_44 = arith.constant 3.200000e+01 : f32
    %113 = vector.broadcast %cst_44 : f32 to vector<8x1xf32>
    %114 = arith.divf %112, %113 : vector<8x1xf32>
    %cst_45 = arith.constant 9.99999997E-7 : f32
    %115 = vector.broadcast %cst_45 : f32 to vector<8x1xf32>
    %116 = arith.addf %114, %115 : vector<8x1xf32>
    %117 = math.rsqrt %116 : vector<8x1xf32>
    %118 = vector.broadcast %117 : vector<8x1xf32> to vector<8x32xf32>
    %119 = arith.mulf %107, %118 : vector<8x32xf32>
    %120 = vector.broadcast %109 : vector<1x32xf32> to vector<8x32xf32>
    %121 = arith.mulf %119, %120 : vector<8x32xf32>
    %c0_46 = arith.constant 0 : index
    %c0_47 = arith.constant 0 : index
    %c0_48 = arith.constant 0 : index
    %122 = vector.load %arg10[%c0_46, %c0_47, %c0_48] : memref<2x32x64xbf16, #tpu.memory_space<vmem>>, vector<1x32x64xbf16>
    %123 = vector.shape_cast %122 : vector<1x32x64xbf16> to vector<32x64xbf16>
    %124 = arith.truncf %121 : vector<8x32xf32> to vector<8x32xbf16>
    %cst_49 = arith.constant dense<0.000000e+00> : vector<8x64xf32>
    %125 = tpu.matmul %124, %123, %cst_49 {dimension_numbers = #tpu.dot_dimension_numbers<[1], [0], [0], [1], [0, 0, 1, 1], [], []>} : vector<8x32xbf16>, vector<32x64xbf16>, vector<8x64xf32> -> vector<8x64xf32>
    %cst_50 = arith.constant 0.000000e+00 : f32
    %126 = vector.broadcast %cst_50 : f32 to vector<8x64xf32>
    %127 = arith.maximumf %125, %126 : vector<8x64xf32>
    %c0_51 = arith.constant 0 : index
    %c0_52 = arith.constant 0 : index
    %c0_53 = arith.constant 0 : index
    %128 = vector.load %arg11[%c0_51, %c0_52, %c0_53] : memref<2x64x32xbf16, #tpu.memory_space<vmem>>, vector<1x64x32xbf16>
    %129 = vector.shape_cast %128 : vector<1x64x32xbf16> to vector<64x32xbf16>
    %130 = arith.truncf %127 : vector<8x64xf32> to vector<8x64xbf16>
    %cst_54 = arith.constant dense<0.000000e+00> : vector<8x32xf32>
    %131 = tpu.matmul %130, %129, %cst_54 {dimension_numbers = #tpu.dot_dimension_numbers<[1], [0], [0], [1], [0, 0, 1, 1], [], []>} : vector<8x64xbf16>, vector<64x32xbf16>, vector<8x32xf32> -> vector<8x32xf32>
    %132 = arith.addf %107, %131 : vector<8x32xf32>
    %c1 = arith.constant 1 : index
    %c0_55 = arith.constant 0 : index
    %c0_56 = arith.constant 0 : index
    %133 = vector.load %arg6[%c1, %c0_55, %c0_56] : memref<2x1x32xf32, #tpu.memory_space<vmem>>, vector<1x1x32xf32>
    %134 = vector.shape_cast %133 : vector<1x1x32xf32> to vector<1x32xf32>
    %135 = arith.mulf %132, %132 : vector<8x32xf32>
    %cst_57 = arith.constant dense<0.000000e+00> : vector<8xf32>
    %136 = vector.multi_reduction <add>, %135, %cst_57 [1] : vector<8x32xf32> to vector<8xf32>
    %137 = vector.shape_cast %136 : vector<8xf32> to vector<8x1xf32>
    %cst_58 = arith.constant 3.200000e+01 : f32
    %138 = vector.broadcast %cst_58 : f32 to vector<8x1xf32>
    %139 = arith.divf %137, %138 : vector<8x1xf32>
    %cst_59 = arith.constant 9.99999997E-7 : f32
    %140 = vector.broadcast %cst_59 : f32 to vector<8x1xf32>
    %141 = arith.addf %139, %140 : vector<8x1xf32>
    %142 = math.rsqrt %141 : vector<8x1xf32>
    %143 = vector.broadcast %142 : vector<8x1xf32> to vector<8x32xf32>
    %144 = arith.mulf %132, %143 : vector<8x32xf32>
    %145 = vector.broadcast %134 : vector<1x32xf32> to vector<8x32xf32>
    %146 = arith.mulf %144, %145 : vector<8x32xf32>
    %c1_60 = arith.constant 1 : index
    %c0_61 = arith.constant 0 : index
    %c0_62 = arith.constant 0 : index
    %147 = vector.load %arg7[%c1_60, %c0_61, %c0_62] : memref<2x32x96xbf16, #tpu.memory_space<vmem>>, vector<1x32x96xbf16>
    %148 = vector.shape_cast %147 : vector<1x32x96xbf16> to vector<32x96xbf16>
    %149 = arith.truncf %146 : vector<8x32xf32> to vector<8x32xbf16>
    %cst_63 = arith.constant dense<0.000000e+00> : vector<8x96xf32>
    %150 = tpu.matmul %149, %148, %cst_63 {dimension_numbers = #tpu.dot_dimension_numbers<[1], [0], [0], [1], [0, 0, 1, 1], [], []>} : vector<8x32xbf16>, vector<32x96xbf16>, vector<8x96xf32> -> vector<8x96xf32>
    %151 = vector.extract_strided_slice %150 {offsets = [0, 0], sizes = [8, 32], strides = [1, 1]} : vector<8x96xf32> to vector<8x32xf32>
    %152 = vector.extract_strided_slice %150 {offsets = [0, 32], sizes = [8, 32], strides = [1, 1]} : vector<8x96xf32> to vector<8x32xf32>
    %153 = vector.extract_strided_slice %150 {offsets = [0, 64], sizes = [8, 32], strides = [1, 1]} : vector<8x96xf32> to vector<8x32xf32>
    %c1_64 = arith.constant 1 : index
    %c0_65 = arith.constant 0 : index
    %c0_66 = arith.constant 0 : index
    %154 = vector.load %arg8[%c1_64, %c0_65, %c0_66] : memref<2x32x32xbf16, #tpu.memory_space<vmem>>, vector<1x32x32xbf16>
    %155 = vector.shape_cast %154 : vector<1x32x32xbf16> to vector<32x32xbf16>
    %156 = vector.extract_strided_slice %151 {offsets = [0, 0], sizes = [8, 8], strides = [1, 1]} : vector<8x32xf32> to vector<8x8xf32>
    %157 = vector.extract_strided_slice %152 {offsets = [0, 0], sizes = [8, 8], strides = [1, 1]} : vector<8x32xf32> to vector<8x8xf32>
    %cst_67 = arith.constant dense<0.000000e+00> : vector<8x8xf32>
    %158 = tpu.matmul %156, %157, %cst_67 {dimension_numbers = #tpu.dot_dimension_numbers<[1], [1], [0], [0], [0, 0, 1, 0], [], []>} : vector<8x8xf32>, vector<8x8xf32>, vector<8x8xf32> -> vector<8x8xf32>
    %159 = vector.extract_strided_slice %5 {offsets = [0, 0, 0], sizes = [1, 8, 8], strides = [1, 1, 1]} : vector<4x8x8xf32> to vector<1x8x8xf32>
    %160 = vector.shape_cast %159 : vector<1x8x8xf32> to vector<8x8xf32>
    %161 = arith.addf %158, %160 : vector<8x8xf32>
    %cst_68 = arith.constant dense<0xFF800000> : vector<8xf32>
    %162 = vector.multi_reduction <maximumf>, %161, %cst_68 [1] : vector<8x8xf32> to vector<8xf32>
    %163 = vector.shape_cast %162 : vector<8xf32> to vector<8x1xf32>
    %164 = vector.broadcast %163 : vector<8x1xf32> to vector<8x8xf32>
    %165 = arith.subf %161, %164 : vector<8x8xf32>
    %166 = math.exp %165 : vector<8x8xf32>
    %cst_69 = arith.constant dense<0.000000e+00> : vector<8xf32>
    %167 = vector.multi_reduction <add>, %166, %cst_69 [1] : vector<8x8xf32> to vector<8xf32>
    %168 = vector.shape_cast %167 : vector<8xf32> to vector<8x1xf32>
    %169 = tpu.reciprocal %168 {approx = true} : vector<8x1xf32> -> vector<8x1xf32>
    %170 = vector.broadcast %169 : vector<8x1xf32> to vector<8x8xf32>
    %171 = arith.mulf %166, %170 : vector<8x8xf32>
    %172 = vector.extract_strided_slice %153 {offsets = [0, 0], sizes = [8, 8], strides = [1, 1]} : vector<8x32xf32> to vector<8x8xf32>
    %cst_70 = arith.constant dense<0.000000e+00> : vector<8x8xf32>
    %173 = tpu.matmul %171, %172, %cst_70 {dimension_numbers = #tpu.dot_dimension_numbers<[1], [0], [0], [1], [0, 0, 1, 1], [], []>} : vector<8x8xf32>, vector<8x8xf32>, vector<8x8xf32> -> vector<8x8xf32>
    %174 = vector.extract_strided_slice %151 {offsets = [0, 8], sizes = [8, 8], strides = [1, 1]} : vector<8x32xf32> to vector<8x8xf32>
    %175 = vector.extract_strided_slice %152 {offsets = [0, 8], sizes = [8, 8], strides = [1, 1]} : vector<8x32xf32> to vector<8x8xf32>
    %cst_71 = arith.constant dense<0.000000e+00> : vector<8x8xf32>
    %176 = tpu.matmul %174, %175, %cst_71 {dimension_numbers = #tpu.dot_dimension_numbers<[1], [1], [0], [0], [0, 0, 1, 0], [], []>} : vector<8x8xf32>, vector<8x8xf32>, vector<8x8xf32> -> vector<8x8xf32>
    %177 = vector.extract_strided_slice %5 {offsets = [1, 0, 0], sizes = [1, 8, 8], strides = [1, 1, 1]} : vector<4x8x8xf32> to vector<1x8x8xf32>
    %178 = vector.shape_cast %177 : vector<1x8x8xf32> to vector<8x8xf32>
    %179 = arith.addf %176, %178 : vector<8x8xf32>
    %cst_72 = arith.constant dense<0xFF800000> : vector<8xf32>
    %180 = vector.multi_reduction <maximumf>, %179, %cst_72 [1] : vector<8x8xf32> to vector<8xf32>
    %181 = vector.shape_cast %180 : vector<8xf32> to vector<8x1xf32>
    %182 = vector.broadcast %181 : vector<8x1xf32> to vector<8x8xf32>
    %183 = arith.subf %179, %182 : vector<8x8xf32>
    %184 = math.exp %183 : vector<8x8xf32>
    %cst_73 = arith.constant dense<0.000000e+00> : vector<8xf32>
    %185 = vector.multi_reduction <add>, %184, %cst_73 [1] : vector<8x8xf32> to vector<8xf32>
    %186 = vector.shape_cast %185 : vector<8xf32> to vector<8x1xf32>
    %187 = tpu.reciprocal %186 {approx = true} : vector<8x1xf32> -> vector<8x1xf32>
    %188 = vector.broadcast %187 : vector<8x1xf32> to vector<8x8xf32>
    %189 = arith.mulf %184, %188 : vector<8x8xf32>
    %190 = vector.extract_strided_slice %153 {offsets = [0, 8], sizes = [8, 8], strides = [1, 1]} : vector<8x32xf32> to vector<8x8xf32>
    %cst_74 = arith.constant dense<0.000000e+00> : vector<8x8xf32>
    %191 = tpu.matmul %189, %190, %cst_74 {dimension_numbers = #tpu.dot_dimension_numbers<[1], [0], [0], [1], [0, 0, 1, 1], [], []>} : vector<8x8xf32>, vector<8x8xf32>, vector<8x8xf32> -> vector<8x8xf32>
    %192 = vector.extract_strided_slice %151 {offsets = [0, 16], sizes = [8, 8], strides = [1, 1]} : vector<8x32xf32> to vector<8x8xf32>
    %193 = vector.extract_strided_slice %152 {offsets = [0, 16], sizes = [8, 8], strides = [1, 1]} : vector<8x32xf32> to vector<8x8xf32>
    %cst_75 = arith.constant dense<0.000000e+00> : vector<8x8xf32>
    %194 = tpu.matmul %192, %193, %cst_75 {dimension_numbers = #tpu.dot_dimension_numbers<[1], [1], [0], [0], [0, 0, 1, 0], [], []>} : vector<8x8xf32>, vector<8x8xf32>, vector<8x8xf32> -> vector<8x8xf32>
    %195 = vector.extract_strided_slice %5 {offsets = [2, 0, 0], sizes = [1, 8, 8], strides = [1, 1, 1]} : vector<4x8x8xf32> to vector<1x8x8xf32>
    %196 = vector.shape_cast %195 : vector<1x8x8xf32> to vector<8x8xf32>
    %197 = arith.addf %194, %196 : vector<8x8xf32>
    %cst_76 = arith.constant dense<0xFF800000> : vector<8xf32>
    %198 = vector.multi_reduction <maximumf>, %197, %cst_76 [1] : vector<8x8xf32> to vector<8xf32>
    %199 = vector.shape_cast %198 : vector<8xf32> to vector<8x1xf32>
    %200 = vector.broadcast %199 : vector<8x1xf32> to vector<8x8xf32>
    %201 = arith.subf %197, %200 : vector<8x8xf32>
    %202 = math.exp %201 : vector<8x8xf32>
    %cst_77 = arith.constant dense<0.000000e+00> : vector<8xf32>
    %203 = vector.multi_reduction <add>, %202, %cst_77 [1] : vector<8x8xf32> to vector<8xf32>
    %204 = vector.shape_cast %203 : vector<8xf32> to vector<8x1xf32>
    %205 = tpu.reciprocal %204 {approx = true} : vector<8x1xf32> -> vector<8x1xf32>
    %206 = vector.broadcast %205 : vector<8x1xf32> to vector<8x8xf32>
    %207 = arith.mulf %202, %206 : vector<8x8xf32>
    %208 = vector.extract_strided_slice %153 {offsets = [0, 16], sizes = [8, 8], strides = [1, 1]} : vector<8x32xf32> to vector<8x8xf32>
    %cst_78 = arith.constant dense<0.000000e+00> : vector<8x8xf32>
    %209 = tpu.matmul %207, %208, %cst_78 {dimension_numbers = #tpu.dot_dimension_numbers<[1], [0], [0], [1], [0, 0, 1, 1], [], []>} : vector<8x8xf32>, vector<8x8xf32>, vector<8x8xf32> -> vector<8x8xf32>
    %210 = vector.extract_strided_slice %151 {offsets = [0, 24], sizes = [8, 8], strides = [1, 1]} : vector<8x32xf32> to vector<8x8xf32>
    %211 = vector.extract_strided_slice %152 {offsets = [0, 24], sizes = [8, 8], strides = [1, 1]} : vector<8x32xf32> to vector<8x8xf32>
    %cst_79 = arith.constant dense<0.000000e+00> : vector<8x8xf32>
    %212 = tpu.matmul %210, %211, %cst_79 {dimension_numbers = #tpu.dot_dimension_numbers<[1], [1], [0], [0], [0, 0, 1, 0], [], []>} : vector<8x8xf32>, vector<8x8xf32>, vector<8x8xf32> -> vector<8x8xf32>
    %213 = vector.extract_strided_slice %5 {offsets = [3, 0, 0], sizes = [1, 8, 8], strides = [1, 1, 1]} : vector<4x8x8xf32> to vector<1x8x8xf32>
    %214 = vector.shape_cast %213 : vector<1x8x8xf32> to vector<8x8xf32>
    %215 = arith.addf %212, %214 : vector<8x8xf32>
    %cst_80 = arith.constant dense<0xFF800000> : vector<8xf32>
    %216 = vector.multi_reduction <maximumf>, %215, %cst_80 [1] : vector<8x8xf32> to vector<8xf32>
    %217 = vector.shape_cast %216 : vector<8xf32> to vector<8x1xf32>
    %218 = vector.broadcast %217 : vector<8x1xf32> to vector<8x8xf32>
    %219 = arith.subf %215, %218 : vector<8x8xf32>
    %220 = math.exp %219 : vector<8x8xf32>
    %cst_81 = arith.constant dense<0.000000e+00> : vector<8xf32>
    %221 = vector.multi_reduction <add>, %220, %cst_81 [1] : vector<8x8xf32> to vector<8xf32>
    %222 = vector.shape_cast %221 : vector<8xf32> to vector<8x1xf32>
    %223 = tpu.reciprocal %222 {approx = true} : vector<8x1xf32> -> vector<8x1xf32>
    %224 = vector.broadcast %223 : vector<8x1xf32> to vector<8x8xf32>
    %225 = arith.mulf %220, %224 : vector<8x8xf32>
    %226 = vector.extract_strided_slice %153 {offsets = [0, 24], sizes = [8, 8], strides = [1, 1]} : vector<8x32xf32> to vector<8x8xf32>
    %cst_82 = arith.constant dense<0.000000e+00> : vector<8x8xf32>
    %227 = tpu.matmul %225, %226, %cst_82 {dimension_numbers = #tpu.dot_dimension_numbers<[1], [0], [0], [1], [0, 0, 1, 1], [], []>} : vector<8x8xf32>, vector<8x8xf32>, vector<8x8xf32> -> vector<8x8xf32>
    %228 = tpu.concatenate %173, %191, %209, %227 in 1 : vector<8x8xf32>, vector<8x8xf32>, vector<8x8xf32>, vector<8x8xf32> -> vector<8x32xf32>
    %229 = arith.truncf %228 : vector<8x32xf32> to vector<8x32xbf16>
    %cst_83 = arith.constant dense<0.000000e+00> : vector<8x32xf32>
    %230 = tpu.matmul %229, %155, %cst_83 {dimension_numbers = #tpu.dot_dimension_numbers<[1], [0], [0], [1], [0, 0, 1, 1], [], []>} : vector<8x32xbf16>, vector<32x32xbf16>, vector<8x32xf32> -> vector<8x32xf32>
    %231 = arith.addf %132, %230 : vector<8x32xf32>
    %c1_84 = arith.constant 1 : index
    %c0_85 = arith.constant 0 : index
    %c0_86 = arith.constant 0 : index
    %232 = vector.load %arg9[%c1_84, %c0_85, %c0_86] : memref<2x1x32xf32, #tpu.memory_space<vmem>>, vector<1x1x32xf32>
    %233 = vector.shape_cast %232 : vector<1x1x32xf32> to vector<1x32xf32>
    %234 = arith.mulf %231, %231 : vector<8x32xf32>
    %cst_87 = arith.constant dense<0.000000e+00> : vector<8xf32>
    %235 = vector.multi_reduction <add>, %234, %cst_87 [1] : vector<8x32xf32> to vector<8xf32>
    %236 = vector.shape_cast %235 : vector<8xf32> to vector<8x1xf32>
    %cst_88 = arith.constant 3.200000e+01 : f32
    %237 = vector.broadcast %cst_88 : f32 to vector<8x1xf32>
    %238 = arith.divf %236, %237 : vector<8x1xf32>
    %cst_89 = arith.constant 9.99999997E-7 : f32
    %239 = vector.broadcast %cst_89 : f32 to vector<8x1xf32>
    %240 = arith.addf %238, %239 : vector<8x1xf32>
    %241 = math.rsqrt %240 : vector<8x1xf32>
    %242 = vector.broadcast %241 : vector<8x1xf32> to vector<8x32xf32>
    %243 = arith.mulf %231, %242 : vector<8x32xf32>
    %244 = vector.broadcast %233 : vector<1x32xf32> to vector<8x32xf32>
    %245 = arith.mulf %243, %244 : vector<8x32xf32>
    %c1_90 = arith.constant 1 : index
    %c0_91 = arith.constant 0 : index
    %c0_92 = arith.constant 0 : index
    %246 = vector.load %arg10[%c1_90, %c0_91, %c0_92] : memref<2x32x64xbf16, #tpu.memory_space<vmem>>, vector<1x32x64xbf16>
    %247 = vector.shape_cast %246 : vector<1x32x64xbf16> to vector<32x64xbf16>
    %248 = arith.truncf %245 : vector<8x32xf32> to vector<8x32xbf16>
    %cst_93 = arith.constant dense<0.000000e+00> : vector<8x64xf32>
    %249 = tpu.matmul %248, %247, %cst_93 {dimension_numbers = #tpu.dot_dimension_numbers<[1], [0], [0], [1], [0, 0, 1, 1], [], []>} : vector<8x32xbf16>, vector<32x64xbf16>, vector<8x64xf32> -> vector<8x64xf32>
    %cst_94 = arith.constant 0.000000e+00 : f32
    %250 = vector.broadcast %cst_94 : f32 to vector<8x64xf32>
    %251 = arith.maximumf %249, %250 : vector<8x64xf32>
    %c1_95 = arith.constant 1 : index
    %c0_96 = arith.constant 0 : index
    %c0_97 = arith.constant 0 : index
    %252 = vector.load %arg11[%c1_95, %c0_96, %c0_97] : memref<2x64x32xbf16, #tpu.memory_space<vmem>>, vector<1x64x32xbf16>
    %253 = vector.shape_cast %252 : vector<1x64x32xbf16> to vector<64x32xbf16>
    %254 = arith.truncf %251 : vector<8x64xf32> to vector<8x64xbf16>
    %cst_98 = arith.constant dense<0.000000e+00> : vector<8x32xf32>
    %255 = tpu.matmul %254, %253, %cst_98 {dimension_numbers = #tpu.dot_dimension_numbers<[1], [0], [0], [1], [0, 0, 1, 1], [], []>} : vector<8x64xbf16>, vector<64x32xbf16>, vector<8x32xf32> -> vector<8x32xf32>
    %256 = arith.addf %231, %255 : vector<8x32xf32>
    %c0_99 = arith.constant 0 : index
    %c0_100 = arith.constant 0 : index
    %257 = vector.load %arg12[%c0_99, %c0_100] : memref<1x32xf32, #tpu.memory_space<vmem>>, vector<1x32xf32>
    %258 = arith.mulf %256, %256 : vector<8x32xf32>
    %cst_101 = arith.constant dense<0.000000e+00> : vector<8xf32>
    %259 = vector.multi_reduction <add>, %258, %cst_101 [1] : vector<8x32xf32> to vector<8xf32>
    %260 = vector.shape_cast %259 : vector<8xf32> to vector<8x1xf32>
    %cst_102 = arith.constant 3.200000e+01 : f32
    %261 = vector.broadcast %cst_102 : f32 to vector<8x1xf32>
    %262 = arith.divf %260, %261 : vector<8x1xf32>
    %cst_103 = arith.constant 9.99999997E-7 : f32
    %263 = vector.broadcast %cst_103 : f32 to vector<8x1xf32>
    %264 = arith.addf %262, %263 : vector<8x1xf32>
    %265 = math.rsqrt %264 : vector<8x1xf32>
    %266 = vector.broadcast %265 : vector<8x1xf32> to vector<8x32xf32>
    %267 = arith.mulf %256, %266 : vector<8x32xf32>
    %268 = vector.broadcast %257 : vector<1x32xf32> to vector<8x32xf32>
    %269 = arith.mulf %267, %268 : vector<8x32xf32>
    %c0_104 = arith.constant 0 : index
    %c0_105 = arith.constant 0 : index
    %c0_106 = arith.constant 0 : index
    %270 = vector.load %arg2[%c0_104, %c0_105, %c0_106] : memref<1x8x32xf32, #tpu.memory_space<vmem>>, vector<1x8x32xf32>
    %271 = vector.shape_cast %270 : vector<1x8x32xf32> to vector<8x32xf32>
    %c0_107 = arith.constant 0 : index
    %c0_108 = arith.constant 0 : index
    %c0_109 = arith.constant 0 : index
    %272 = vector.load %arg13[%c0_107, %c0_108, %c0_109] : memref<2x1x32xf32, #tpu.memory_space<vmem>>, vector<1x1x32xf32>
    %273 = vector.shape_cast %272 : vector<1x1x32xf32> to vector<1x32xf32>
    %274 = arith.mulf %271, %271 : vector<8x32xf32>
    %cst_110 = arith.constant dense<0.000000e+00> : vector<8xf32>
    %275 = vector.multi_reduction <add>, %274, %cst_110 [1] : vector<8x32xf32> to vector<8xf32>
    %276 = vector.shape_cast %275 : vector<8xf32> to vector<8x1xf32>
    %cst_111 = arith.constant 3.200000e+01 : f32
    %277 = vector.broadcast %cst_111 : f32 to vector<8x1xf32>
    %278 = arith.divf %276, %277 : vector<8x1xf32>
    %cst_112 = arith.constant 9.99999997E-7 : f32
    %279 = vector.broadcast %cst_112 : f32 to vector<8x1xf32>
    %280 = arith.addf %278, %279 : vector<8x1xf32>
    %281 = math.rsqrt %280 : vector<8x1xf32>
    %282 = vector.broadcast %281 : vector<8x1xf32> to vector<8x32xf32>
    %283 = arith.mulf %271, %282 : vector<8x32xf32>
    %284 = vector.broadcast %273 : vector<1x32xf32> to vector<8x32xf32>
    %285 = arith.mulf %283, %284 : vector<8x32xf32>
    %c0_113 = arith.constant 0 : index
    %c0_114 = arith.constant 0 : index
    %c0_115 = arith.constant 0 : index
    %286 = vector.load %arg14[%c0_113, %c0_114, %c0_115] : memref<2x32x96xbf16, #tpu.memory_space<vmem>>, vector<1x32x96xbf16>
    %287 = vector.shape_cast %286 : vector<1x32x96xbf16> to vector<32x96xbf16>
    %288 = arith.truncf %285 : vector<8x32xf32> to vector<8x32xbf16>
    %cst_116 = arith.constant dense<0.000000e+00> : vector<8x96xf32>
    %289 = tpu.matmul %288, %287, %cst_116 {dimension_numbers = #tpu.dot_dimension_numbers<[1], [0], [0], [1], [0, 0, 1, 1], [], []>} : vector<8x32xbf16>, vector<32x96xbf16>, vector<8x96xf32> -> vector<8x96xf32>
    %290 = vector.extract_strided_slice %289 {offsets = [0, 0], sizes = [8, 32], strides = [1, 1]} : vector<8x96xf32> to vector<8x32xf32>
    %291 = vector.extract_strided_slice %289 {offsets = [0, 32], sizes = [8, 32], strides = [1, 1]} : vector<8x96xf32> to vector<8x32xf32>
    %292 = vector.extract_strided_slice %289 {offsets = [0, 64], sizes = [8, 32], strides = [1, 1]} : vector<8x96xf32> to vector<8x32xf32>
    %c0_117 = arith.constant 0 : index
    %c0_118 = arith.constant 0 : index
    %c0_119 = arith.constant 0 : index
    %293 = vector.load %arg15[%c0_117, %c0_118, %c0_119] : memref<2x32x32xbf16, #tpu.memory_space<vmem>>, vector<1x32x32xbf16>
    %294 = vector.shape_cast %293 : vector<1x32x32xbf16> to vector<32x32xbf16>
    %295 = vector.extract_strided_slice %290 {offsets = [0, 0], sizes = [8, 8], strides = [1, 1]} : vector<8x32xf32> to vector<8x8xf32>
    %296 = vector.extract_strided_slice %291 {offsets = [0, 0], sizes = [8, 8], strides = [1, 1]} : vector<8x32xf32> to vector<8x8xf32>
    %cst_120 = arith.constant dense<0.000000e+00> : vector<8x8xf32>
    %297 = tpu.matmul %295, %296, %cst_120 {dimension_numbers = #tpu.dot_dimension_numbers<[1], [1], [0], [0], [0, 0, 1, 0], [], []>} : vector<8x8xf32>, vector<8x8xf32>, vector<8x8xf32> -> vector<8x8xf32>
    %298 = vector.extract_strided_slice %6 {offsets = [0, 0, 0], sizes = [1, 8, 8], strides = [1, 1, 1]} : vector<4x8x8xf32> to vector<1x8x8xf32>
    %299 = vector.shape_cast %298 : vector<1x8x8xf32> to vector<8x8xf32>
    %300 = arith.addf %297, %299 : vector<8x8xf32>
    %cst_121 = arith.constant dense<0xFF800000> : vector<8xf32>
    %301 = vector.multi_reduction <maximumf>, %300, %cst_121 [1] : vector<8x8xf32> to vector<8xf32>
    %302 = vector.shape_cast %301 : vector<8xf32> to vector<8x1xf32>
    %303 = vector.broadcast %302 : vector<8x1xf32> to vector<8x8xf32>
    %304 = arith.subf %300, %303 : vector<8x8xf32>
    %305 = math.exp %304 : vector<8x8xf32>
    %cst_122 = arith.constant dense<0.000000e+00> : vector<8xf32>
    %306 = vector.multi_reduction <add>, %305, %cst_122 [1] : vector<8x8xf32> to vector<8xf32>
    %307 = vector.shape_cast %306 : vector<8xf32> to vector<8x1xf32>
    %308 = tpu.reciprocal %307 {approx = true} : vector<8x1xf32> -> vector<8x1xf32>
    %309 = vector.broadcast %308 : vector<8x1xf32> to vector<8x8xf32>
    %310 = arith.mulf %305, %309 : vector<8x8xf32>
    %311 = vector.extract_strided_slice %292 {offsets = [0, 0], sizes = [8, 8], strides = [1, 1]} : vector<8x32xf32> to vector<8x8xf32>
    %cst_123 = arith.constant dense<0.000000e+00> : vector<8x8xf32>
    %312 = tpu.matmul %310, %311, %cst_123 {dimension_numbers = #tpu.dot_dimension_numbers<[1], [0], [0], [1], [0, 0, 1, 1], [], []>} : vector<8x8xf32>, vector<8x8xf32>, vector<8x8xf32> -> vector<8x8xf32>
    %313 = vector.extract_strided_slice %290 {offsets = [0, 8], sizes = [8, 8], strides = [1, 1]} : vector<8x32xf32> to vector<8x8xf32>
    %314 = vector.extract_strided_slice %291 {offsets = [0, 8], sizes = [8, 8], strides = [1, 1]} : vector<8x32xf32> to vector<8x8xf32>
    %cst_124 = arith.constant dense<0.000000e+00> : vector<8x8xf32>
    %315 = tpu.matmul %313, %314, %cst_124 {dimension_numbers = #tpu.dot_dimension_numbers<[1], [1], [0], [0], [0, 0, 1, 0], [], []>} : vector<8x8xf32>, vector<8x8xf32>, vector<8x8xf32> -> vector<8x8xf32>
    %316 = vector.extract_strided_slice %6 {offsets = [1, 0, 0], sizes = [1, 8, 8], strides = [1, 1, 1]} : vector<4x8x8xf32> to vector<1x8x8xf32>
    %317 = vector.shape_cast %316 : vector<1x8x8xf32> to vector<8x8xf32>
    %318 = arith.addf %315, %317 : vector<8x8xf32>
    %cst_125 = arith.constant dense<0xFF800000> : vector<8xf32>
    %319 = vector.multi_reduction <maximumf>, %318, %cst_125 [1] : vector<8x8xf32> to vector<8xf32>
    %320 = vector.shape_cast %319 : vector<8xf32> to vector<8x1xf32>
    %321 = vector.broadcast %320 : vector<8x1xf32> to vector<8x8xf32>
    %322 = arith.subf %318, %321 : vector<8x8xf32>
    %323 = math.exp %322 : vector<8x8xf32>
    %cst_126 = arith.constant dense<0.000000e+00> : vector<8xf32>
    %324 = vector.multi_reduction <add>, %323, %cst_126 [1] : vector<8x8xf32> to vector<8xf32>
    %325 = vector.shape_cast %324 : vector<8xf32> to vector<8x1xf32>
    %326 = tpu.reciprocal %325 {approx = true} : vector<8x1xf32> -> vector<8x1xf32>
    %327 = vector.broadcast %326 : vector<8x1xf32> to vector<8x8xf32>
    %328 = arith.mulf %323, %327 : vector<8x8xf32>
    %329 = vector.extract_strided_slice %292 {offsets = [0, 8], sizes = [8, 8], strides = [1, 1]} : vector<8x32xf32> to vector<8x8xf32>
    %cst_127 = arith.constant dense<0.000000e+00> : vector<8x8xf32>
    %330 = tpu.matmul %328, %329, %cst_127 {dimension_numbers = #tpu.dot_dimension_numbers<[1], [0], [0], [1], [0, 0, 1, 1], [], []>} : vector<8x8xf32>, vector<8x8xf32>, vector<8x8xf32> -> vector<8x8xf32>
    %331 = vector.extract_strided_slice %290 {offsets = [0, 16], sizes = [8, 8], strides = [1, 1]} : vector<8x32xf32> to vector<8x8xf32>
    %332 = vector.extract_strided_slice %291 {offsets = [0, 16], sizes = [8, 8], strides = [1, 1]} : vector<8x32xf32> to vector<8x8xf32>
    %cst_128 = arith.constant dense<0.000000e+00> : vector<8x8xf32>
    %333 = tpu.matmul %331, %332, %cst_128 {dimension_numbers = #tpu.dot_dimension_numbers<[1], [1], [0], [0], [0, 0, 1, 0], [], []>} : vector<8x8xf32>, vector<8x8xf32>, vector<8x8xf32> -> vector<8x8xf32>
    %334 = vector.extract_strided_slice %6 {offsets = [2, 0, 0], sizes = [1, 8, 8], strides = [1, 1, 1]} : vector<4x8x8xf32> to vector<1x8x8xf32>
    %335 = vector.shape_cast %334 : vector<1x8x8xf32> to vector<8x8xf32>
    %336 = arith.addf %333, %335 : vector<8x8xf32>
    %cst_129 = arith.constant dense<0xFF800000> : vector<8xf32>
    %337 = vector.multi_reduction <maximumf>, %336, %cst_129 [1] : vector<8x8xf32> to vector<8xf32>
    %338 = vector.shape_cast %337 : vector<8xf32> to vector<8x1xf32>
    %339 = vector.broadcast %338 : vector<8x1xf32> to vector<8x8xf32>
    %340 = arith.subf %336, %339 : vector<8x8xf32>
    %341 = math.exp %340 : vector<8x8xf32>
    %cst_130 = arith.constant dense<0.000000e+00> : vector<8xf32>
    %342 = vector.multi_reduction <add>, %341, %cst_130 [1] : vector<8x8xf32> to vector<8xf32>
    %343 = vector.shape_cast %342 : vector<8xf32> to vector<8x1xf32>
    %344 = tpu.reciprocal %343 {approx = true} : vector<8x1xf32> -> vector<8x1xf32>
    %345 = vector.broadcast %344 : vector<8x1xf32> to vector<8x8xf32>
    %346 = arith.mulf %341, %345 : vector<8x8xf32>
    %347 = vector.extract_strided_slice %292 {offsets = [0, 16], sizes = [8, 8], strides = [1, 1]} : vector<8x32xf32> to vector<8x8xf32>
    %cst_131 = arith.constant dense<0.000000e+00> : vector<8x8xf32>
    %348 = tpu.matmul %346, %347, %cst_131 {dimension_numbers = #tpu.dot_dimension_numbers<[1], [0], [0], [1], [0, 0, 1, 1], [], []>} : vector<8x8xf32>, vector<8x8xf32>, vector<8x8xf32> -> vector<8x8xf32>
    %349 = vector.extract_strided_slice %290 {offsets = [0, 24], sizes = [8, 8], strides = [1, 1]} : vector<8x32xf32> to vector<8x8xf32>
    %350 = vector.extract_strided_slice %291 {offsets = [0, 24], sizes = [8, 8], strides = [1, 1]} : vector<8x32xf32> to vector<8x8xf32>
    %cst_132 = arith.constant dense<0.000000e+00> : vector<8x8xf32>
    %351 = tpu.matmul %349, %350, %cst_132 {dimension_numbers = #tpu.dot_dimension_numbers<[1], [1], [0], [0], [0, 0, 1, 0], [], []>} : vector<8x8xf32>, vector<8x8xf32>, vector<8x8xf32> -> vector<8x8xf32>
    %352 = vector.extract_strided_slice %6 {offsets = [3, 0, 0], sizes = [1, 8, 8], strides = [1, 1, 1]} : vector<4x8x8xf32> to vector<1x8x8xf32>
    %353 = vector.shape_cast %352 : vector<1x8x8xf32> to vector<8x8xf32>
    %354 = arith.addf %351, %353 : vector<8x8xf32>
    %cst_133 = arith.constant dense<0xFF800000> : vector<8xf32>
    %355 = vector.multi_reduction <maximumf>, %354, %cst_133 [1] : vector<8x8xf32> to vector<8xf32>
    %356 = vector.shape_cast %355 : vector<8xf32> to vector<8x1xf32>
    %357 = vector.broadcast %356 : vector<8x1xf32> to vector<8x8xf32>
    %358 = arith.subf %354, %357 : vector<8x8xf32>
    %359 = math.exp %358 : vector<8x8xf32>
    %cst_134 = arith.constant dense<0.000000e+00> : vector<8xf32>
    %360 = vector.multi_reduction <add>, %359, %cst_134 [1] : vector<8x8xf32> to vector<8xf32>
    %361 = vector.shape_cast %360 : vector<8xf32> to vector<8x1xf32>
    %362 = tpu.reciprocal %361 {approx = true} : vector<8x1xf32> -> vector<8x1xf32>
    %363 = vector.broadcast %362 : vector<8x1xf32> to vector<8x8xf32>
    %364 = arith.mulf %359, %363 : vector<8x8xf32>
    %365 = vector.extract_strided_slice %292 {offsets = [0, 24], sizes = [8, 8], strides = [1, 1]} : vector<8x32xf32> to vector<8x8xf32>
    %cst_135 = arith.constant dense<0.000000e+00> : vector<8x8xf32>
    %366 = tpu.matmul %364, %365, %cst_135 {dimension_numbers = #tpu.dot_dimension_numbers<[1], [0], [0], [1], [0, 0, 1, 1], [], []>} : vector<8x8xf32>, vector<8x8xf32>, vector<8x8xf32> -> vector<8x8xf32>
    %367 = tpu.concatenate %312, %330, %348, %366 in 1 : vector<8x8xf32>, vector<8x8xf32>, vector<8x8xf32>, vector<8x8xf32> -> vector<8x32xf32>
    %368 = arith.truncf %367 : vector<8x32xf32> to vector<8x32xbf16>
    %cst_136 = arith.constant dense<0.000000e+00> : vector<8x32xf32>
    %369 = tpu.matmul %368, %294, %cst_136 {dimension_numbers = #tpu.dot_dimension_numbers<[1], [0], [0], [1], [0, 0, 1, 1], [], []>} : vector<8x32xbf16>, vector<32x32xbf16>, vector<8x32xf32> -> vector<8x32xf32>
    %370 = arith.addf %271, %369 : vector<8x32xf32>
    %c0_137 = arith.constant 0 : index
    %c0_138 = arith.constant 0 : index
    %c0_139 = arith.constant 0 : index
    %371 = vector.load %arg16[%c0_137, %c0_138, %c0_139] : memref<2x1x32xf32, #tpu.memory_space<vmem>>, vector<1x1x32xf32>
    %372 = vector.shape_cast %371 : vector<1x1x32xf32> to vector<1x32xf32>
    %373 = arith.mulf %370, %370 : vector<8x32xf32>
    %cst_140 = arith.constant dense<0.000000e+00> : vector<8xf32>
    %374 = vector.multi_reduction <add>, %373, %cst_140 [1] : vector<8x32xf32> to vector<8xf32>
    %375 = vector.shape_cast %374 : vector<8xf32> to vector<8x1xf32>
    %cst_141 = arith.constant 3.200000e+01 : f32
    %376 = vector.broadcast %cst_141 : f32 to vector<8x1xf32>
    %377 = arith.divf %375, %376 : vector<8x1xf32>
    %cst_142 = arith.constant 9.99999997E-7 : f32
    %378 = vector.broadcast %cst_142 : f32 to vector<8x1xf32>
    %379 = arith.addf %377, %378 : vector<8x1xf32>
    %380 = math.rsqrt %379 : vector<8x1xf32>
    %381 = vector.broadcast %380 : vector<8x1xf32> to vector<8x32xf32>
    %382 = arith.mulf %370, %381 : vector<8x32xf32>
    %383 = vector.broadcast %372 : vector<1x32xf32> to vector<8x32xf32>
    %384 = arith.mulf %382, %383 : vector<8x32xf32>
    %c0_143 = arith.constant 0 : index
    %c0_144 = arith.constant 0 : index
    %c0_145 = arith.constant 0 : index
    %385 = vector.load %arg17[%c0_143, %c0_144, %c0_145] : memref<2x32x32xbf16, #tpu.memory_space<vmem>>, vector<1x32x32xbf16>
    %386 = vector.shape_cast %385 : vector<1x32x32xbf16> to vector<32x32xbf16>
    %387 = arith.truncf %384 : vector<8x32xf32> to vector<8x32xbf16>
    %cst_146 = arith.constant dense<0.000000e+00> : vector<8x32xf32>
    %388 = tpu.matmul %387, %386, %cst_146 {dimension_numbers = #tpu.dot_dimension_numbers<[1], [0], [0], [1], [0, 0, 1, 1], [], []>} : vector<8x32xbf16>, vector<32x32xbf16>, vector<8x32xf32> -> vector<8x32xf32>
    %c0_147 = arith.constant 0 : index
    %c0_148 = arith.constant 0 : index
    %c0_149 = arith.constant 0 : index
    %389 = vector.load %arg18[%c0_147, %c0_148, %c0_149] : memref<2x32x64xbf16, #tpu.memory_space<vmem>>, vector<1x32x64xbf16>
    %390 = vector.shape_cast %389 : vector<1x32x64xbf16> to vector<32x64xbf16>
    %391 = arith.truncf %269 : vector<8x32xf32> to vector<8x32xbf16>
    %cst_150 = arith.constant dense<0.000000e+00> : vector<8x64xf32>
    %392 = tpu.matmul %391, %390, %cst_150 {dimension_numbers = #tpu.dot_dimension_numbers<[1], [0], [0], [1], [0, 0, 1, 1], [], []>} : vector<8x32xbf16>, vector<32x64xbf16>, vector<8x64xf32> -> vector<8x64xf32>
    %393 = vector.extract_strided_slice %392 {offsets = [0, 0], sizes = [8, 32], strides = [1, 1]} : vector<8x64xf32> to vector<8x32xf32>
    %394 = vector.extract_strided_slice %392 {offsets = [0, 32], sizes = [8, 32], strides = [1, 1]} : vector<8x64xf32> to vector<8x32xf32>
    %c0_151 = arith.constant 0 : index
    %c0_152 = arith.constant 0 : index
    %c0_153 = arith.constant 0 : index
    %395 = vector.load %arg19[%c0_151, %c0_152, %c0_153] : memref<2x32x32xbf16, #tpu.memory_space<vmem>>, vector<1x32x32xbf16>
    %396 = vector.shape_cast %395 : vector<1x32x32xbf16> to vector<32x32xbf16>
    %397 = vector.extract_strided_slice %388 {offsets = [0, 0], sizes = [8, 8], strides = [1, 1]} : vector<8x32xf32> to vector<8x8xf32>
    %398 = vector.extract_strided_slice %393 {offsets = [0, 0], sizes = [8, 8], strides = [1, 1]} : vector<8x32xf32> to vector<8x8xf32>
    %cst_154 = arith.constant dense<0.000000e+00> : vector<8x8xf32>
    %399 = tpu.matmul %397, %398, %cst_154 {dimension_numbers = #tpu.dot_dimension_numbers<[1], [1], [0], [0], [0, 0, 1, 0], [], []>} : vector<8x8xf32>, vector<8x8xf32>, vector<8x8xf32> -> vector<8x8xf32>
    %400 = vector.broadcast %1 : vector<1x8xf32> to vector<8x8xf32>
    %401 = arith.addf %399, %400 : vector<8x8xf32>
    %cst_155 = arith.constant dense<0xFF800000> : vector<8xf32>
    %402 = vector.multi_reduction <maximumf>, %401, %cst_155 [1] : vector<8x8xf32> to vector<8xf32>
    %403 = vector.shape_cast %402 : vector<8xf32> to vector<8x1xf32>
    %404 = vector.broadcast %403 : vector<8x1xf32> to vector<8x8xf32>
    %405 = arith.subf %401, %404 : vector<8x8xf32>
    %406 = math.exp %405 : vector<8x8xf32>
    %cst_156 = arith.constant dense<0.000000e+00> : vector<8xf32>
    %407 = vector.multi_reduction <add>, %406, %cst_156 [1] : vector<8x8xf32> to vector<8xf32>
    %408 = vector.shape_cast %407 : vector<8xf32> to vector<8x1xf32>
    %409 = tpu.reciprocal %408 {approx = true} : vector<8x1xf32> -> vector<8x1xf32>
    %410 = vector.broadcast %409 : vector<8x1xf32> to vector<8x8xf32>
    %411 = arith.mulf %406, %410 : vector<8x8xf32>
    %412 = vector.extract_strided_slice %394 {offsets = [0, 0], sizes = [8, 8], strides = [1, 1]} : vector<8x32xf32> to vector<8x8xf32>
    %cst_157 = arith.constant dense<0.000000e+00> : vector<8x8xf32>
    %413 = tpu.matmul %411, %412, %cst_157 {dimension_numbers = #tpu.dot_dimension_numbers<[1], [0], [0], [1], [0, 0, 1, 1], [], []>} : vector<8x8xf32>, vector<8x8xf32>, vector<8x8xf32> -> vector<8x8xf32>
    %414 = vector.extract_strided_slice %388 {offsets = [0, 8], sizes = [8, 8], strides = [1, 1]} : vector<8x32xf32> to vector<8x8xf32>
    %415 = vector.extract_strided_slice %393 {offsets = [0, 8], sizes = [8, 8], strides = [1, 1]} : vector<8x32xf32> to vector<8x8xf32>
    %cst_158 = arith.constant dense<0.000000e+00> : vector<8x8xf32>
    %416 = tpu.matmul %414, %415, %cst_158 {dimension_numbers = #tpu.dot_dimension_numbers<[1], [1], [0], [0], [0, 0, 1, 0], [], []>} : vector<8x8xf32>, vector<8x8xf32>, vector<8x8xf32> -> vector<8x8xf32>
    %417 = vector.broadcast %1 : vector<1x8xf32> to vector<8x8xf32>
    %418 = arith.addf %416, %417 : vector<8x8xf32>
    %cst_159 = arith.constant dense<0xFF800000> : vector<8xf32>
    %419 = vector.multi_reduction <maximumf>, %418, %cst_159 [1] : vector<8x8xf32> to vector<8xf32>
    %420 = vector.shape_cast %419 : vector<8xf32> to vector<8x1xf32>
    %421 = vector.broadcast %420 : vector<8x1xf32> to vector<8x8xf32>
    %422 = arith.subf %418, %421 : vector<8x8xf32>
    %423 = math.exp %422 : vector<8x8xf32>
    %cst_160 = arith.constant dense<0.000000e+00> : vector<8xf32>
    %424 = vector.multi_reduction <add>, %423, %cst_160 [1] : vector<8x8xf32> to vector<8xf32>
    %425 = vector.shape_cast %424 : vector<8xf32> to vector<8x1xf32>
    %426 = tpu.reciprocal %425 {approx = true} : vector<8x1xf32> -> vector<8x1xf32>
    %427 = vector.broadcast %426 : vector<8x1xf32> to vector<8x8xf32>
    %428 = arith.mulf %423, %427 : vector<8x8xf32>
    %429 = vector.extract_strided_slice %394 {offsets = [0, 8], sizes = [8, 8], strides = [1, 1]} : vector<8x32xf32> to vector<8x8xf32>
    %cst_161 = arith.constant dense<0.000000e+00> : vector<8x8xf32>
    %430 = tpu.matmul %428, %429, %cst_161 {dimension_numbers = #tpu.dot_dimension_numbers<[1], [0], [0], [1], [0, 0, 1, 1], [], []>} : vector<8x8xf32>, vector<8x8xf32>, vector<8x8xf32> -> vector<8x8xf32>
    %431 = vector.extract_strided_slice %388 {offsets = [0, 16], sizes = [8, 8], strides = [1, 1]} : vector<8x32xf32> to vector<8x8xf32>
    %432 = vector.extract_strided_slice %393 {offsets = [0, 16], sizes = [8, 8], strides = [1, 1]} : vector<8x32xf32> to vector<8x8xf32>
    %cst_162 = arith.constant dense<0.000000e+00> : vector<8x8xf32>
    %433 = tpu.matmul %431, %432, %cst_162 {dimension_numbers = #tpu.dot_dimension_numbers<[1], [1], [0], [0], [0, 0, 1, 0], [], []>} : vector<8x8xf32>, vector<8x8xf32>, vector<8x8xf32> -> vector<8x8xf32>
    %434 = vector.broadcast %1 : vector<1x8xf32> to vector<8x8xf32>
    %435 = arith.addf %433, %434 : vector<8x8xf32>
    %cst_163 = arith.constant dense<0xFF800000> : vector<8xf32>
    %436 = vector.multi_reduction <maximumf>, %435, %cst_163 [1] : vector<8x8xf32> to vector<8xf32>
    %437 = vector.shape_cast %436 : vector<8xf32> to vector<8x1xf32>
    %438 = vector.broadcast %437 : vector<8x1xf32> to vector<8x8xf32>
    %439 = arith.subf %435, %438 : vector<8x8xf32>
    %440 = math.exp %439 : vector<8x8xf32>
    %cst_164 = arith.constant dense<0.000000e+00> : vector<8xf32>
    %441 = vector.multi_reduction <add>, %440, %cst_164 [1] : vector<8x8xf32> to vector<8xf32>
    %442 = vector.shape_cast %441 : vector<8xf32> to vector<8x1xf32>
    %443 = tpu.reciprocal %442 {approx = true} : vector<8x1xf32> -> vector<8x1xf32>
    %444 = vector.broadcast %443 : vector<8x1xf32> to vector<8x8xf32>
    %445 = arith.mulf %440, %444 : vector<8x8xf32>
    %446 = vector.extract_strided_slice %394 {offsets = [0, 16], sizes = [8, 8], strides = [1, 1]} : vector<8x32xf32> to vector<8x8xf32>
    %cst_165 = arith.constant dense<0.000000e+00> : vector<8x8xf32>
    %447 = tpu.matmul %445, %446, %cst_165 {dimension_numbers = #tpu.dot_dimension_numbers<[1], [0], [0], [1], [0, 0, 1, 1], [], []>} : vector<8x8xf32>, vector<8x8xf32>, vector<8x8xf32> -> vector<8x8xf32>
    %448 = vector.extract_strided_slice %388 {offsets = [0, 24], sizes = [8, 8], strides = [1, 1]} : vector<8x32xf32> to vector<8x8xf32>
    %449 = vector.extract_strided_slice %393 {offsets = [0, 24], sizes = [8, 8], strides = [1, 1]} : vector<8x32xf32> to vector<8x8xf32>
    %cst_166 = arith.constant dense<0.000000e+00> : vector<8x8xf32>
    %450 = tpu.matmul %448, %449, %cst_166 {dimension_numbers = #tpu.dot_dimension_numbers<[1], [1], [0], [0], [0, 0, 1, 0], [], []>} : vector<8x8xf32>, vector<8x8xf32>, vector<8x8xf32> -> vector<8x8xf32>
    %451 = vector.broadcast %1 : vector<1x8xf32> to vector<8x8xf32>
    %452 = arith.addf %450, %451 : vector<8x8xf32>
    %cst_167 = arith.constant dense<0xFF800000> : vector<8xf32>
    %453 = vector.multi_reduction <maximumf>, %452, %cst_167 [1] : vector<8x8xf32> to vector<8xf32>
    %454 = vector.shape_cast %453 : vector<8xf32> to vector<8x1xf32>
    %455 = vector.broadcast %454 : vector<8x1xf32> to vector<8x8xf32>
    %456 = arith.subf %452, %455 : vector<8x8xf32>
    %457 = math.exp %456 : vector<8x8xf32>
    %cst_168 = arith.constant dense<0.000000e+00> : vector<8xf32>
    %458 = vector.multi_reduction <add>, %457, %cst_168 [1] : vector<8x8xf32> to vector<8xf32>
    %459 = vector.shape_cast %458 : vector<8xf32> to vector<8x1xf32>
    %460 = tpu.reciprocal %459 {approx = true} : vector<8x1xf32> -> vector<8x1xf32>
    %461 = vector.broadcast %460 : vector<8x1xf32> to vector<8x8xf32>
    %462 = arith.mulf %457, %461 : vector<8x8xf32>
    %463 = vector.extract_strided_slice %394 {offsets = [0, 24], sizes = [8, 8], strides = [1, 1]} : vector<8x32xf32> to vector<8x8xf32>
    %cst_169 = arith.constant dense<0.000000e+00> : vector<8x8xf32>
    %464 = tpu.matmul %462, %463, %cst_169 {dimension_numbers = #tpu.dot_dimension_numbers<[1], [0], [0], [1], [0, 0, 1, 1], [], []>} : vector<8x8xf32>, vector<8x8xf32>, vector<8x8xf32> -> vector<8x8xf32>
    %465 = tpu.concatenate %413, %430, %447, %464 in 1 : vector<8x8xf32>, vector<8x8xf32>, vector<8x8xf32>, vector<8x8xf32> -> vector<8x32xf32>
    %466 = arith.truncf %465 : vector<8x32xf32> to vector<8x32xbf16>
    %cst_170 = arith.constant dense<0.000000e+00> : vector<8x32xf32>
    %467 = tpu.matmul %466, %396, %cst_170 {dimension_numbers = #tpu.dot_dimension_numbers<[1], [0], [0], [1], [0, 0, 1, 1], [], []>} : vector<8x32xbf16>, vector<32x32xbf16>, vector<8x32xf32> -> vector<8x32xf32>
    %468 = arith.addf %370, %467 : vector<8x32xf32>
    %c0_171 = arith.constant 0 : index
    %c0_172 = arith.constant 0 : index
    %c0_173 = arith.constant 0 : index
    %469 = vector.load %arg20[%c0_171, %c0_172, %c0_173] : memref<2x1x32xf32, #tpu.memory_space<vmem>>, vector<1x1x32xf32>
    %470 = vector.shape_cast %469 : vector<1x1x32xf32> to vector<1x32xf32>
    %471 = arith.mulf %468, %468 : vector<8x32xf32>
    %cst_174 = arith.constant dense<0.000000e+00> : vector<8xf32>
    %472 = vector.multi_reduction <add>, %471, %cst_174 [1] : vector<8x32xf32> to vector<8xf32>
    %473 = vector.shape_cast %472 : vector<8xf32> to vector<8x1xf32>
    %cst_175 = arith.constant 3.200000e+01 : f32
    %474 = vector.broadcast %cst_175 : f32 to vector<8x1xf32>
    %475 = arith.divf %473, %474 : vector<8x1xf32>
    %cst_176 = arith.constant 9.99999997E-7 : f32
    %476 = vector.broadcast %cst_176 : f32 to vector<8x1xf32>
    %477 = arith.addf %475, %476 : vector<8x1xf32>
    %478 = math.rsqrt %477 : vector<8x1xf32>
    %479 = vector.broadcast %478 : vector<8x1xf32> to vector<8x32xf32>
    %480 = arith.mulf %468, %479 : vector<8x32xf32>
    %481 = vector.broadcast %470 : vector<1x32xf32> to vector<8x32xf32>
    %482 = arith.mulf %480, %481 : vector<8x32xf32>
    %c0_177 = arith.constant 0 : index
    %c0_178 = arith.constant 0 : index
    %c0_179 = arith.constant 0 : index
    %483 = vector.load %arg21[%c0_177, %c0_178, %c0_179] : memref<2x32x64xbf16, #tpu.memory_space<vmem>>, vector<1x32x64xbf16>
    %484 = vector.shape_cast %483 : vector<1x32x64xbf16> to vector<32x64xbf16>
    %485 = arith.truncf %482 : vector<8x32xf32> to vector<8x32xbf16>
    %cst_180 = arith.constant dense<0.000000e+00> : vector<8x64xf32>
    %486 = tpu.matmul %485, %484, %cst_180 {dimension_numbers = #tpu.dot_dimension_numbers<[1], [0], [0], [1], [0, 0, 1, 1], [], []>} : vector<8x32xbf16>, vector<32x64xbf16>, vector<8x64xf32> -> vector<8x64xf32>
    %cst_181 = arith.constant 0.000000e+00 : f32
    %487 = vector.broadcast %cst_181 : f32 to vector<8x64xf32>
    %488 = arith.maximumf %486, %487 : vector<8x64xf32>
    %c0_182 = arith.constant 0 : index
    %c0_183 = arith.constant 0 : index
    %c0_184 = arith.constant 0 : index
    %489 = vector.load %arg22[%c0_182, %c0_183, %c0_184] : memref<2x64x32xbf16, #tpu.memory_space<vmem>>, vector<1x64x32xbf16>
    %490 = vector.shape_cast %489 : vector<1x64x32xbf16> to vector<64x32xbf16>
    %491 = arith.truncf %488 : vector<8x64xf32> to vector<8x64xbf16>
    %cst_185 = arith.constant dense<0.000000e+00> : vector<8x32xf32>
    %492 = tpu.matmul %491, %490, %cst_185 {dimension_numbers = #tpu.dot_dimension_numbers<[1], [0], [0], [1], [0, 0, 1, 1], [], []>} : vector<8x64xbf16>, vector<64x32xbf16>, vector<8x32xf32> -> vector<8x32xf32>
    %493 = arith.addf %468, %492 : vector<8x32xf32>
    %c1_186 = arith.constant 1 : index
    %c0_187 = arith.constant 0 : index
    %c0_188 = arith.constant 0 : index
    %494 = vector.load %arg13[%c1_186, %c0_187, %c0_188] : memref<2x1x32xf32, #tpu.memory_space<vmem>>, vector<1x1x32xf32>
    %495 = vector.shape_cast %494 : vector<1x1x32xf32> to vector<1x32xf32>
    %496 = arith.mulf %493, %493 : vector<8x32xf32>
    %cst_189 = arith.constant dense<0.000000e+00> : vector<8xf32>
    %497 = vector.multi_reduction <add>, %496, %cst_189 [1] : vector<8x32xf32> to vector<8xf32>
    %498 = vector.shape_cast %497 : vector<8xf32> to vector<8x1xf32>
    %cst_190 = arith.constant 3.200000e+01 : f32
    %499 = vector.broadcast %cst_190 : f32 to vector<8x1xf32>
    %500 = arith.divf %498, %499 : vector<8x1xf32>
    %cst_191 = arith.constant 9.99999997E-7 : f32
    %501 = vector.broadcast %cst_191 : f32 to vector<8x1xf32>
    %502 = arith.addf %500, %501 : vector<8x1xf32>
    %503 = math.rsqrt %502 : vector<8x1xf32>
    %504 = vector.broadcast %503 : vector<8x1xf32> to vector<8x32xf32>
    %505 = arith.mulf %493, %504 : vector<8x32xf32>
    %506 = vector.broadcast %495 : vector<1x32xf32> to vector<8x32xf32>
    %507 = arith.mulf %505, %506 : vector<8x32xf32>
    %c1_192 = arith.constant 1 : index
    %c0_193 = arith.constant 0 : index
    %c0_194 = arith.constant 0 : index
    %508 = vector.load %arg14[%c1_192, %c0_193, %c0_194] : memref<2x32x96xbf16, #tpu.memory_space<vmem>>, vector<1x32x96xbf16>
    %509 = vector.shape_cast %508 : vector<1x32x96xbf16> to vector<32x96xbf16>
    %510 = arith.truncf %507 : vector<8x32xf32> to vector<8x32xbf16>
    %cst_195 = arith.constant dense<0.000000e+00> : vector<8x96xf32>
    %511 = tpu.matmul %510, %509, %cst_195 {dimension_numbers = #tpu.dot_dimension_numbers<[1], [0], [0], [1], [0, 0, 1, 1], [], []>} : vector<8x32xbf16>, vector<32x96xbf16>, vector<8x96xf32> -> vector<8x96xf32>
    %512 = vector.extract_strided_slice %511 {offsets = [0, 0], sizes = [8, 32], strides = [1, 1]} : vector<8x96xf32> to vector<8x32xf32>
    %513 = vector.extract_strided_slice %511 {offsets = [0, 32], sizes = [8, 32], strides = [1, 1]} : vector<8x96xf32> to vector<8x32xf32>
    %514 = vector.extract_strided_slice %511 {offsets = [0, 64], sizes = [8, 32], strides = [1, 1]} : vector<8x96xf32> to vector<8x32xf32>
    %c1_196 = arith.constant 1 : index
    %c0_197 = arith.constant 0 : index
    %c0_198 = arith.constant 0 : index
    %515 = vector.load %arg15[%c1_196, %c0_197, %c0_198] : memref<2x32x32xbf16, #tpu.memory_space<vmem>>, vector<1x32x32xbf16>
    %516 = vector.shape_cast %515 : vector<1x32x32xbf16> to vector<32x32xbf16>
    %517 = vector.extract_strided_slice %512 {offsets = [0, 0], sizes = [8, 8], strides = [1, 1]} : vector<8x32xf32> to vector<8x8xf32>
    %518 = vector.extract_strided_slice %513 {offsets = [0, 0], sizes = [8, 8], strides = [1, 1]} : vector<8x32xf32> to vector<8x8xf32>
    %cst_199 = arith.constant dense<0.000000e+00> : vector<8x8xf32>
    %519 = tpu.matmul %517, %518, %cst_199 {dimension_numbers = #tpu.dot_dimension_numbers<[1], [1], [0], [0], [0, 0, 1, 0], [], []>} : vector<8x8xf32>, vector<8x8xf32>, vector<8x8xf32> -> vector<8x8xf32>
    %520 = vector.extract_strided_slice %6 {offsets = [0, 0, 0], sizes = [1, 8, 8], strides = [1, 1, 1]} : vector<4x8x8xf32> to vector<1x8x8xf32>
    %521 = vector.shape_cast %520 : vector<1x8x8xf32> to vector<8x8xf32>
    %522 = arith.addf %519, %521 : vector<8x8xf32>
    %cst_200 = arith.constant dense<0xFF800000> : vector<8xf32>
    %523 = vector.multi_reduction <maximumf>, %522, %cst_200 [1] : vector<8x8xf32> to vector<8xf32>
    %524 = vector.shape_cast %523 : vector<8xf32> to vector<8x1xf32>
    %525 = vector.broadcast %524 : vector<8x1xf32> to vector<8x8xf32>
    %526 = arith.subf %522, %525 : vector<8x8xf32>
    %527 = math.exp %526 : vector<8x8xf32>
    %cst_201 = arith.constant dense<0.000000e+00> : vector<8xf32>
    %528 = vector.multi_reduction <add>, %527, %cst_201 [1] : vector<8x8xf32> to vector<8xf32>
    %529 = vector.shape_cast %528 : vector<8xf32> to vector<8x1xf32>
    %530 = tpu.reciprocal %529 {approx = true} : vector<8x1xf32> -> vector<8x1xf32>
    %531 = vector.broadcast %530 : vector<8x1xf32> to vector<8x8xf32>
    %532 = arith.mulf %527, %531 : vector<8x8xf32>
    %533 = vector.extract_strided_slice %514 {offsets = [0, 0], sizes = [8, 8], strides = [1, 1]} : vector<8x32xf32> to vector<8x8xf32>
    %cst_202 = arith.constant dense<0.000000e+00> : vector<8x8xf32>
    %534 = tpu.matmul %532, %533, %cst_202 {dimension_numbers = #tpu.dot_dimension_numbers<[1], [0], [0], [1], [0, 0, 1, 1], [], []>} : vector<8x8xf32>, vector<8x8xf32>, vector<8x8xf32> -> vector<8x8xf32>
    %535 = vector.extract_strided_slice %512 {offsets = [0, 8], sizes = [8, 8], strides = [1, 1]} : vector<8x32xf32> to vector<8x8xf32>
    %536 = vector.extract_strided_slice %513 {offsets = [0, 8], sizes = [8, 8], strides = [1, 1]} : vector<8x32xf32> to vector<8x8xf32>
    %cst_203 = arith.constant dense<0.000000e+00> : vector<8x8xf32>
    %537 = tpu.matmul %535, %536, %cst_203 {dimension_numbers = #tpu.dot_dimension_numbers<[1], [1], [0], [0], [0, 0, 1, 0], [], []>} : vector<8x8xf32>, vector<8x8xf32>, vector<8x8xf32> -> vector<8x8xf32>
    %538 = vector.extract_strided_slice %6 {offsets = [1, 0, 0], sizes = [1, 8, 8], strides = [1, 1, 1]} : vector<4x8x8xf32> to vector<1x8x8xf32>
    %539 = vector.shape_cast %538 : vector<1x8x8xf32> to vector<8x8xf32>
    %540 = arith.addf %537, %539 : vector<8x8xf32>
    %cst_204 = arith.constant dense<0xFF800000> : vector<8xf32>
    %541 = vector.multi_reduction <maximumf>, %540, %cst_204 [1] : vector<8x8xf32> to vector<8xf32>
    %542 = vector.shape_cast %541 : vector<8xf32> to vector<8x1xf32>
    %543 = vector.broadcast %542 : vector<8x1xf32> to vector<8x8xf32>
    %544 = arith.subf %540, %543 : vector<8x8xf32>
    %545 = math.exp %544 : vector<8x8xf32>
    %cst_205 = arith.constant dense<0.000000e+00> : vector<8xf32>
    %546 = vector.multi_reduction <add>, %545, %cst_205 [1] : vector<8x8xf32> to vector<8xf32>
    %547 = vector.shape_cast %546 : vector<8xf32> to vector<8x1xf32>
    %548 = tpu.reciprocal %547 {approx = true} : vector<8x1xf32> -> vector<8x1xf32>
    %549 = vector.broadcast %548 : vector<8x1xf32> to vector<8x8xf32>
    %550 = arith.mulf %545, %549 : vector<8x8xf32>
    %551 = vector.extract_strided_slice %514 {offsets = [0, 8], sizes = [8, 8], strides = [1, 1]} : vector<8x32xf32> to vector<8x8xf32>
    %cst_206 = arith.constant dense<0.000000e+00> : vector<8x8xf32>
    %552 = tpu.matmul %550, %551, %cst_206 {dimension_numbers = #tpu.dot_dimension_numbers<[1], [0], [0], [1], [0, 0, 1, 1], [], []>} : vector<8x8xf32>, vector<8x8xf32>, vector<8x8xf32> -> vector<8x8xf32>
    %553 = vector.extract_strided_slice %512 {offsets = [0, 16], sizes = [8, 8], strides = [1, 1]} : vector<8x32xf32> to vector<8x8xf32>
    %554 = vector.extract_strided_slice %513 {offsets = [0, 16], sizes = [8, 8], strides = [1, 1]} : vector<8x32xf32> to vector<8x8xf32>
    %cst_207 = arith.constant dense<0.000000e+00> : vector<8x8xf32>
    %555 = tpu.matmul %553, %554, %cst_207 {dimension_numbers = #tpu.dot_dimension_numbers<[1], [1], [0], [0], [0, 0, 1, 0], [], []>} : vector<8x8xf32>, vector<8x8xf32>, vector<8x8xf32> -> vector<8x8xf32>
    %556 = vector.extract_strided_slice %6 {offsets = [2, 0, 0], sizes = [1, 8, 8], strides = [1, 1, 1]} : vector<4x8x8xf32> to vector<1x8x8xf32>
    %557 = vector.shape_cast %556 : vector<1x8x8xf32> to vector<8x8xf32>
    %558 = arith.addf %555, %557 : vector<8x8xf32>
    %cst_208 = arith.constant dense<0xFF800000> : vector<8xf32>
    %559 = vector.multi_reduction <maximumf>, %558, %cst_208 [1] : vector<8x8xf32> to vector<8xf32>
    %560 = vector.shape_cast %559 : vector<8xf32> to vector<8x1xf32>
    %561 = vector.broadcast %560 : vector<8x1xf32> to vector<8x8xf32>
    %562 = arith.subf %558, %561 : vector<8x8xf32>
    %563 = math.exp %562 : vector<8x8xf32>
    %cst_209 = arith.constant dense<0.000000e+00> : vector<8xf32>
    %564 = vector.multi_reduction <add>, %563, %cst_209 [1] : vector<8x8xf32> to vector<8xf32>
    %565 = vector.shape_cast %564 : vector<8xf32> to vector<8x1xf32>
    %566 = tpu.reciprocal %565 {approx = true} : vector<8x1xf32> -> vector<8x1xf32>
    %567 = vector.broadcast %566 : vector<8x1xf32> to vector<8x8xf32>
    %568 = arith.mulf %563, %567 : vector<8x8xf32>
    %569 = vector.extract_strided_slice %514 {offsets = [0, 16], sizes = [8, 8], strides = [1, 1]} : vector<8x32xf32> to vector<8x8xf32>
    %cst_210 = arith.constant dense<0.000000e+00> : vector<8x8xf32>
    %570 = tpu.matmul %568, %569, %cst_210 {dimension_numbers = #tpu.dot_dimension_numbers<[1], [0], [0], [1], [0, 0, 1, 1], [], []>} : vector<8x8xf32>, vector<8x8xf32>, vector<8x8xf32> -> vector<8x8xf32>
    %571 = vector.extract_strided_slice %512 {offsets = [0, 24], sizes = [8, 8], strides = [1, 1]} : vector<8x32xf32> to vector<8x8xf32>
    %572 = vector.extract_strided_slice %513 {offsets = [0, 24], sizes = [8, 8], strides = [1, 1]} : vector<8x32xf32> to vector<8x8xf32>
    %cst_211 = arith.constant dense<0.000000e+00> : vector<8x8xf32>
    %573 = tpu.matmul %571, %572, %cst_211 {dimension_numbers = #tpu.dot_dimension_numbers<[1], [1], [0], [0], [0, 0, 1, 0], [], []>} : vector<8x8xf32>, vector<8x8xf32>, vector<8x8xf32> -> vector<8x8xf32>
    %574 = vector.extract_strided_slice %6 {offsets = [3, 0, 0], sizes = [1, 8, 8], strides = [1, 1, 1]} : vector<4x8x8xf32> to vector<1x8x8xf32>
    %575 = vector.shape_cast %574 : vector<1x8x8xf32> to vector<8x8xf32>
    %576 = arith.addf %573, %575 : vector<8x8xf32>
    %cst_212 = arith.constant dense<0xFF800000> : vector<8xf32>
    %577 = vector.multi_reduction <maximumf>, %576, %cst_212 [1] : vector<8x8xf32> to vector<8xf32>
    %578 = vector.shape_cast %577 : vector<8xf32> to vector<8x1xf32>
    %579 = vector.broadcast %578 : vector<8x1xf32> to vector<8x8xf32>
    %580 = arith.subf %576, %579 : vector<8x8xf32>
    %581 = math.exp %580 : vector<8x8xf32>
    %cst_213 = arith.constant dense<0.000000e+00> : vector<8xf32>
    %582 = vector.multi_reduction <add>, %581, %cst_213 [1] : vector<8x8xf32> to vector<8xf32>
    %583 = vector.shape_cast %582 : vector<8xf32> to vector<8x1xf32>
    %584 = tpu.reciprocal %583 {approx = true} : vector<8x1xf32> -> vector<8x1xf32>
    %585 = vector.broadcast %584 : vector<8x1xf32> to vector<8x8xf32>
    %586 = arith.mulf %581, %585 : vector<8x8xf32>
    %587 = vector.extract_strided_slice %514 {offsets = [0, 24], sizes = [8, 8], strides = [1, 1]} : vector<8x32xf32> to vector<8x8xf32>
    %cst_214 = arith.constant dense<0.000000e+00> : vector<8x8xf32>
    %588 = tpu.matmul %586, %587, %cst_214 {dimension_numbers = #tpu.dot_dimension_numbers<[1], [0], [0], [1], [0, 0, 1, 1], [], []>} : vector<8x8xf32>, vector<8x8xf32>, vector<8x8xf32> -> vector<8x8xf32>
    %589 = tpu.concatenate %534, %552, %570, %588 in 1 : vector<8x8xf32>, vector<8x8xf32>, vector<8x8xf32>, vector<8x8xf32> -> vector<8x32xf32>
    %590 = arith.truncf %589 : vector<8x32xf32> to vector<8x32xbf16>
    %cst_215 = arith.constant dense<0.000000e+00> : vector<8x32xf32>
    %591 = tpu.matmul %590, %516, %cst_215 {dimension_numbers = #tpu.dot_dimension_numbers<[1], [0], [0], [1], [0, 0, 1, 1], [], []>} : vector<8x32xbf16>, vector<32x32xbf16>, vector<8x32xf32> -> vector<8x32xf32>
    %592 = arith.addf %493, %591 : vector<8x32xf32>
    %c1_216 = arith.constant 1 : index
    %c0_217 = arith.constant 0 : index
    %c0_218 = arith.constant 0 : index
    %593 = vector.load %arg16[%c1_216, %c0_217, %c0_218] : memref<2x1x32xf32, #tpu.memory_space<vmem>>, vector<1x1x32xf32>
    %594 = vector.shape_cast %593 : vector<1x1x32xf32> to vector<1x32xf32>
    %595 = arith.mulf %592, %592 : vector<8x32xf32>
    %cst_219 = arith.constant dense<0.000000e+00> : vector<8xf32>
    %596 = vector.multi_reduction <add>, %595, %cst_219 [1] : vector<8x32xf32> to vector<8xf32>
    %597 = vector.shape_cast %596 : vector<8xf32> to vector<8x1xf32>
    %cst_220 = arith.constant 3.200000e+01 : f32
    %598 = vector.broadcast %cst_220 : f32 to vector<8x1xf32>
    %599 = arith.divf %597, %598 : vector<8x1xf32>
    %cst_221 = arith.constant 9.99999997E-7 : f32
    %600 = vector.broadcast %cst_221 : f32 to vector<8x1xf32>
    %601 = arith.addf %599, %600 : vector<8x1xf32>
    %602 = math.rsqrt %601 : vector<8x1xf32>
    %603 = vector.broadcast %602 : vector<8x1xf32> to vector<8x32xf32>
    %604 = arith.mulf %592, %603 : vector<8x32xf32>
    %605 = vector.broadcast %594 : vector<1x32xf32> to vector<8x32xf32>
    %606 = arith.mulf %604, %605 : vector<8x32xf32>
    %c1_222 = arith.constant 1 : index
    %c0_223 = arith.constant 0 : index
    %c0_224 = arith.constant 0 : index
    %607 = vector.load %arg17[%c1_222, %c0_223, %c0_224] : memref<2x32x32xbf16, #tpu.memory_space<vmem>>, vector<1x32x32xbf16>
    %608 = vector.shape_cast %607 : vector<1x32x32xbf16> to vector<32x32xbf16>
    %609 = arith.truncf %606 : vector<8x32xf32> to vector<8x32xbf16>
    %cst_225 = arith.constant dense<0.000000e+00> : vector<8x32xf32>
    %610 = tpu.matmul %609, %608, %cst_225 {dimension_numbers = #tpu.dot_dimension_numbers<[1], [0], [0], [1], [0, 0, 1, 1], [], []>} : vector<8x32xbf16>, vector<32x32xbf16>, vector<8x32xf32> -> vector<8x32xf32>
    %c1_226 = arith.constant 1 : index
    %c0_227 = arith.constant 0 : index
    %c0_228 = arith.constant 0 : index
    %611 = vector.load %arg18[%c1_226, %c0_227, %c0_228] : memref<2x32x64xbf16, #tpu.memory_space<vmem>>, vector<1x32x64xbf16>
    %612 = vector.shape_cast %611 : vector<1x32x64xbf16> to vector<32x64xbf16>
    %613 = arith.truncf %269 : vector<8x32xf32> to vector<8x32xbf16>
    %cst_229 = arith.constant dense<0.000000e+00> : vector<8x64xf32>
    %614 = tpu.matmul %613, %612, %cst_229 {dimension_numbers = #tpu.dot_dimension_numbers<[1], [0], [0], [1], [0, 0, 1, 1], [], []>} : vector<8x32xbf16>, vector<32x64xbf16>, vector<8x64xf32> -> vector<8x64xf32>
    %615 = vector.extract_strided_slice %614 {offsets = [0, 0], sizes = [8, 32], strides = [1, 1]} : vector<8x64xf32> to vector<8x32xf32>
    %616 = vector.extract_strided_slice %614 {offsets = [0, 32], sizes = [8, 32], strides = [1, 1]} : vector<8x64xf32> to vector<8x32xf32>
    %c1_230 = arith.constant 1 : index
    %c0_231 = arith.constant 0 : index
    %c0_232 = arith.constant 0 : index
    %617 = vector.load %arg19[%c1_230, %c0_231, %c0_232] : memref<2x32x32xbf16, #tpu.memory_space<vmem>>, vector<1x32x32xbf16>
    %618 = vector.shape_cast %617 : vector<1x32x32xbf16> to vector<32x32xbf16>
    %619 = vector.extract_strided_slice %610 {offsets = [0, 0], sizes = [8, 8], strides = [1, 1]} : vector<8x32xf32> to vector<8x8xf32>
    %620 = vector.extract_strided_slice %615 {offsets = [0, 0], sizes = [8, 8], strides = [1, 1]} : vector<8x32xf32> to vector<8x8xf32>
    %cst_233 = arith.constant dense<0.000000e+00> : vector<8x8xf32>
    %621 = tpu.matmul %619, %620, %cst_233 {dimension_numbers = #tpu.dot_dimension_numbers<[1], [1], [0], [0], [0, 0, 1, 0], [], []>} : vector<8x8xf32>, vector<8x8xf32>, vector<8x8xf32> -> vector<8x8xf32>
    %622 = vector.broadcast %1 : vector<1x8xf32> to vector<8x8xf32>
    %623 = arith.addf %621, %622 : vector<8x8xf32>
    %cst_234 = arith.constant dense<0xFF800000> : vector<8xf32>
    %624 = vector.multi_reduction <maximumf>, %623, %cst_234 [1] : vector<8x8xf32> to vector<8xf32>
    %625 = vector.shape_cast %624 : vector<8xf32> to vector<8x1xf32>
    %626 = vector.broadcast %625 : vector<8x1xf32> to vector<8x8xf32>
    %627 = arith.subf %623, %626 : vector<8x8xf32>
    %628 = math.exp %627 : vector<8x8xf32>
    %cst_235 = arith.constant dense<0.000000e+00> : vector<8xf32>
    %629 = vector.multi_reduction <add>, %628, %cst_235 [1] : vector<8x8xf32> to vector<8xf32>
    %630 = vector.shape_cast %629 : vector<8xf32> to vector<8x1xf32>
    %631 = tpu.reciprocal %630 {approx = true} : vector<8x1xf32> -> vector<8x1xf32>
    %632 = vector.broadcast %631 : vector<8x1xf32> to vector<8x8xf32>
    %633 = arith.mulf %628, %632 : vector<8x8xf32>
    %634 = vector.extract_strided_slice %616 {offsets = [0, 0], sizes = [8, 8], strides = [1, 1]} : vector<8x32xf32> to vector<8x8xf32>
    %cst_236 = arith.constant dense<0.000000e+00> : vector<8x8xf32>
    %635 = tpu.matmul %633, %634, %cst_236 {dimension_numbers = #tpu.dot_dimension_numbers<[1], [0], [0], [1], [0, 0, 1, 1], [], []>} : vector<8x8xf32>, vector<8x8xf32>, vector<8x8xf32> -> vector<8x8xf32>
    %636 = vector.extract_strided_slice %610 {offsets = [0, 8], sizes = [8, 8], strides = [1, 1]} : vector<8x32xf32> to vector<8x8xf32>
    %637 = vector.extract_strided_slice %615 {offsets = [0, 8], sizes = [8, 8], strides = [1, 1]} : vector<8x32xf32> to vector<8x8xf32>
    %cst_237 = arith.constant dense<0.000000e+00> : vector<8x8xf32>
    %638 = tpu.matmul %636, %637, %cst_237 {dimension_numbers = #tpu.dot_dimension_numbers<[1], [1], [0], [0], [0, 0, 1, 0], [], []>} : vector<8x8xf32>, vector<8x8xf32>, vector<8x8xf32> -> vector<8x8xf32>
    %639 = vector.broadcast %1 : vector<1x8xf32> to vector<8x8xf32>
    %640 = arith.addf %638, %639 : vector<8x8xf32>
    %cst_238 = arith.constant dense<0xFF800000> : vector<8xf32>
    %641 = vector.multi_reduction <maximumf>, %640, %cst_238 [1] : vector<8x8xf32> to vector<8xf32>
    %642 = vector.shape_cast %641 : vector<8xf32> to vector<8x1xf32>
    %643 = vector.broadcast %642 : vector<8x1xf32> to vector<8x8xf32>
    %644 = arith.subf %640, %643 : vector<8x8xf32>
    %645 = math.exp %644 : vector<8x8xf32>
    %cst_239 = arith.constant dense<0.000000e+00> : vector<8xf32>
    %646 = vector.multi_reduction <add>, %645, %cst_239 [1] : vector<8x8xf32> to vector<8xf32>
    %647 = vector.shape_cast %646 : vector<8xf32> to vector<8x1xf32>
    %648 = tpu.reciprocal %647 {approx = true} : vector<8x1xf32> -> vector<8x1xf32>
    %649 = vector.broadcast %648 : vector<8x1xf32> to vector<8x8xf32>
    %650 = arith.mulf %645, %649 : vector<8x8xf32>
    %651 = vector.extract_strided_slice %616 {offsets = [0, 8], sizes = [8, 8], strides = [1, 1]} : vector<8x32xf32> to vector<8x8xf32>
    %cst_240 = arith.constant dense<0.000000e+00> : vector<8x8xf32>
    %652 = tpu.matmul %650, %651, %cst_240 {dimension_numbers = #tpu.dot_dimension_numbers<[1], [0], [0], [1], [0, 0, 1, 1], [], []>} : vector<8x8xf32>, vector<8x8xf32>, vector<8x8xf32> -> vector<8x8xf32>
    %653 = vector.extract_strided_slice %610 {offsets = [0, 16], sizes = [8, 8], strides = [1, 1]} : vector<8x32xf32> to vector<8x8xf32>
    %654 = vector.extract_strided_slice %615 {offsets = [0, 16], sizes = [8, 8], strides = [1, 1]} : vector<8x32xf32> to vector<8x8xf32>
    %cst_241 = arith.constant dense<0.000000e+00> : vector<8x8xf32>
    %655 = tpu.matmul %653, %654, %cst_241 {dimension_numbers = #tpu.dot_dimension_numbers<[1], [1], [0], [0], [0, 0, 1, 0], [], []>} : vector<8x8xf32>, vector<8x8xf32>, vector<8x8xf32> -> vector<8x8xf32>
    %656 = vector.broadcast %1 : vector<1x8xf32> to vector<8x8xf32>
    %657 = arith.addf %655, %656 : vector<8x8xf32>
    %cst_242 = arith.constant dense<0xFF800000> : vector<8xf32>
    %658 = vector.multi_reduction <maximumf>, %657, %cst_242 [1] : vector<8x8xf32> to vector<8xf32>
    %659 = vector.shape_cast %658 : vector<8xf32> to vector<8x1xf32>
    %660 = vector.broadcast %659 : vector<8x1xf32> to vector<8x8xf32>
    %661 = arith.subf %657, %660 : vector<8x8xf32>
    %662 = math.exp %661 : vector<8x8xf32>
    %cst_243 = arith.constant dense<0.000000e+00> : vector<8xf32>
    %663 = vector.multi_reduction <add>, %662, %cst_243 [1] : vector<8x8xf32> to vector<8xf32>
    %664 = vector.shape_cast %663 : vector<8xf32> to vector<8x1xf32>
    %665 = tpu.reciprocal %664 {approx = true} : vector<8x1xf32> -> vector<8x1xf32>
    %666 = vector.broadcast %665 : vector<8x1xf32> to vector<8x8xf32>
    %667 = arith.mulf %662, %666 : vector<8x8xf32>
    %668 = vector.extract_strided_slice %616 {offsets = [0, 16], sizes = [8, 8], strides = [1, 1]} : vector<8x32xf32> to vector<8x8xf32>
    %cst_244 = arith.constant dense<0.000000e+00> : vector<8x8xf32>
    %669 = tpu.matmul %667, %668, %cst_244 {dimension_numbers = #tpu.dot_dimension_numbers<[1], [0], [0], [1], [0, 0, 1, 1], [], []>} : vector<8x8xf32>, vector<8x8xf32>, vector<8x8xf32> -> vector<8x8xf32>
    %670 = vector.extract_strided_slice %610 {offsets = [0, 24], sizes = [8, 8], strides = [1, 1]} : vector<8x32xf32> to vector<8x8xf32>
    %671 = vector.extract_strided_slice %615 {offsets = [0, 24], sizes = [8, 8], strides = [1, 1]} : vector<8x32xf32> to vector<8x8xf32>
    %cst_245 = arith.constant dense<0.000000e+00> : vector<8x8xf32>
    %672 = tpu.matmul %670, %671, %cst_245 {dimension_numbers = #tpu.dot_dimension_numbers<[1], [1], [0], [0], [0, 0, 1, 0], [], []>} : vector<8x8xf32>, vector<8x8xf32>, vector<8x8xf32> -> vector<8x8xf32>
    %673 = vector.broadcast %1 : vector<1x8xf32> to vector<8x8xf32>
    %674 = arith.addf %672, %673 : vector<8x8xf32>
    %cst_246 = arith.constant dense<0xFF800000> : vector<8xf32>
    %675 = vector.multi_reduction <maximumf>, %674, %cst_246 [1] : vector<8x8xf32> to vector<8xf32>
    %676 = vector.shape_cast %675 : vector<8xf32> to vector<8x1xf32>
    %677 = vector.broadcast %676 : vector<8x1xf32> to vector<8x8xf32>
    %678 = arith.subf %674, %677 : vector<8x8xf32>
    %679 = math.exp %678 : vector<8x8xf32>
    %cst_247 = arith.constant dense<0.000000e+00> : vector<8xf32>
    %680 = vector.multi_reduction <add>, %679, %cst_247 [1] : vector<8x8xf32> to vector<8xf32>
    %681 = vector.shape_cast %680 : vector<8xf32> to vector<8x1xf32>
    %682 = tpu.reciprocal %681 {approx = true} : vector<8x1xf32> -> vector<8x1xf32>
    %683 = vector.broadcast %682 : vector<8x1xf32> to vector<8x8xf32>
    %684 = arith.mulf %679, %683 : vector<8x8xf32>
    %685 = vector.extract_strided_slice %616 {offsets = [0, 24], sizes = [8, 8], strides = [1, 1]} : vector<8x32xf32> to vector<8x8xf32>
    %cst_248 = arith.constant dense<0.000000e+00> : vector<8x8xf32>
    %686 = tpu.matmul %684, %685, %cst_248 {dimension_numbers = #tpu.dot_dimension_numbers<[1], [0], [0], [1], [0, 0, 1, 1], [], []>} : vector<8x8xf32>, vector<8x8xf32>, vector<8x8xf32> -> vector<8x8xf32>
    %687 = tpu.concatenate %635, %652, %669, %686 in 1 : vector<8x8xf32>, vector<8x8xf32>, vector<8x8xf32>, vector<8x8xf32> -> vector<8x32xf32>
    %688 = arith.truncf %687 : vector<8x32xf32> to vector<8x32xbf16>
    %cst_249 = arith.constant dense<0.000000e+00> : vector<8x32xf32>
    %689 = tpu.matmul %688, %618, %cst_249 {dimension_numbers = #tpu.dot_dimension_numbers<[1], [0], [0], [1], [0, 0, 1, 1], [], []>} : vector<8x32xbf16>, vector<32x32xbf16>, vector<8x32xf32> -> vector<8x32xf32>
    %690 = arith.addf %592, %689 : vector<8x32xf32>
    %c1_250 = arith.constant 1 : index
    %c0_251 = arith.constant 0 : index
    %c0_252 = arith.constant 0 : index
    %691 = vector.load %arg20[%c1_250, %c0_251, %c0_252] : memref<2x1x32xf32, #tpu.memory_space<vmem>>, vector<1x1x32xf32>
    %692 = vector.shape_cast %691 : vector<1x1x32xf32> to vector<1x32xf32>
    %693 = arith.mulf %690, %690 : vector<8x32xf32>
    %cst_253 = arith.constant dense<0.000000e+00> : vector<8xf32>
    %694 = vector.multi_reduction <add>, %693, %cst_253 [1] : vector<8x32xf32> to vector<8xf32>
    %695 = vector.shape_cast %694 : vector<8xf32> to vector<8x1xf32>
    %cst_254 = arith.constant 3.200000e+01 : f32
    %696 = vector.broadcast %cst_254 : f32 to vector<8x1xf32>
    %697 = arith.divf %695, %696 : vector<8x1xf32>
    %cst_255 = arith.constant 9.99999997E-7 : f32
    %698 = vector.broadcast %cst_255 : f32 to vector<8x1xf32>
    %699 = arith.addf %697, %698 : vector<8x1xf32>
    %700 = math.rsqrt %699 : vector<8x1xf32>
    %701 = vector.broadcast %700 : vector<8x1xf32> to vector<8x32xf32>
    %702 = arith.mulf %690, %701 : vector<8x32xf32>
    %703 = vector.broadcast %692 : vector<1x32xf32> to vector<8x32xf32>
    %704 = arith.mulf %702, %703 : vector<8x32xf32>
    %c1_256 = arith.constant 1 : index
    %c0_257 = arith.constant 0 : index
    %c0_258 = arith.constant 0 : index
    %705 = vector.load %arg21[%c1_256, %c0_257, %c0_258] : memref<2x32x64xbf16, #tpu.memory_space<vmem>>, vector<1x32x64xbf16>
    %706 = vector.shape_cast %705 : vector<1x32x64xbf16> to vector<32x64xbf16>
    %707 = arith.truncf %704 : vector<8x32xf32> to vector<8x32xbf16>
    %cst_259 = arith.constant dense<0.000000e+00> : vector<8x64xf32>
    %708 = tpu.matmul %707, %706, %cst_259 {dimension_numbers = #tpu.dot_dimension_numbers<[1], [0], [0], [1], [0, 0, 1, 1], [], []>} : vector<8x32xbf16>, vector<32x64xbf16>, vector<8x64xf32> -> vector<8x64xf32>
    %cst_260 = arith.constant 0.000000e+00 : f32
    %709 = vector.broadcast %cst_260 : f32 to vector<8x64xf32>
    %710 = arith.maximumf %708, %709 : vector<8x64xf32>
    %c1_261 = arith.constant 1 : index
    %c0_262 = arith.constant 0 : index
    %c0_263 = arith.constant 0 : index
    %711 = vector.load %arg22[%c1_261, %c0_262, %c0_263] : memref<2x64x32xbf16, #tpu.memory_space<vmem>>, vector<1x64x32xbf16>
    %712 = vector.shape_cast %711 : vector<1x64x32xbf16> to vector<64x32xbf16>
    %713 = arith.truncf %710 : vector<8x64xf32> to vector<8x64xbf16>
    %cst_264 = arith.constant dense<0.000000e+00> : vector<8x32xf32>
    %714 = tpu.matmul %713, %712, %cst_264 {dimension_numbers = #tpu.dot_dimension_numbers<[1], [0], [0], [1], [0, 0, 1, 1], [], []>} : vector<8x64xbf16>, vector<64x32xbf16>, vector<8x32xf32> -> vector<8x32xf32>
    %715 = arith.addf %690, %714 : vector<8x32xf32>
    %c0_265 = arith.constant 0 : index
    %c0_266 = arith.constant 0 : index
    %716 = vector.load %arg23[%c0_265, %c0_266] : memref<1x32xf32, #tpu.memory_space<vmem>>, vector<1x32xf32>
    %717 = arith.mulf %715, %715 : vector<8x32xf32>
    %cst_267 = arith.constant dense<0.000000e+00> : vector<8xf32>
    %718 = vector.multi_reduction <add>, %717, %cst_267 [1] : vector<8x32xf32> to vector<8xf32>
    %719 = vector.shape_cast %718 : vector<8xf32> to vector<8x1xf32>
    %cst_268 = arith.constant 3.200000e+01 : f32
    %720 = vector.broadcast %cst_268 : f32 to vector<8x1xf32>
    %721 = arith.divf %719, %720 : vector<8x1xf32>
    %cst_269 = arith.constant 9.99999997E-7 : f32
    %722 = vector.broadcast %cst_269 : f32 to vector<8x1xf32>
    %723 = arith.addf %721, %722 : vector<8x1xf32>
    %724 = math.rsqrt %723 : vector<8x1xf32>
    %725 = vector.broadcast %724 : vector<8x1xf32> to vector<8x32xf32>
    %726 = arith.mulf %715, %725 : vector<8x32xf32>
    %727 = vector.broadcast %716 : vector<1x32xf32> to vector<8x32xf32>
    %728 = arith.mulf %726, %727 : vector<8x32xf32>
    %c0_270 = arith.constant 0 : index
    %c0_271 = arith.constant 0 : index
    %729 = vector.load %arg24[%c0_270, %c0_271] : memref<32x512xbf16, #tpu.memory_space<vmem>>, vector<32x512xbf16>
    %730 = arith.truncf %728 : vector<8x32xf32> to vector<8x32xbf16>
    %cst_272 = arith.constant dense<0.000000e+00> : vector<8x512xf32>
    %731 = tpu.matmul %730, %729, %cst_272 {dimension_numbers = #tpu.dot_dimension_numbers<[1], [0], [0], [1], [0, 0, 1, 1], [], []>} : vector<8x32xbf16>, vector<32x512xbf16>, vector<8x512xf32> -> vector<8x512xf32>
    %c0_273 = arith.constant 0 : index
    %c0_274 = arith.constant 0 : index
    %732 = vector.load %arg25[%c0_273, %c0_274] : memref<1x512xf32, #tpu.memory_space<vmem>>, vector<1x512xf32>
    %733 = vector.broadcast %732 : vector<1x512xf32> to vector<8x512xf32>
    %734 = arith.addf %731, %733 : vector<8x512xf32>
    %c0_275 = arith.constant 0 : index
    %c0_276 = arith.constant 0 : index
    %735 = vector.load %arg26[%c0_275, %c0_276] : memref<1x512xi32, #tpu.memory_space<vmem>>, vector<1x512xi32>
    %c0_i32 = arith.constant 0 : i32
    %736 = vector.broadcast %c0_i32 : i32 to vector<1x512xi32>
    %737 = arith.cmpi ne, %735, %736 : vector<1x512xi32>
    %cst_277 = arith.constant -1.000000e+09 : f32
    %738 = vector.shape_cast %737 : vector<1x512xi1> to vector<1x512xi1>
    %739 = vector.broadcast %738 : vector<1x512xi1> to vector<8x512xi1>
    %740 = vector.broadcast %cst_277 : f32 to vector<8x512xf32>
    %741 = arith.select %739, %734, %740 : vector<8x512xi1>, vector<8x512xf32>
    %c0_278 = arith.constant 0 : index
    %c0_279 = arith.constant 0 : index
    %c0_280 = arith.constant 0 : index
    %742 = vector.load %arg27[%c0_278, %c0_279, %c0_280] : memref<1x8x512xf32, #tpu.memory_space<vmem>>, vector<1x8x512xf32>
    %743 = vector.shape_cast %742 : vector<1x8x512xf32> to vector<8x512xf32>
    %744 = vector.shape_cast %741 : vector<8x512xf32> to vector<1x8x512xf32>
    tpu.vector_store %arg27[%c0_278, %c0_279, %c0_280], %744 {strides = array<i32>} : memref<1x8x512xf32, #tpu.memory_space<vmem>>, vector<1x8x512xf32>,
    return
  }
  func.func @transform_0(%arg0: i32) -> (i32, i32, i32) {
    %c0_i32 = arith.constant 0 : i32
    %c0_i32_0 = arith.constant 0 : i32
    %c0_i32_1 = arith.constant 0 : i32
    return %arg0, %c0_i32, %c0_i32_0 : i32, i32, i32
  }
  func.func @transform_1(%arg0: i32) -> (i32, i32, i32) {
    %c0_i32 = arith.constant 0 : i32
    %c0_i32_0 = arith.constant 0 : i32
    %c0_i32_1 = arith.constant 0 : i32
    return %arg0, %c0_i32, %c0_i32_0 : i32, i32, i32
  }
  func.func @transform_2(%arg0: i32) -> (i32, i32, i32) {
    %c0_i32 = arith.constant 0 : i32
    %c0_i32_0 = arith.constant 0 : i32
    %c0_i32_1 = arith.constant 0 : i32
    return %arg0, %c0_i32, %c0_i32_0 : i32, i32, i32
  }
  func.func @transform_3(%arg0: i32) -> (i32, i32, i32) {
    %c0_i32 = arith.constant 0 : i32
    %c0_i32_0 = arith.constant 0 : i32
    %c0_i32_1 = arith.constant 0 : i32
    %c0_i32_2 = arith.constant 0 : i32
    return %c0_i32, %c0_i32_0, %c0_i32_1 : i32, i32, i32
  }
  func.func @transform_4(%arg0: i32) -> (i32, i32, i32) {
    %c0_i32 = arith.constant 0 : i32
    %c0_i32_0 = arith.constant 0 : i32
    %c0_i32_1 = arith.constant 0 : i32
    %c0_i32_2 = arith.constant 0 : i32
    return %c0_i32, %c0_i32_0, %c0_i32_1 : i32, i32, i32
  }
  func.func @transform_5(%arg0: i32) -> (i32, i32, i32) {
    %c0_i32 = arith.constant 0 : i32
    %c0_i32_0 = arith.constant 0 : i32
    %c0_i32_1 = arith.constant 0 : i32
    %c0_i32_2 = arith.constant 0 : i32
    return %c0_i32, %c0_i32_0, %c0_i32_1 : i32, i32, i32
  }
  func.func @transform_6(%arg0: i32) -> (i32, i32, i32) {
    %c0_i32 = arith.constant 0 : i32
    %c0_i32_0 = arith.constant 0 : i32
    %c0_i32_1 = arith.constant 0 : i32
    %c0_i32_2 = arith.constant 0 : i32
    return %c0_i32, %c0_i32_0, %c0_i32_1 : i32, i32, i32
  }
  func.func @transform_7(%arg0: i32) -> (i32, i32, i32) {
    %c0_i32 = arith.constant 0 : i32
    %c0_i32_0 = arith.constant 0 : i32
    %c0_i32_1 = arith.constant 0 : i32
    %c0_i32_2 = arith.constant 0 : i32
    return %c0_i32, %c0_i32_0, %c0_i32_1 : i32, i32, i32
  }
  func.func @transform_8(%arg0: i32) -> (i32, i32, i32) {
    %c0_i32 = arith.constant 0 : i32
    %c0_i32_0 = arith.constant 0 : i32
    %c0_i32_1 = arith.constant 0 : i32
    %c0_i32_2 = arith.constant 0 : i32
    return %c0_i32, %c0_i32_0, %c0_i32_1 : i32, i32, i32
  }
  func.func @transform_9(%arg0: i32) -> (i32, i32, i32) {
    %c0_i32 = arith.constant 0 : i32
    %c0_i32_0 = arith.constant 0 : i32
    %c0_i32_1 = arith.constant 0 : i32
    %c0_i32_2 = arith.constant 0 : i32
    return %c0_i32, %c0_i32_0, %c0_i32_1 : i32, i32, i32
  }
  func.func @transform_10(%arg0: i32) -> (i32, i32, i32) {
    %c0_i32 = arith.constant 0 : i32
    %c0_i32_0 = arith.constant 0 : i32
    %c0_i32_1 = arith.constant 0 : i32
    %c0_i32_2 = arith.constant 0 : i32
    return %c0_i32, %c0_i32_0, %c0_i32_1 : i32, i32, i32
  }
  func.func @transform_11(%arg0: i32) -> (i32, i32) {
    %c0_i32 = arith.constant 0 : i32
    %c0_i32_0 = arith.constant 0 : i32
    %c0_i32_1 = arith.constant 0 : i32
    return %c0_i32, %c0_i32_0 : i32, i32
  }
  func.func @transform_12(%arg0: i32) -> (i32, i32, i32) {
    %c0_i32 = arith.constant 0 : i32
    %c0_i32_0 = arith.constant 0 : i32
    %c0_i32_1 = arith.constant 0 : i32
    %c0_i32_2 = arith.constant 0 : i32
    return %c0_i32, %c0_i32_0, %c0_i32_1 : i32, i32, i32
  }
  func.func @transform_13(%arg0: i32) -> (i32, i32, i32) {
    %c0_i32 = arith.constant 0 : i32
    %c0_i32_0 = arith.constant 0 : i32
    %c0_i32_1 = arith.constant 0 : i32
    %c0_i32_2 = arith.constant 0 : i32
    return %c0_i32, %c0_i32_0, %c0_i32_1 : i32, i32, i32
  }
  func.func @transform_14(%arg0: i32) -> (i32, i32, i32) {
    %c0_i32 = arith.constant 0 : i32
    %c0_i32_0 = arith.constant 0 : i32
    %c0_i32_1 = arith.constant 0 : i32
    %c0_i32_2 = arith.constant 0 : i32
    return %c0_i32, %c0_i32_0, %c0_i32_1 : i32, i32, i32
  }
  func.func @transform_15(%arg0: i32) -> (i32, i32, i32) {
    %c0_i32 = arith.constant 0 : i32
    %c0_i32_0 = arith.constant 0 : i32
    %c0_i32_1 = arith.constant 0 : i32
    %c0_i32_2 = arith.constant 0 : i32
    return %c0_i32, %c0_i32_0, %c0_i32_1 : i32, i32, i32
  }
  func.func @transform_16(%arg0: i32) -> (i32, i32, i32) {
    %c0_i32 = arith.constant 0 : i32
    %c0_i32_0 = arith.constant 0 : i32
    %c0_i32_1 = arith.constant 0 : i32
    %c0_i32_2 = arith.constant 0 : i32
    return %c0_i32, %c0_i32_0, %c0_i32_1 : i32, i32, i32
  }
  func.func @transform_17(%arg0: i32) -> (i32, i32, i32) {
    %c0_i32 = arith.constant 0 : i32
    %c0_i32_0 = arith.constant 0 : i32
    %c0_i32_1 = arith.constant 0 : i32
    %c0_i32_2 = arith.constant 0 : i32
    return %c0_i32, %c0_i32_0, %c0_i32_1 : i32, i32, i32
  }
  func.func @transform_18(%arg0: i32) -> (i32, i32, i32) {
    %c0_i32 = arith.constant 0 : i32
    %c0_i32_0 = arith.constant 0 : i32
    %c0_i32_1 = arith.constant 0 : i32
    %c0_i32_2 = arith.constant 0 : i32
    return %c0_i32, %c0_i32_0, %c0_i32_1 : i32, i32, i32
  }
  func.func @transform_19(%arg0: i32) -> (i32, i32, i32) {
    %c0_i32 = arith.constant 0 : i32
    %c0_i32_0 = arith.constant 0 : i32
    %c0_i32_1 = arith.constant 0 : i32
    %c0_i32_2 = arith.constant 0 : i32
    return %c0_i32, %c0_i32_0, %c0_i32_1 : i32, i32, i32
  }
  func.func @transform_20(%arg0: i32) -> (i32, i32, i32) {
    %c0_i32 = arith.constant 0 : i32
    %c0_i32_0 = arith.constant 0 : i32
    %c0_i32_1 = arith.constant 0 : i32
    %c0_i32_2 = arith.constant 0 : i32
    return %c0_i32, %c0_i32_0, %c0_i32_1 : i32, i32, i32
  }
  func.func @transform_21(%arg0: i32) -> (i32, i32, i32) {
    %c0_i32 = arith.constant 0 : i32
    %c0_i32_0 = arith.constant 0 : i32
    %c0_i32_1 = arith.constant 0 : i32
    %c0_i32_2 = arith.constant 0 : i32
    return %c0_i32, %c0_i32_0, %c0_i32_1 : i32, i32, i32
  }
  func.func @transform_22(%arg0: i32) -> (i32, i32) {
    %c0_i32 = arith.constant 0 : i32
    %c0_i32_0 = arith.constant 0 : i32
    %c0_i32_1 = arith.constant 0 : i32
    return %c0_i32, %c0_i32_0 : i32, i32
  }
  func.func @transform_23(%arg0: i32) -> (i32, i32) {
    %c0_i32 = arith.constant 0 : i32
    %c0_i32_0 = arith.constant 0 : i32
    %c0_i32_1 = arith.constant 0 : i32
    return %c0_i32, %c0_i32_0 : i32, i32
  }
  func.func @transform_24(%arg0: i32) -> (i32, i32) {
    %c0_i32 = arith.constant 0 : i32
    %c0_i32_0 = arith.constant 0 : i32
    %c0_i32_1 = arith.constant 0 : i32
    return %c0_i32, %c0_i32_0 : i32, i32
  }
  func.func @transform_25(%arg0: i32) -> (i32, i32) {
    %c0_i32 = arith.constant 0 : i32
    %c0_i32_0 = arith.constant 0 : i32
    %c0_i32_1 = arith.constant 0 : i32
    return %c0_i32, %c0_i32_0 : i32, i32
  }
  func.func @transform_26(%arg0: i32) -> (i32, i32, i32) {
    %c0_i32 = arith.constant 0 : i32
    %c0_i32_0 = arith.constant 0 : i32
    %c0_i32_1 = arith.constant 0 : i32
    return %arg0, %c0_i32, %c0_i32_0 : i32, i32, i32
  }
}

</mosaic_0001>

<bundles_post_ra>
// kernel: t5_forward.1
= control target key start
LH: loop header
LB: loop body
LE: loop exit
PB: predicated region body
PF: predicated region fallthrough
CT: control target
= control target key end

     0   :  { %s7965_s27 = smov 0   ;;  %s8919_s0 = inlined_call_operand.vmem [shape: f32[2,8,32], index: 0, kind: input, shape index: {}]   ;;  %s8920_s1 = inlined_call_operand.vmem [shape: f32[2,8,32], index: 1, kind: input, shape index: {}]   ;;  %s8921_s2 = inlined_call_operand.vmem [shape: f32[2,1,8], index: 2, kind: input, shape index: {}]   ;;  %s8922_s3 = inlined_call_operand.vmem [shape: f32[4,8,8], index: 3, kind: input, shape index: {}]   ;;  %s8923_s4 = inlined_call_operand.vmem [shape: f32[4,8,8], index: 4, kind: input, shape index: {}]   ;;  %s8924_s5 = inlined_call_operand.vmem [shape: f32[2,1,32], index: 5, kind: input, shape index: {}]   ;;  %s8925_s6 = inlined_call_operand.vmem [shape: bf16[2,32,96], index: 6, kind: input, shape index: {}]   ;;  %s8926_s7 = inlined_call_operand.vmem [shape: bf16[2,32,32], index: 7, kind: input, shape index: {}]   ;;  %s8927_s8 = inlined_call_operand.vmem [shape: f32[2,1,32], index: 8, kind: input, shape index: {}]   ;;  %s8928_s9 = inlined_call_operand.vmem [shape: bf16[2,32,64], index: 9, kind: input, shape index: {}]   ;;  %s8929_s10 = inlined_call_operand.vmem [shape: bf16[2,64,32], index: 10, kind: input, shape index: {}]   ;;  %s8930_s11 = inlined_call_operand.vmem [shape: f32[1,32], index: 11, kind: input, shape index: {}]   ;;  %s8931_s12 = inlined_call_operand.vmem [shape: f32[2,1,32], index: 12, kind: input, shape index: {}]   ;;  %s8932_s13 = inlined_call_operand.vmem [shape: bf16[2,32,96], index: 13, kind: input, shape index: {}]   ;;  %s8933_s14 = inlined_call_operand.vmem [shape: bf16[2,32,32], index: 14, kind: input, shape index: {}]   ;;  %s8934_s15 = inlined_call_operand.vmem [shape: f32[2,1,32], index: 15, kind: input, shape index: {}]   ;;  %s8935_s16 = inlined_call_operand.vmem [shape: bf16[2,32,32], index: 16, kind: input, shape index: {}]   ;;  %s8936_s17 = inlined_call_operand.vmem [shape: bf16[2,32,64], index: 17, kind: input, shape index: {}]   ;;  %s8937_s18 = inlined_call_operand.vmem [shape: bf16[2,32,32], index: 18, kind: input, shape index: {}]   ;;  %s8938_s19 = inlined_call_operand.vmem [shape: f32[2,1,32], index: 19, kind: input, shape index: {}]   ;;  %s8939_s20 = inlined_call_operand.vmem [shape: bf16[2,32,64], index: 20, kind: input, shape index: {}]   ;;  %s8940_s21 = inlined_call_operand.vmem [shape: bf16[2,64,32], index: 21, kind: input, shape index: {}]   ;;  %s8941_s22 = inlined_call_operand.vmem [shape: f32[1,32], index: 22, kind: input, shape index: {}]   ;;  %s8942_s23 = inlined_call_operand.vmem [shape: bf16[32,512], index: 23, kind: input, shape index: {}]   ;;  %s8943_s24 = inlined_call_operand.vmem [shape: f32[1,512], index: 24, kind: input, shape index: {}]   ;;  %s8944_s25 = inlined_call_operand.vmem [shape: s32[1,512], index: 25, kind: input, shape index: {}]   ;;  %s8945_s26 = inlined_call_operand.vmem [shape: f32[2,8,512], index: 26, kind: output, shape index: {}]  }
   0x1   :  { %9000 = sst [smem:[#allocation5_spill]] %s8919_s0 }
   0x2   :  { %9001 = sst [smem:[#allocation6_spill]] %s8920_s1 }
   0x3   :  { %9002 = sst [smem:[#allocation7_spill]] %s8921_s2 }
   0x4   :  { %9003 = sst [smem:[#allocation8_spill]] %s8922_s3 }
   0x5   :  { %9004 = sst [smem:[#allocation9_spill]] %s8923_s4 }
   0x6   :  { %9005 = sst [smem:[#allocation10_spill]] %s8924_s5 }
   0x7   :  { %9006 = sst [smem:[#allocation11_spill]] %s8925_s6 }
   0x8   :  { %9007 = sst [smem:[#allocation12_spill]] %s8926_s7 }
   0x9   :  { %9008 = sst [smem:[#allocation13_spill]] %s8927_s8 }
   0xa   :  { %9009 = sst [smem:[#allocation14_spill]] %s8928_s9 }
   0xb   :  { %9010 = sst [smem:[#allocation15_spill]] %s8929_s10 }
   0xc   :  { %9011 = sst [smem:[#allocation16_spill]] %s8930_s11 }
   0xd   :  { %9012 = sst [smem:[#allocation17_spill]] %s8934_s15 }
   0xe   :  { %9013 = sst [smem:[#allocation18_spill]] %s8937_s18 }
   0xf   :  { %9014 = sst [smem:[#allocation19_spill]] %s8938_s19 }
  0x10   :  { %9015 = sst [smem:[#allocation20_spill]] %s8939_s20 }
  0x11   :  { %9016 = sst [smem:[#allocation21_spill]] %s8940_s21 }
  0x12   :  { %9017 = sst [smem:[#allocation22_spill]] %s8941_s22 }
  0x13   :  { %9018 = sst [smem:[#allocation23_spill]] %s8942_s23 }
  0x14   :  { %9019 = sst [smem:[#allocation24_spill]] %s8943_s24 }
  0x15   :  { %9020 = sst [smem:[#allocation25_spill]] %s8944_s25 }
  0x16   :  { %9021 = sst [smem:[#allocation26_spill]] %s8945_s26 }
  0x17 LB: > { %9022 = sst [smem:[#allocation2_spill]] %s7811_s27  ;;  %s6755_s3 = sadd.s32 4294967295, %s7811_s27   ;;  %s7811_s27 = sphi %s7965_s27, %s36_s27  }
  0x18   : > { %p6759_p0 = scmp.ge.s32.totalorder %s7811_s27, 1  ;;  %p728_p1 = scmp.lt.s32.totalorder %s7811_s27, 3 }
  0x1a   : > { %p729_p2 = pnand %p6759_p0, %p728_p1 }
  0x1c   : > { %732 = sbr.rel (%p729_p2) target bundleno = 11686 (0x2da6), region = 124 }
  0x21   : > { %p804_p3 = scmp.lt.s32.totalorder %s6755_s3, 1  ;;  %s9024_s4 = sld [smem:[#allocation5_spill]]  ;;  %vm843_vm0 = vcmask 261120   ;;  %v7813_v5 = vmov 0.0   ;;  %vm7814_vm1 = vmmov 0   ;;  %vm926_vm2 = vcmask 64512  }
  0x22   : > { %s9025_s30 = sld [smem:[#allocation11_spill]]  ;;  %7163 = vmatprep.subr.bf16.mxu0 %v7813_v5  ;;  %7167 = vmatprep.mubr.msk.bf16.mxu0 %vm7814_vm1, %v7813_v5  ;;  %s8979_s28 = smov 96   ;;  %vm1596_vm3 = vcmask 130048   ;;  %vm1598_vm4 = vcmask 195584   ;;  %vm1767_vm5 = vcmask 523264  }
  0x23   : > { %s9066_s3 = smov (!%p804_p3, %s6755_s3), 1  ;;  %7171 = vmatprep.subr.mxu1 %v7813_v5  ;;  %7173 = vmatprep.mubr.msk.f32.mxu1 %vm7814_vm1, %v7813_v5  ;;  %s9026_s1 = sld [smem:[#allocation10_spill]] }
  0x24   : > { %9023 = sst [smem:[#allocation3_spill]] %s9066_s3  ;;  %s8954_s7 = sshll.u32 %s9066_s3, 3 }
  0x25   : > { %s8971_s8 = smov 120   ;;  %s9027_s2 = sld [smem:[#allocation7_spill]] }
  0x26   : > { %s8955_s0 = smov 64   ;;  %s8981_s9 = smov 88  }
  0x27   : > { %s807_s29 = scalar_lea.vmem %s9024_s4, %s8954_s7  ;;  %s8961_s4 = smov 112  }
  0x28   : > { %v7981_v0 = vld [vmem:[%s807_s29] sm:$0xff]  ;;  %v7620_v3 = vld [vmem:[%s9025_s30 + $0x8] sm:$0xff]   ;;  %s8957_s29 = smov 104   ;;  %s9029_s7 = sld [smem:[#allocation8_spill]] }
  0x29   : > { %v842_v1 = vmul.f32 %v7981_v0, %v7981_v0  ;;  %v7621_v4 = vld [vmem:[%s9025_s30] sm:$0xff]   ;;  %7164 = vmatpush3.bf16.msra.mxu0 %v7620_v3  ;;  %s8959_s10 = smov 72   ;;  %s8973_s6 = smov 24  }
  0x2a   : > { %7165 = vmatprep.subr.bf16.mxu0 %v7813_v5  ;;  %v6765_v10 = vld [vmem:[%s9026_s1] ss:$0 sm:$0xff]  ;;  %s9039_s27 = smov 72   ;;  %s9043_s26 = smov 64  }
  0x2b   : > { %v844_v2 = vsel %vm843_vm0, %v842_v1, 0.0  ;;  %s8027_s5 = scalar_lea.vmem %s9027_s2, %s9066_s3  ;;  %s8969_s2 = smov 80  }
  0x2c   : > { %845 = vadd.xlane.f32.xlu0 %v844_v2  ;;  %9028 = sst [smem:[#allocation4_spill]] %s8027_s5  ;;  %v8030_v19 = vld [vmem:[%s8027_s5] ss:$0 sm:$0xff]  ;;  %s9044_s24 = smov 40  }
  0x2d   : > { %7166 = vmatpush3.bf16.msra.mxu0 %v7621_v4  ;;  %s9045_s23 = smov 8   ;;  %s9046_s19 = smov 16  }
  0x2e   : > { %7186 = vmatprep.subr.mxu0 %v7813_v5  ;;  %v822_v20 = vld [vmem:[%s9029_s7] sm:$0xff]  ;;  %v823_v41 = vld [vmem:[%s9029_s7 + $0x8] sm:$0xff]  ;;  %v824_v45 = vld [vmem:[%s9029_s7 + $0x10] sm:$0xff]  ;;  %s9047_s22 = smov 24   ;;  %s9048_s20 = sshll.u32 %s9066_s3, 3 }
  0x2f   : > { %v8036_v21 = vadd.f32 %v8030_v19, %v822_v20  ;;  %v8074_v43 = vadd.f32 %v8030_v19, %v823_v41  ;;  %v8081_v48 = vadd.f32 %v8030_v19, %v824_v45  ;;  %v825_v50 = vld [vmem:[%s9029_s7 + $0x18] sm:$0xff]  ;;  %s9033_s7 = sld [smem:[#allocation13_spill]] }
  0x30   : > { %v8089_v54 = vadd.f32 %v8030_v19, %v825_v50  ;;  %s9050_s21 = sld [smem:[#allocation9_spill]] }
  0x31   : > { %s9051_s11 = sld [smem:[#allocation16_spill]] }
  0x32   : > { %s9054_s5 = sld [smem:[#allocation18_spill]] }
  0x33   : > { %s9055_s3 = sld [smem:[#allocation20_spill]] }
  0xb5   : > { %v846_v6 = vpop.xlane.xlu0 %845 }
  0xb6   : > { %v848_v7 = vmul.f32 0.03125, %v846_v6 }
  0xb8   : > { %v849_v8 = vadd.f32 1e-06, %v848_v7 }
  0xba   : > { %7684 = vrsqrt.f32 %v849_v8 }
  0xc7   : > { %v7685_v9 = vpop.eup %7684 }
  0xc8   : > { %v851_v11 = vmul.f32 %v7685_v9, %v7981_v0 }
  0xca   : > { %v858_v12 = vmul.f32 %v6765_v10, %v851_v11 }
  0xcc   : > { %v863_v13 = vpack.c.bf16 %v858_v12, %v858_v12 }
  0xce   : > { %7168 = vmatmul.mubr.msk.bf16.vlgmr.msra.gmra.mxu0 %vm843_vm0, %v863_v13 }
  0xcf   : > { %7188 = vmatprep.mubr.msk.f32.mxu0 %vm7814_vm1, %v7813_v5 }
 0x18e   : > { %v8007_v14 = vpop.f32.mrf.mxu0 }
 0x18f   : > { %924 = vrot.lane.b32.xlu0 %v8007_v14, %s8979_s28  ;;  %s9038_s28 = smov 112  }
 0x190   : > { %v7169_v15 = vpop.f32.mrf.mxu0 }
 0x192   : > { %v916_v16 = vpop.f32.mrf.mxu0 }
 0x193   : > { %1088 = vrot.lane.b32.xlu0 %v8007_v14, %s8971_s8  ;;  %s8975_s8 = smov 16  }
 0x194   : > { %v7170_v17 = vpop.f32.mrf.mxu0 }
 0x197   : > { %1253 = vrot.lane.b32.xlu0 %v8007_v14, %s8961_s4  ;;  %s8967_s4 = smov 56  }
 0x19b   : > { %1418 = vrot.lane.b32.xlu0 %v8007_v14, %s8957_s29  ;;  %s8963_s29 = smov 40  }
 0x201   : > { %v925_v18 = vpop.permute.xlu0 %924 }
 0x202   : > { %7172 = vmatpush3.xpose.msk.msra.mxu1 %vm926_vm2, %v925_v18 }
 0x203   : > { %7176 = vmatprep.subr.mxu1 %v7813_v5 }
 0x205   : > { %7174 = vmatmul.mubr.msk.f32.vlgmr.msra.gmra.mxu1 %vm926_vm2, %v8007_v14  ;;  %v1089_v36 = vpop.permute.xlu0 %1088 }
 0x206   : > { %7178 = vmatprep.mubr.msk.f32.mxu1 %vm7814_vm1, %v7813_v5 }
 0x209   : > { %v1254_v38 = vpop.permute.xlu0 %1253 }
 0x20d   : > { %v1419_v40 = vpop.permute.xlu0 %1418 }
 0x2c5   : > { %v997_v22 = vpop.f32.mrf.mxu1 }
 0x2c6   : > { %v998_v23 = vadd.f32 %v997_v22, %v8036_v21 }
 0x2c7   : > { %v7175_v24 = vpop.f32.mrf.mxu1 }
 0x2c8   : > { %v1001_v25 = vsel %vm926_vm2, %v998_v23, -inf }
 0x2c9   : > { %1002 = vmax.xlane.f32.xlu1 %v1001_v25 }
 0x2da   : > { %1012 = vrot.lane.b32.xlu1 %v8007_v14, %s8955_s0  ;;  %s9031_s0 = sld [smem:[#allocation14_spill]] }
 0x2de   : > { %1090 = vrot.lane.b32.xlu1 %v8007_v14, %s8981_s9  ;;  %s9032_s9 = sld [smem:[#allocation15_spill]] }
 0x352   : > { %v1003_v26 = vpop.xlane.xlu1 %1002 }
 0x353   : > { %v1004_v27 = vsub.f32 %v998_v23, %v1003_v26 }
 0x355   : > { %v1005_v28 = vmul.f32 1.442695, %v1004_v27 }
 0x356   : > { %v1013_v29 = vpop.permute.xlu1 %1012 }
 0x357   : > { %7686 = vpow2.f32 %v1005_v28  ;;  %7177 = vmatpush3.msra.mxu1 %v1013_v29 }
 0x358   : > { %7181 = vmatprep.subr.mxu1 %v7813_v5 }
 0x35a   : > { %v1091_v32 = vpop.permute.xlu1 %1090 }
 0x364   : > { %v7687_v30 = vpop.eup %7686 }
 0x365   : > { %v1007_v31 = vsel %vm926_vm2, %v7687_v30, 0.0 }
 0x366   : > { %1008 = vadd.xlane.f32.xlu1 %v1007_v31 }
 0x377   : > { %1255 = vrot.lane.b32.xlu1 %v8007_v14, %s8969_s2  ;;  %s8977_s2 = smov 8  }
 0x37b   : > { %1420 = vrot.lane.b32.xlu1 %v8007_v14, %s8959_s10  ;;  %s8965_s10 = smov 48  }
 0x3ef   : > { %v1009_v33 = vpop.xlane.xlu1 %1008 }
 0x3f0   : > { %7688 = vrcp.f32 %v1009_v33 }
 0x3f3   : > { %v1256_v37 = vpop.permute.xlu1 %1255 }
 0x3f7   : > { %v1421_v39 = vpop.permute.xlu1 %1420 }
 0x3fd   : > { %v7689_v34 = vpop.eup %7688 }
 0x3fe   : > { %v1011_v35 = vmul.f32 %v7689_v34, %v7687_v30 }
 0x400   : > { %7179 = vmatmul.mubr.msk.f32.vlgmr.msra.gmra.mxu1 %vm926_vm2, %v1011_v35 }
 0x401   : > { %7182 = vmatpush3.xpose.msk.msra.mxu1 %vm926_vm2, %v1091_v32  ;;  %7183 = vmatprep.mubr.msk.f32.mxu1 %vm7814_vm1, %v7813_v5 }
 0x402   : > { %7191 = vmatprep.subr.mxu1 %v7813_v5 }
 0x404   : > { %7184 = vmatmul.mubr.msk.f32.vlgmr.msra.gmra.mxu1 %vm926_vm2, %v1089_v36 }
 0x405   : > { %7192 = vmatpush3.xpose.msk.msra.mxu1 %vm926_vm2, %v1256_v37  ;;  %7193 = vmatprep.mubr.msk.f32.mxu1 %vm7814_vm1, %v7813_v5 }
 0x406   : > { %7201 = vmatprep.subr.mxu1 %v7813_v5 }
 0x408   : > { %7194 = vmatmul.mubr.msk.f32.vlgmr.msra.gmra.mxu1 %vm926_vm2, %v1254_v38 }
 0x409   : > { %7202 = vmatpush3.xpose.msk.msra.mxu1 %vm926_vm2, %v1421_v39  ;;  %7203 = vmatprep.mubr.msk.f32.mxu1 %vm7814_vm1, %v7813_v5 }
 0x40a   : > { %7211 = vmatprep.subr.bf16.mxu1 %v7813_v5 }
 0x40c   : > { %7204 = vmatmul.mubr.msk.f32.vlgmr.msra.gmra.mxu1 %vm926_vm2, %v1419_v40 }
 0x40d   : > { %7215 = vmatprep.mubr.msk.bf16.mxu1 %vm7814_vm1, %v7813_v5 }
 0x4c0   : > { %v8071_v42 = vpop.f32.mrf.mxu1 }
 0x4c2   : > { %v7180_v44 = vpop.f32.mrf.mxu1 }
 0x4c4   : > { %v1162_v46 = vpop.f32.mrf.mxu1 }
 0x4c5   : > { %v1163_v47 = vadd.f32 %v1162_v46, %v8074_v43 }
 0x4c6   : > { %v7185_v49 = vpop.f32.mrf.mxu1 }
 0x4c7   : > { %v1166_v51 = vsel %vm926_vm2, %v1163_v47, -inf }
 0x4c8   : > { %1167 = vmax.xlane.f32.xlu1 %v1166_v51  ;;  %v1327_v52 = vpop.f32.mrf.mxu1  ;;  %v7624_v51 = vld [vmem:[%s9031_s0 + $0x8] sm:$0xff]  }
 0x4c9   : > { %v1328_v53 = vadd.f32 %v1327_v52, %v8081_v48  ;;  %v7625_v52 = vld [vmem:[%s9031_s0] sm:$0xff]  }
 0x4ca   : > { %v7195_v55 = vpop.f32.mrf.mxu1 }
 0x4cb   : > { %v1331_v56 = vsel %vm926_vm2, %v1328_v53, -inf  ;;  %v7628_v55 = vld [vmem:[%s9032_s9 + $0x8] sm:$0xff]  }
 0x4cc   : > { %1332 = vmax.xlane.f32.xlu0 %v1331_v56  ;;  %v1492_v57 = vpop.f32.mrf.mxu1 }
 0x4cd   : > { %v1493_v58 = vadd.f32 %v1492_v57, %v8089_v54 }
 0x4ce   : > { %v7205_v59 = vpop.f32.mrf.mxu1 }
 0x4cf   : > { %v1496_v60 = vsel %vm926_vm2, %v1493_v58, -inf }
 0x4d0   : > { %1497 = vmax.xlane.f32.xlu0 %v1496_v60  ;;  %v6784_v60 = vld [vmem:[%s9033_s7] ss:$0 sm:$0xff] }
 0x4d9   : > { %1177 = vrot.lane.b32.xlu1 %v8007_v14, %s8967_s4  ;;  %s9036_s4 = smov 120  }
 0x551   : > { %v1168_v61 = vpop.xlane.xlu1 %1167 }
 0x552   : > { %v1169_v62 = vsub.f32 %v1163_v47, %v1168_v61 }
 0x554   : > { %v1170_v63 = vmul.f32 1.442695, %v1169_v62 }
 0x555   : > { %v1178_v1 = vpop.permute.xlu1 %1177  ;;  %v1333_v2 = vpop.xlane.xlu0 %1332 }
 0x556   : > { %7690 = vpow2.f32 %v1170_v63  ;;  %v1334_v3 = vsub.f32 %v1328_v53, %v1333_v2  ;;  %7187 = vmatpush3.msra.mxu0 %v1178_v1  ;;  %v7627_v53 = vld [vmem:[%s9032_s9 + $0x10] sm:$0xff]   ;;  %v7629_v1 = vld [vmem:[%s9032_s9] sm:$0xff]  }
 0x557   : > { %7196 = vmatprep.subr.mxu0 %v7813_v5 }
 0x558   : > { %v1335_v4 = vmul.f32 1.442695, %v1334_v3 }
 0x559   : > { %v1498_v6 = vpop.xlane.xlu0 %1497 }
 0x55a   : > { %7692 = vpow2.f32 %v1335_v4  ;;  %v1499_v7 = vsub.f32 %v1493_v58, %v1498_v6 }
 0x55c   : > { %v1500_v8 = vmul.f32 1.442695, %v1499_v7 }
 0x55e   : > { %7694 = vpow2.f32 %v1500_v8 }
 0x563   : > { %v7691_v9 = vpop.eup %7690 }
 0x564   : > { %v1172_v10 = vsel %vm926_vm2, %v7691_v9, 0.0 }
 0x565   : > { %1173 = vadd.xlane.f32.xlu0 %v1172_v10 }
 0x567   : > { %v7693_v11 = vpop.eup %7692 }
 0x568   : > { %v1337_v12 = vsel %vm926_vm2, %v7693_v11, 0.0 }
 0x569   : > { %1338 = vadd.xlane.f32.xlu1 %v1337_v12 }
 0x56b   : > { %v7695_v13 = vpop.eup %7694 }
 0x56c   : > { %v1502_v15 = vsel %vm926_vm2, %v7695_v13, 0.0 }
 0x56d   : > { %1503 = vadd.xlane.f32.xlu0 %v1502_v15 }
 0x57a   : > { %1507 = vrot.lane.b32.xlu1 %v8007_v14, %s8963_s29  ;;  %s9030_s29 = sld [smem:[#allocation12_spill]] }
 0x580   : > { %v7622_v27 = vld [vmem:[%s9030_s29 + $0x8] sm:$0xff]   ;;  %v7623_v28 = vld [vmem:[%s9030_s29] sm:$0xff]  }
 0x581   : > { %7212 = vmatpush3.bf16.msra.mxu1 %v7622_v27 }
 0x582   : > { %7213 = vmatprep.subr.bf16.mxu1 %v7813_v5 }
 0x583   : > { %1342 = vrot.lane.b32.xlu0 %v8007_v14, %s8965_s10  ;;  %s9035_s10 = smov 96  }
 0x585   : > { %7214 = vmatpush3.bf16.msra.mxu1 %v7623_v28 }
 0x586   : > { %7227 = vmatprep.subr.bf16.mxu1 %v7813_v5 }
 0x5ee   : > { %v1174_v16 = vpop.xlane.xlu0 %1173 }
 0x5ef   : > { %7696 = vrcp.f32 %v1174_v16 }
 0x5f2   : > { %v1339_v17 = vpop.xlane.xlu1 %1338 }
 0x5f3   : > { %7698 = vrcp.f32 %v1339_v17  ;;  %v7630_v17 = vld [vmem:[%s9025_s30 + $0x18] sm:$0xff]  }
 0x5f6   : > { %v1504_v18 = vpop.xlane.xlu0 %1503  ;;  %v1508_v14 = vpop.permute.xlu1 %1507 }
 0x5f7   : > { %7700 = vrcp.f32 %v1504_v18  ;;  %v7631_v18 = vld [vmem:[%s9025_s30 + $0x10] sm:$0xff]   ;;  %s9042_s30 = smov 48  }
 0x5fa   : > { %v1343_v22 = vpop.permute.xlu0 %1342 }
 0x5fc   : > { %v7697_v19 = vpop.eup %7696 }
 0x5fd   : > { %v1176_v20 = vmul.f32 %v7697_v19, %v7691_v9 }
 0x5ff   : > { %7189 = vmatmul.mubr.msk.f32.vlgmr.msra.gmra.mxu0 %vm926_vm2, %v1176_v20 }
 0x600   : > { %v7699_v23 = vpop.eup %7698  ;;  %7197 = vmatpush3.msra.mxu0 %v1343_v22  ;;  %7198 = vmatprep.mubr.msk.f32.mxu0 %vm7814_vm1, %v7813_v5 }
 0x601   : > { %7206 = vmatprep.subr.mxu0 %v7813_v5  ;;  %v1341_v24 = vmul.f32 %v7699_v23, %v7693_v11 }
 0x603   : > { %7199 = vmatmul.mubr.msk.f32.vlgmr.msra.gmra.mxu0 %vm926_vm2, %v1341_v24  ;;  %v6794_v24 = vld [vmem:[%s9026_s1 + $0x1] ss:$0 sm:$0xff]  ;;  %s9041_s1 = smov 56  }
 0x604   : > { %v7701_v25 = vpop.eup %7700  ;;  %7207 = vmatpush3.msra.mxu0 %v1508_v14  ;;  %7208 = vmatprep.mubr.msk.f32.mxu0 %vm7814_vm1, %v7813_v5 }
 0x605   : > { %v1506_v26 = vmul.f32 %v7701_v25, %v7695_v13  ;;  %7219 = vmatprep.subr.bf16.mxu0 %v7813_v5 }
 0x607   : > { %7209 = vmatmul.mubr.msk.f32.vlgmr.msra.gmra.mxu0 %vm926_vm2, %v1506_v26 }
 0x608   : > { %7223 = vmatprep.mubr.msk.bf16.mxu0 %vm7814_vm1, %v7813_v5  ;;  %7220 = vmatpush3.bf16.msra.mxu0 %v7624_v51 }
 0x609   : > { %7221 = vmatprep.subr.bf16.mxu0 %v7813_v5 }
 0x60c   : > { %7222 = vmatpush3.bf16.msra.mxu0 %v7625_v52 }
 0x60d   : > { %7239 = vmatprep.subr.bf16.mxu0 %v7813_v5 }
 0x6bf   : > { %v1249_v29 = vpop.f32.mrf.mxu0 }
 0x6c0   : > { %1584 = vrot.lane.b32.xlu1 %v1249_v29, %s8977_s2  ;;  %s9040_s2 = smov 104  }
 0x6c1   : > { %v7190_v30 = vpop.f32.mrf.mxu0 }
 0x6c3   : > { %v1414_v31 = vpop.f32.mrf.mxu0 }
 0x6c4   : > { %1588 = vrot.lane.b32.xlu1 %v1414_v31, %s8975_s8  ;;  %s9037_s8 = smov 80  }
 0x6c5   : > { %v7200_v32 = vpop.f32.mrf.mxu0 }
 0x6c7   : > { %v1579_v33 = vpop.f32.mrf.mxu0 }
 0x6c8   : > { %1592 = vrot.lane.b32.xlu0 %v1579_v33, %s8973_s6  ;;  %s9034_s6 = smov 88  }
 0x6c9   : > { %v7210_v34 = vpop.f32.mrf.mxu0 }
 0x732   : > { %v1585_v35 = vpop.permute.xlu1 %1584 }
 0x733   : > { %v1595_v37 = vsel %vm926_vm2, %v8071_v42, %v1585_v35 }
 0x736   : > { %v1589_v36 = vpop.permute.xlu1 %1588 }
 0x737   : > { %v1597_v38 = vsel %vm1596_vm3, %v1595_v37, %v1589_v36 }
 0x73a   : > { %v1593_v39 = vpop.permute.xlu0 %1592 }
 0x73b   : > { %v1599_v40 = vsel %vm1598_vm4, %v1597_v38, %v1593_v39 }
 0x73c   : > { %v1600_v41 = vpack.c.bf16 %v1599_v40, %v1599_v40 }
 0x73e   : > { %7216 = vmatmul.mubr.msk.bf16.vlgmr.msra.gmra.mxu1 %vm843_vm0, %v1600_v41 }
 0x73f   : > { %7235 = vmatprep.mubr.msk.bf16.mxu1 %vm7814_vm1, %v7813_v5 }
 0x7fe   : > { %v1650_v44 = vpop.f32.mrf.mxu1 }
 0x7ff   : > { %v1656_v45 = vadd.f32 %v1650_v44, %v7981_v0  ;;  %v7626_v0 = vld [vmem:[%s9032_s9 + $0x18] sm:$0xff]  }
 0x800   : > { %v7217_v46 = vpop.f32.mrf.mxu1  ;;  %7228 = vmatpush3.bf16.msra.mxu1 %v7626_v0 }
 0x801   : > { %v1658_v47 = vmul.f32 %v1656_v45, %v1656_v45  ;;  %7229 = vmatprep.subr.bf16.mxu1 %v7813_v5 }
 0x802   : > { %v1653_v49 = vpop.f32.mrf.mxu1 }
 0x803   : > { %v1659_v50 = vsel %vm843_vm0, %v1658_v47, 0.0 }
 0x804   : > { %1660 = vadd.xlane.f32.xlu1 %v1659_v50  ;;  %v7218_v42 = vpop.f32.mrf.mxu1  ;;  %7230 = vmatpush3.bf16.msra.mxu1 %v7627_v53 }
 0x805   : > { %7231 = vmatprep.subr.bf16.mxu1 %v7813_v5 }
 0x808   : > { %7232 = vmatpush3.bf16.msra.mxu1 %v7628_v55 }
 0x809   : > { %7233 = vmatprep.subr.bf16.mxu1 %v7813_v5 }
 0x80c   : > { %7234 = vmatpush3.bf16.msra.mxu1 %v7629_v1 }
 0x80d   : > { %7257 = vmatprep.subr.mxu1 %v7813_v5 }
 0x88d   : > { %v1661_v56 = vpop.xlane.xlu1 %1660 }
 0x88e   : > { %v1662_v57 = vmul.f32 0.03125, %v1661_v56 }
 0x890   : > { %v1663_v58 = vadd.f32 1e-06, %v1662_v57 }
 0x892   : > { %7702 = vrsqrt.f32 %v1663_v58 }
 0x89f   : > { %v7703_v59 = vpop.eup %7702 }
 0x8a0   : > { %v1665_v61 = vmul.f32 %v7703_v59, %v1656_v45 }
 0x8a2   : > { %v1672_v62 = vmul.f32 %v6784_v60, %v1665_v61 }
 0x8a4   : > { %v1677_v63 = vpack.c.bf16 %v1672_v62, %v1672_v62 }
 0x8a6   : > { %7224 = vmatmul.mubr.msk.bf16.vlgmr.msra.gmra.mxu0 %vm843_vm0, %v1677_v63 }
 0x8a7   : > { %7243 = vmatprep.mubr.msk.bf16.mxu0 %vm7814_vm1, %v7813_v5  ;;  %7240 = vmatpush3.bf16.msra.mxu0 %v7630_v17 }
 0x8a8   : > { %7241 = vmatprep.subr.bf16.mxu0 %v7813_v5 }
 0x8ab   : > { %7242 = vmatpush3.bf16.msra.mxu0 %v7631_v18 }
 0x8ac   : > { %7247 = vmatprep.subr.mxu0 %v7813_v5 }
 0x966   : > { %v1727_v2 = vpop.f32.mrf.mxu0 }
 0x967   : > { %v1733_v3 = vmax.f32 %v1727_v2, 0.0 }
 0x968   : > { %v7225_v4 = vpop.f32.mrf.mxu0 }
 0x969   : > { %v1742_v6 = vpack.c.bf16 %v1733_v3, %v1733_v3 }
 0x96a   : > { %v1730_v7 = vpop.f32.mrf.mxu0 }
 0x96b   : > { %7236 = vmatmul.mubr.msk.bf16.vlgmr.msra.gmra.mxu1 %vm1767_vm5, %v1742_v6 }
 0x96c   : > { %v7226_v8 = vpop.f32.mrf.mxu0  ;;  %7259 = vmatprep.mubr.msk.f32.mxu1 %vm7814_vm1, %v7813_v5 }
 0xa2b   : > { %v1805_v9 = vpop.f32.mrf.mxu1 }
 0xa2c   : > { %v8168_v10 = vadd.f32 %v1805_v9, %v1656_v45 }
 0xa2d   : > { %v7237_v11 = vpop.f32.mrf.mxu1 }
 0xa2e   : > { %v1814_v12 = vmul.f32 %v8168_v10, %v8168_v10 }
 0xa2f   : > { %v1808_v13 = vpop.f32.mrf.mxu1 }
 0xa30   : > { %v1815_v15 = vsel %vm843_vm0, %v1814_v12, 0.0 }
 0xa31   : > { %1816 = vadd.xlane.f32.xlu0 %v1815_v15  ;;  %v7238_v16 = vpop.f32.mrf.mxu1 }
 0xaba   : > { %v1817_v19 = vpop.xlane.xlu0 %1816 }
 0xabb   : > { %v1818_v20 = vmul.f32 0.03125, %v1817_v19 }
 0xabd   : > { %v1819_v22 = vadd.f32 1e-06, %v1818_v20 }
 0xabf   : > { %7704 = vrsqrt.f32 %v1819_v22 }
 0xacc   : > { %v7705_v23 = vpop.eup %7704 }
 0xacd   : > { %v1821_v14 = vmul.f32 %v7705_v23, %v8168_v10 }
 0xacf   : > { %v1828_v25 = vmul.f32 %v6794_v24, %v1821_v14 }
 0xad1   : > { %v1834_v26 = vpack.c.bf16 %v1828_v25, %v1828_v25 }
 0xad3   : > { %7244 = vmatmul.mubr.msk.bf16.vlgmr.msra.gmra.mxu0 %vm843_vm0, %v1834_v26 }
 0xad4   : > { %7249 = vmatprep.mubr.msk.f32.mxu0 %vm7814_vm1, %v7813_v5 }
 0xb93   : > { %v8188_v27 = vpop.f32.mrf.mxu0 }
 0xb94   : > { %2061 = vrot.lane.b32.xlu1 %v8188_v27, %s9034_s6  ;;  %1896 = vrot.lane.b32.xlu0 %v8188_v27, %s9035_s10 }
 0xb95   : > { %v7245_v28 = vpop.f32.mrf.mxu0 }
 0xb96   : > { %v7632_v28 = vld [vmem:[%s9030_s29 + $0x18] sm:$0xff]  }
 0xb97   : > { %v1887_v29 = vpop.f32.mrf.mxu0 }
 0xb98   : > { %2059 = vrot.lane.b32.xlu1 %v8188_v27, %s9036_s4  ;;  %2226 = vrot.lane.b32.xlu0 %v8188_v27, %s9037_s8 }
 0xb99   : > { %v7246_v30 = vpop.f32.mrf.mxu0 }
 0xb9c   : > { %2224 = vrot.lane.b32.xlu1 %v8188_v27, %s9038_s28  ;;  %2391 = vrot.lane.b32.xlu0 %v8188_v27, %s9039_s27 }
 0xba0   : > { %2389 = vrot.lane.b32.xlu1 %v8188_v27, %s9040_s2 }
 0xc06   : > { %v2062_v31 = vpop.permute.xlu1 %2061  ;;  %v1897_v32 = vpop.permute.xlu0 %1896 }
 0xc07   : > { %7248 = vmatpush3.xpose.msk.msra.mxu0 %vm926_vm2, %v1897_v32  ;;  %7258 = vmatpush3.xpose.msk.msra.mxu1 %vm926_vm2, %v2062_v31 }
 0xc08   : > { %7267 = vmatprep.subr.mxu1 %v7813_v5  ;;  %7252 = vmatprep.subr.mxu0 %v7813_v5 }
 0xc0a   : > { %v2060_v33 = vpop.permute.xlu1 %2059  ;;  %7250 = vmatmul.mubr.msk.f32.vlgmr.msra.gmra.mxu0 %vm926_vm2, %v8188_v27  ;;  %v2227_v34 = vpop.permute.xlu0 %2226 }
 0xc0b   : > { %7260 = vmatmul.mubr.msk.f32.vlgmr.msra.gmra.mxu1 %vm926_vm2, %v2060_v33  ;;  %7254 = vmatprep.mubr.msk.f32.mxu0 %vm7814_vm1, %v7813_v5 }
 0xc0c   : > { %7268 = vmatpush3.xpose.msk.msra.mxu1 %vm926_vm2, %v2227_v34  ;;  %7269 = vmatprep.mubr.msk.f32.mxu1 %vm7814_vm1, %v7813_v5 }
 0xc0d   : > { %7277 = vmatprep.subr.mxu1 %v7813_v5 }
 0xc0e   : > { %v2225_v35 = vpop.permute.xlu1 %2224  ;;  %v2392_v36 = vpop.permute.xlu0 %2391 }
 0xc0f   : > { %7270 = vmatmul.mubr.msk.f32.vlgmr.msra.gmra.mxu1 %vm926_vm2, %v2225_v35  ;;  %v7633_v35 = vld [vmem:[%s9030_s29 + $0x10] sm:$0xff]   ;;  %s9049_s29 = sld [smem:[#allocation6_spill]] }
 0xc10   : > { %7278 = vmatpush3.xpose.msk.msra.mxu1 %vm926_vm2, %v2392_v36  ;;  %7279 = vmatprep.mubr.msk.f32.mxu1 %vm7814_vm1, %v7813_v5 }
 0xc11   : > { %7287 = vmatprep.subr.bf16.mxu1 %v7813_v5 }
 0xc12   : > { %v2390_v37 = vpop.permute.xlu1 %2389 }
 0xc13   : > { %7280 = vmatmul.mubr.msk.f32.vlgmr.msra.gmra.mxu1 %vm926_vm2, %v2390_v37 }
 0xc14   : > { %7291 = vmatprep.mubr.msk.bf16.mxu1 %vm7814_vm1, %v7813_v5  ;;  %7288 = vmatpush3.bf16.msra.mxu1 %v7632_v28 }
 0xc15   : > { %7289 = vmatprep.subr.bf16.mxu1 %v7813_v5  ;;  %s811_s18 = scalar_lea.vmem %s9049_s29, %s9048_s20  ;;  %s9053_s29 = sld [smem:[#allocation4_spill]] }
 0xc18   : > { %7290 = vmatpush3.bf16.msra.mxu1 %v7633_v35 }
 0xc19   : > { %7303 = vmatprep.subr.bf16.mxu1 %v7813_v5 }
 0xcca   : > { %v1968_v38 = vpop.f32.mrf.mxu0 }
 0xccb   : > { %v1969_v39 = vadd.f32 %v1968_v38, %v8036_v21  ;;  %v2133_v40 = vpop.f32.mrf.mxu1 }
 0xccc   : > { %v2134_v41 = vadd.f32 %v2133_v40, %v8074_v43  ;;  %v7251_v44 = vpop.f32.mrf.mxu0 }
 0xccd   : > { %v7261_v45 = vpop.f32.mrf.mxu1  ;;  %v1972_v46 = vsel %vm926_vm2, %v1969_v39, -inf }
 0xcce   : > { %1973 = vmax.xlane.f32.xlu0 %v1972_v46  ;;  %v2137_v47 = vsel %vm926_vm2, %v2134_v41, -inf }
 0xccf   : > { %2138 = vmax.xlane.f32.xlu1 %v2137_v47  ;;  %v2298_v49 = vpop.f32.mrf.mxu1  ;;  %v8283_v47 = vld [vmem:[%s811_s18] sm:$0xff]  ;;  %s9052_s18 = sld [smem:[#allocation17_spill]] }
 0xcd0   : > { %v2299_v50 = vadd.f32 %v2298_v49, %v8081_v48  ;;  %v2801_v49 = vmul.f32 %v8283_v47, %v8283_v47 }
 0xcd1   : > { %v7271_v42 = vpop.f32.mrf.mxu1 }
 0xcd2   : > { %v2302_v51 = vsel %vm926_vm2, %v2299_v50, -inf }
 0xcd3   : > { %v2463_v52 = vpop.f32.mrf.mxu1  ;;  %2303 = vmax.xlane.f32.xlu0 %v2302_v51 }
 0xcd4   : > { %v2464_v21 = vadd.f32 %v2463_v52, %v8089_v54 }
 0xcd5   : > { %v7281_v0 = vpop.f32.mrf.mxu1 }
 0xcd6   : > { %v2467_v43 = vsel %vm926_vm2, %v2464_v21, -inf }
 0xcd7   : > { %2468 = vmax.xlane.f32.xlu0 %v2467_v43 }
 0xd57   : > { %v1974_v53 = vpop.xlane.xlu0 %1973 }
 0xd58   : > { %v1975_v55 = vsub.f32 %v1969_v39, %v1974_v53  ;;  %v2139_v56 = vpop.xlane.xlu1 %2138 }
 0xd59   : > { %v2140_v57 = vsub.f32 %v2134_v41, %v2139_v56  ;;  %v7635_v56 = vld [vmem:[%s9031_s0 + $0x10] sm:$0xff]  }
 0xd5a   : > { %v1976_v58 = vmul.f32 1.442695, %v1975_v55  ;;  %v7634_v55 = vld [vmem:[%s9031_s0 + $0x18] sm:$0xff]  }
 0xd5b   : > { %v2141_v59 = vmul.f32 1.442695, %v2140_v57  ;;  %v7639_v57 = vld [vmem:[%s9032_s9 + $0x30] sm:$0xff]  }
 0xd5c   : > { %7706 = vpow2.f32 %v1976_v58  ;;  %v2304_v60 = vpop.xlane.xlu0 %2303  ;;  %v7640_v58 = vld [vmem:[%s9032_s9 + $0x28] sm:$0xff]  }
 0xd5d   : > { %7708 = vpow2.f32 %v2141_v59  ;;  %v2305_v48 = vsub.f32 %v2299_v50, %v2304_v60  ;;  %v2802_v50 = vsel %vm843_vm0, %v2801_v49, 0.0 }
 0xd5f   : > { %v2306_v61 = vmul.f32 1.442695, %v2305_v48 }
 0xd60   : > { %v2469_v4 = vpop.xlane.xlu0 %2468 }
 0xd61   : > { %7710 = vpow2.f32 %v2306_v61  ;;  %v2470_v6 = vsub.f32 %v2464_v21, %v2469_v4 }
 0xd63   : > { %v2471_v7 = vmul.f32 1.442695, %v2470_v6 }
 0xd65   : > { %7712 = vpow2.f32 %v2471_v7  ;;  %v7636_v7 = vld [vmem:[%s8932_s13 + $0x8] sm:$0xff]  }
 0xd69   : > { %v7707_v62 = vpop.eup %7706 }
 0xd6a   : > { %v7709_v63 = vpop.eup %7708  ;;  %v1978_v54 = vsel %vm926_vm2, %v7707_v62, 0.0 }
 0xd6b   : > { %1979 = vadd.xlane.f32.xlu0 %v1978_v54  ;;  %v2143_v1 = vsel %vm926_vm2, %v7709_v63, 0.0 }
 0xd6c   : > { %2144 = vadd.xlane.f32.xlu1 %v2143_v1 }
 0xd6e   : > { %v7711_v2 = vpop.eup %7710 }
 0xd6f   : > { %v2308_v3 = vsel %vm926_vm2, %v7711_v2, 0.0 }
 0xd70   : > { %2309 = vadd.xlane.f32.xlu0 %v2308_v3 }
 0xd72   : > { %v7713_v8 = vpop.eup %7712 }
 0xd73   : > { %v2473_v9 = vsel %vm926_vm2, %v7713_v8, 0.0 }
 0xd7d   : > { %2148 = vrot.lane.b32.xlu1 %v8188_v27, %s9041_s1 }
 0xd81   : > { %2313 = vrot.lane.b32.xlu1 %v8188_v27, %s9042_s30 }
 0xd86   : > { %1983 = vrot.lane.b32.xlu0 %v8188_v27, %s9043_s26 }
 0xda5   : > { %2474 = vadd.xlane.f32.xlu1 %v2473_v9 }
 0xdb6   : > { %2478 = vrot.lane.b32.xlu1 %v8188_v27, %s9044_s24 }
 0xdf4   : > { %v1980_v11 = vpop.xlane.xlu0 %1979 }
 0xdf5   : > { %7714 = vrcp.f32 %v1980_v11  ;;  %v2145_v12 = vpop.xlane.xlu1 %2144 }
 0xdf6   : > { %7716 = vrcp.f32 %v2145_v12  ;;  %v7637_v12 = vld [vmem:[%s8932_s13] sm:$0xff]  }
 0xdf9   : > { %v2310_v13 = vpop.xlane.xlu0 %2309  ;;  %v2149_v17 = vpop.permute.xlu1 %2148 }
 0xdfa   : > { %7718 = vrcp.f32 %v2310_v13 }
 0xdfd   : > { %v1984_v15 = vpop.permute.xlu0 %1983  ;;  %v2314_v23 = vpop.permute.xlu1 %2313 }
 0xdfe   : > { %7253 = vmatpush3.msra.mxu0 %v1984_v15  ;;  %v7641_v15 = vld [vmem:[%s9032_s9 + $0x20] sm:$0xff]  }
 0xdff   : > { %7262 = vmatprep.subr.mxu0 %v7813_v5 }
 0xe02   : > { %v7715_v16 = vpop.eup %7714 }
 0xe03   : > { %v1982_v18 = vmul.f32 %v7715_v16, %v7707_v62  ;;  %v7717_v19 = vpop.eup %7716 }
 0xe04   : > { %v2147_v20 = vmul.f32 %v7717_v19, %v7709_v63 }
 0xe05   : > { %7255 = vmatmul.mubr.msk.f32.vlgmr.msra.gmra.mxu0 %vm926_vm2, %v1982_v18 }
 0xe06   : > { %7263 = vmatpush3.msra.mxu0 %v2149_v17  ;;  %7264 = vmatprep.mubr.msk.f32.mxu0 %vm7814_vm1, %v7813_v5 }
 0xe07   : > { %7272 = vmatprep.subr.mxu0 %v7813_v5  ;;  %v7719_v22 = vpop.eup %7718 }
 0xe08   : > { %v2312_v24 = vmul.f32 %v7719_v22, %v7711_v2  ;;  %v6822_v2 = vld [vmem:[%s9033_s7 + $0x1] ss:$0 sm:$0xff]  ;;  %s9057_s7 = sld [smem:[#allocation19_spill]] }
 0xe09   : > { %7265 = vmatmul.mubr.msk.f32.vlgmr.msra.gmra.mxu0 %vm926_vm2, %v2147_v20 }
 0xe0a   : > { %7273 = vmatpush3.msra.mxu0 %v2314_v23  ;;  %7274 = vmatprep.mubr.msk.f32.mxu0 %vm7814_vm1, %v7813_v5 }
 0xe0b   : > { %7282 = vmatprep.subr.mxu0 %v7813_v5 }
 0xe0d   : > { %7275 = vmatmul.mubr.msk.f32.vlgmr.msra.gmra.mxu0 %vm926_vm2, %v2312_v24 }
 0xe0e   : > { %7284 = vmatprep.mubr.msk.f32.mxu0 %vm7814_vm1, %v7813_v5 }
 0xe2e   : > { %v2475_v14 = vpop.xlane.xlu1 %2474 }
 0xe2f   : > { %7720 = vrcp.f32 %v2475_v14 }
 0xe32   : > { %v2479_v25 = vpop.permute.xlu1 %2478 }
 0xe33   : > { %7283 = vmatpush3.msra.mxu0 %v2479_v25 }
 0xe34   : > { %7295 = vmatprep.subr.bf16.mxu0 %v7813_v5 }
 0xe3c   : > { %v7721_v26 = vpop.eup %7720 }
 0xe3d   : > { %v2477_v27 = vmul.f32 %v7721_v26, %v7713_v8  ;;  %v6844_v8 = vld [vmem:[%s8931_s12] ss:$0 sm:$0xff] }
 0xe3f   : > { %7285 = vmatmul.mubr.msk.f32.vlgmr.msra.gmra.mxu0 %vm926_vm2, %v2477_v27 }
 0xe40   : > { %7299 = vmatprep.mubr.msk.bf16.mxu0 %vm7814_vm1, %v7813_v5  ;;  %7296 = vmatpush3.bf16.msra.mxu0 %v7634_v55 }
 0xe41   : > { %7297 = vmatprep.subr.bf16.mxu0 %v7813_v5 }
 0xe44   : > { %7298 = vmatpush3.bf16.msra.mxu0 %v7635_v56 }
 0xe45   : > { %7315 = vmatprep.subr.bf16.mxu0 %v7813_v5 }
 0xec5   : > { %v2055_v29 = vpop.f32.mrf.mxu0 }
 0xec7   : > { %v7256_v30 = vpop.f32.mrf.mxu0 }
 0xec9   : > { %v2220_v31 = vpop.f32.mrf.mxu0 }
 0xeca   : > { %2555 = vrot.lane.b32.xlu0 %v2220_v31, %s9045_s23 }
 0xecb   : > { %v7266_v32 = vpop.f32.mrf.mxu0 }
 0xecd   : > { %v2385_v33 = vpop.f32.mrf.mxu0 }
 0xece   : > { %2559 = vrot.lane.b32.xlu1 %v2385_v33, %s9046_s19 }
 0xecf   : > { %v7276_v34 = vpop.f32.mrf.mxu0 }
 0xeff   : > { %v2550_v36 = vpop.f32.mrf.mxu0 }
 0xf00   : > { %2563 = vrot.lane.b32.xlu0 %v2550_v36, %s9047_s22 }
 0xf01   : > { %v7286_v37 = vpop.f32.mrf.mxu0 }
 0xf02   : > { %v8385_v37 = vld [vmem:[%s9050_s21] sm:$0xff] }
 0xf1f   : > { %2803 = vadd.xlane.f32.xlu0 %v2802_v50  ;;  %v8398_v50 = vld [vmem:[%s9050_s21 + $0x10] sm:$0xff] }
 0xf3c   : > { %v2556_v38 = vpop.permute.xlu0 %2555 }
 0xf3d   : > { %v2566_v40 = vsel %vm926_vm2, %v2055_v29, %v2556_v38  ;;  %v8390_v38 = vld [vmem:[%s9050_s21 + $0x8] sm:$0xff] }
 0xf40   : > { %v2560_v39 = vpop.permute.xlu1 %2559 }
 0xf41   : > { %v2567_v41 = vsel %vm1596_vm3, %v2566_v40, %v2560_v39 }
 0xf72   : > { %v2564_v44 = vpop.permute.xlu0 %2563 }
 0xf73   : > { %v2568_v45 = vsel %vm1598_vm4, %v2567_v41, %v2564_v44 }
 0xf74   : > { %v2569_v46 = vpack.c.bf16 %v2568_v45, %v2568_v45 }
 0xf76   : > { %7292 = vmatmul.mubr.msk.bf16.vlgmr.msra.gmra.mxu1 %vm843_vm0, %v2569_v46 }
 0xf77   : > { %7311 = vmatprep.mubr.msk.bf16.mxu1 %vm7814_vm1, %v7813_v5 }
 0xfa8   : > { %v2804_v59 = vpop.xlane.xlu0 %2803 }
 0xfa9   : > { %v2805_v60 = vmul.f32 0.03125, %v2804_v59 }
 0xfab   : > { %v2806_v61 = vadd.f32 1e-06, %v2805_v60 }
 0xfad   : > { %7722 = vrsqrt.f32 %v2806_v61 }
 0xfba   : > { %v7723_v54 = vpop.eup %7722 }
 0xfbb   : > { %v2808_v6 = vmul.f32 %v7723_v54, %v8283_v47 }
 0xfbd   : > { %v2815_v11 = vmul.f32 %v6844_v8, %v2808_v6 }
 0xfbf   : > { %v2820_v13 = vpack.c.bf16 %v2815_v11, %v2815_v11 }
0x1036   : > { %v2619_v42 = vpop.f32.mrf.mxu1 }
0x1037   : > { %v8289_v51 = vadd.f32 %v2619_v42, %v8168_v10  ;;  %v7638_v10 = vld [vmem:[%s9032_s9 + $0x38] sm:$0xff]   ;;  %s9056_s9 = sld [smem:[#allocation21_spill]] }
0x1038   : > { %v7293_v52 = vpop.f32.mrf.mxu1  ;;  %7304 = vmatpush3.bf16.msra.mxu1 %v7638_v10 }
0x1039   : > { %v2628_v21 = vmul.f32 %v8289_v51, %v8289_v51  ;;  %7305 = vmatprep.subr.bf16.mxu1 %v7813_v5 }
0x103a   : > { %v2622_v0 = vpop.f32.mrf.mxu1 }
0x103b   : > { %v2629_v43 = vsel %vm843_vm0, %v2628_v21, 0.0 }
0x103c   : > { %2630 = vadd.xlane.f32.xlu1 %v2629_v43  ;;  %v7294_v53 = vpop.f32.mrf.mxu1  ;;  %7306 = vmatpush3.bf16.msra.mxu1 %v7639_v57  ;;  %v8405_v43 = vld [vmem:[%s9050_s21 + $0x18] sm:$0xff]  ;;  %s9060_s21 = sld [smem:[#allocation3_spill]] }
0x103d   : > { %7307 = vmatprep.subr.bf16.mxu1 %v7813_v5 }
0x1040   : > { %7308 = vmatpush3.bf16.msra.mxu1 %v7640_v58 }
0x1041   : > { %7309 = vmatprep.subr.bf16.mxu1 %v7813_v5 }
0x1044   : > { %7310 = vmatpush3.bf16.msra.mxu1 %v7641_v15 }
0x1045   : > { %7333 = vmatprep.subr.mxu1 %v7813_v5 }
0x10c5   : > { %v2631_v48 = vpop.xlane.xlu1 %2630 }
0x10c6   : > { %v2632_v62 = vmul.f32 0.03125, %v2631_v48 }
0x10c8   : > { %v2633_v63 = vadd.f32 1e-06, %v2632_v62 }
0x10ca   : > { %7724 = vrsqrt.f32 %v2633_v63 }
0x10d7   : > { %v7725_v1 = vpop.eup %7724 }
0x10d8   : > { %v2635_v3 = vmul.f32 %v7725_v1, %v8289_v51 }
0x10da   : > { %v2642_v4 = vmul.f32 %v6822_v2, %v2635_v3 }
0x10dc   : > { %v2648_v9 = vpack.c.bf16 %v2642_v4, %v2642_v4 }
0x10de   : > { %7300 = vmatmul.mubr.msk.bf16.vlgmr.msra.gmra.mxu0 %vm843_vm0, %v2648_v9 }
0x10df   : > { %7316 = vmatpush3.bf16.msra.mxu0 %v7636_v7  ;;  %7319 = vmatprep.mubr.msk.bf16.mxu0 %vm7814_vm1, %v7813_v5 }
0x10e0   : > { %7317 = vmatprep.subr.bf16.mxu0 %v7813_v5 }
0x10e3   : > { %7318 = vmatpush3.bf16.msra.mxu0 %v7637_v12 }
0x10e4   : > { %7323 = vmatprep.subr.mxu0 %v7813_v5 }
0x10e6   : > { %7320 = vmatmul.mubr.msk.bf16.vlgmr.msra.gmra.mxu0 %vm843_vm0, %v2820_v13 }
0x10e7   : > { %7325 = vmatprep.mubr.msk.f32.mxu0 %vm7814_vm1, %v7813_v5 }
0x119e   : > { %v2698_v16 = vpop.f32.mrf.mxu0 }
0x119f   : > { %v2704_v17 = vmax.f32 %v2698_v16, 0.0 }
0x11a0   : > { %v7301_v18 = vpop.f32.mrf.mxu0 }
0x11a1   : > { %v2714_v19 = vpack.c.bf16 %v2704_v17, %v2704_v17 }
0x11a2   : > { %v2701_v20 = vpop.f32.mrf.mxu0 }
0x11a3   : > { %7312 = vmatmul.mubr.msk.bf16.vlgmr.msra.gmra.mxu1 %vm1767_vm5, %v2714_v19 }
0x11a4   : > { %v7302_v22 = vpop.f32.mrf.mxu0  ;;  %7335 = vmatprep.mubr.msk.f32.mxu1 %vm7814_vm1, %v7813_v5 }
0x11a6   : > { %v8343_v23 = vpop.f32.mrf.mxu0 }
0x11a7   : > { %3046 = vrot.lane.b32.xlu1 %v8343_v23, %s9034_s6  ;;  %2881 = vrot.lane.b32.xlu0 %v8343_v23, %s9035_s10 }
0x11a8   : > { %v7321_v24 = vpop.f32.mrf.mxu0 }
0x11aa   : > { %v2873_v14 = vpop.f32.mrf.mxu0 }
0x11ab   : > { %3044 = vrot.lane.b32.xlu1 %v8343_v23, %s9036_s4  ;;  %3211 = vrot.lane.b32.xlu0 %v8343_v23, %s9037_s8 }
0x11ac   : > { %v7322_v25 = vpop.f32.mrf.mxu0 }
0x11af   : > { %3209 = vrot.lane.b32.xlu1 %v8343_v23, %s9038_s28  ;;  %3376 = vrot.lane.b32.xlu0 %v8343_v23, %s9039_s27 }
0x11b3   : > { %3374 = vrot.lane.b32.xlu1 %v8343_v23, %s9040_s2 }
0x1219   : > { %v3047_v26 = vpop.permute.xlu1 %3046  ;;  %v2882_v27 = vpop.permute.xlu0 %2881 }
0x121a   : > { %7324 = vmatpush3.xpose.msk.msra.mxu0 %vm926_vm2, %v2882_v27  ;;  %7334 = vmatpush3.xpose.msk.msra.mxu1 %vm926_vm2, %v3047_v26 }
0x121b   : > { %7343 = vmatprep.subr.mxu1 %v7813_v5  ;;  %7328 = vmatprep.subr.mxu0 %v7813_v5 }
0x121d   : > { %v3045_v28 = vpop.permute.xlu1 %3044  ;;  %7326 = vmatmul.mubr.msk.f32.vlgmr.msra.gmra.mxu0 %vm926_vm2, %v8343_v23  ;;  %v3212_v29 = vpop.permute.xlu0 %3211 }
0x121e   : > { %7336 = vmatmul.mubr.msk.f32.vlgmr.msra.gmra.mxu1 %vm926_vm2, %v3045_v28  ;;  %7330 = vmatprep.mubr.msk.f32.mxu0 %vm7814_vm1, %v7813_v5 }
0x121f   : > { %7344 = vmatpush3.xpose.msk.msra.mxu1 %vm926_vm2, %v3212_v29  ;;  %7345 = vmatprep.mubr.msk.f32.mxu1 %vm7814_vm1, %v7813_v5 }
0x1220   : > { %7353 = vmatprep.subr.mxu1 %v7813_v5 }
0x1221   : > { %v3210_v30 = vpop.permute.xlu1 %3209  ;;  %v3377_v31 = vpop.permute.xlu0 %3376 }
0x1222   : > { %7346 = vmatmul.mubr.msk.f32.vlgmr.msra.gmra.mxu1 %vm926_vm2, %v3210_v30 }
0x1223   : > { %7354 = vmatpush3.xpose.msk.msra.mxu1 %vm926_vm2, %v3377_v31  ;;  %7355 = vmatprep.mubr.msk.f32.mxu1 %vm7814_vm1, %v7813_v5 }
0x1224   : > { %7363 = vmatprep.subr.bf16.mxu1 %v7813_v5 }
0x1225   : > { %v3375_v32 = vpop.permute.xlu1 %3374 }
0x1226   : > { %7356 = vmatmul.mubr.msk.f32.vlgmr.msra.gmra.mxu1 %vm926_vm2, %v3375_v32  ;;  %v7642_v32 = vld [vmem:[%s8933_s14 + $0x8] sm:$0xff]  }
0x1227   : > { %7367 = vmatprep.mubr.msk.bf16.mxu1 %vm7814_vm1, %v7813_v5  ;;  %7364 = vmatpush3.bf16.msra.mxu1 %v7642_v32 }
0x1228   : > { %7365 = vmatprep.subr.bf16.mxu1 %v7813_v5 }
0x1263   : > { %v8380_v33 = vpop.f32.mrf.mxu1 }
0x1265   : > { %v7313_v34 = vpop.f32.mrf.mxu1 }
0x1267   : > { %v2779_v35 = vpop.f32.mrf.mxu1 }
0x1269   : > { %v7314_v36 = vpop.f32.mrf.mxu1 }
0x12dd   : > { %v2953_v39 = vpop.f32.mrf.mxu0 }
0x12de   : > { %v2954_v40 = vadd.f32 %v2953_v39, %v8385_v37  ;;  %v3118_v41 = vpop.f32.mrf.mxu1 }
0x12df   : > { %v3119_v44 = vadd.f32 %v3118_v41, %v8390_v38  ;;  %v7327_v45 = vpop.f32.mrf.mxu0 }
0x12e0   : > { %v7337_v46 = vpop.f32.mrf.mxu1  ;;  %v2957_v49 = vsel %vm926_vm2, %v2954_v40, -inf }
0x12e1   : > { %2958 = vmax.xlane.f32.xlu0 %v2957_v49  ;;  %v3122_v42 = vsel %vm926_vm2, %v3119_v44, -inf  ;;  %v7643_v49 = vld [vmem:[%s8933_s14] sm:$0xff]  }
0x12e2   : > { %3123 = vmax.xlane.f32.xlu1 %v3122_v42  ;;  %v3283_v52 = vpop.f32.mrf.mxu1  ;;  %7366 = vmatpush3.bf16.msra.mxu1 %v7643_v49 }
0x12e3   : > { %v3284_v21 = vadd.f32 %v3283_v52, %v8398_v50  ;;  %7379 = vmatprep.subr.bf16.mxu1 %v7813_v5 }
0x12e4   : > { %v7347_v0 = vpop.f32.mrf.mxu1 }
0x12e5   : > { %v3287_v53 = vsel %vm926_vm2, %v3284_v21, -inf }
0x12e6   : > { %v3448_v55 = vpop.f32.mrf.mxu1  ;;  %3288 = vmax.xlane.f32.xlu0 %v3287_v53 }
0x12e7   : > { %v3449_v56 = vadd.f32 %v3448_v55, %v8405_v43 }
0x12e8   : > { %v7357_v10 = vpop.f32.mrf.mxu1 }
0x12e9   : > { %v3452_v57 = vsel %vm926_vm2, %v3449_v56, -inf }
0x12ea   : > { %3453 = vmax.xlane.f32.xlu0 %v3452_v57  ;;  %v7645_v57 = vld [vmem:[%s8936_s17] sm:$0xff]  }
0x136a   : > { %v2959_v58 = vpop.xlane.xlu0 %2958 }
0x136b   : > { %v2960_v59 = vsub.f32 %v2954_v40, %v2959_v58  ;;  %v3124_v60 = vpop.xlane.xlu1 %3123 }
0x136c   : > { %v3125_v48 = vsub.f32 %v3119_v44, %v3124_v60  ;;  %v2782_v44 = vadd.f32 %v8380_v33, %v8289_v51 }
0x136d   : > { %v2961_v61 = vmul.f32 1.442695, %v2960_v59 }
0x136e   : > { %v3126_v62 = vmul.f32 1.442695, %v3125_v48  ;;  %v2784_v45 = vmul.f32 %v2782_v44, %v2782_v44 }
0x136f   : > { %7726 = vpow2.f32 %v2961_v61  ;;  %v3289_v63 = vpop.xlane.xlu0 %3288  ;;  %v6843_v61 = vld [vmem:[%s9051_s11] ss:$0 sm:$0xff] }
0x1370   : > { %7728 = vpow2.f32 %v3126_v62  ;;  %v3290_v54 = vsub.f32 %v3284_v21, %v3289_v63  ;;  %v2785_v46 = vsel %vm843_vm0, %v2784_v45, 0.0 }
0x1372   : > { %v3291_v1 = vmul.f32 1.442695, %v3290_v54 }
0x1373   : > { %v3454_v9 = vpop.xlane.xlu0 %3453 }
0x1374   : > { %7730 = vpow2.f32 %v3291_v1  ;;  %v3455_v11 = vsub.f32 %v3449_v56, %v3454_v9  ;;  %v7644_v56 = vld [vmem:[%s8936_s17 + $0x8] sm:$0xff]  }
0x1375   : > { %v7646_v9 = vld [vmem:[%s8935_s16 + $0x8] sm:$0xff]  }
0x1376   : > { %v3456_v12 = vmul.f32 1.442695, %v3455_v11  ;;  %v7647_v11 = vld [vmem:[%s8935_s16] sm:$0xff]  }
0x1378   : > { %7732 = vpow2.f32 %v3456_v12 }
0x137c   : > { %v7727_v2 = vpop.eup %7726 }
0x137d   : > { %v7729_v3 = vpop.eup %7728  ;;  %v2963_v4 = vsel %vm926_vm2, %v7727_v2, 0.0 }
0x137e   : > { %2964 = vadd.xlane.f32.xlu0 %v2963_v4  ;;  %v3128_v6 = vsel %vm926_vm2, %v7729_v3, 0.0 }
0x137f   : > { %3129 = vadd.xlane.f32.xlu1 %v3128_v6 }
0x1381   : > { %v7731_v7 = vpop.eup %7730 }
0x1382   : > { %v3293_v8 = vsel %vm926_vm2, %v7731_v7, 0.0 }
0x1383   : > { %3294 = vadd.xlane.f32.xlu0 %v3293_v8 }
0x1385   : > { %v7733_v13 = vpop.eup %7732 }
0x1386   : > { %v3458_v15 = vsel %vm926_vm2, %v7733_v13, 0.0 }
0x1390   : > { %3133 = vrot.lane.b32.xlu1 %v8343_v23, %s9041_s1 }
0x1394   : > { %3298 = vrot.lane.b32.xlu1 %v8343_v23, %s9042_s30 }
0x1399   : > { %2968 = vrot.lane.b32.xlu0 %v8343_v23, %s9043_s26 }
0x13b8   : > { %3459 = vadd.xlane.f32.xlu1 %v3458_v15 }
0x13c9   : > { %3463 = vrot.lane.b32.xlu1 %v8343_v23, %s9044_s24 }
0x1407   : > { %v2965_v16 = vpop.xlane.xlu0 %2964 }
0x1408   : > { %7734 = vrcp.f32 %v2965_v16  ;;  %v3130_v17 = vpop.xlane.xlu1 %3129 }
0x1409   : > { %7736 = vrcp.f32 %v3130_v17 }
0x140c   : > { %v3295_v18 = vpop.xlane.xlu0 %3294  ;;  %v3134_v22 = vpop.permute.xlu1 %3133 }
0x140d   : > { %7738 = vrcp.f32 %v3295_v18 }
0x1410   : > { %v2969_v19 = vpop.permute.xlu0 %2968  ;;  %v3299_v26 = vpop.permute.xlu1 %3298 }
0x1411   : > { %7329 = vmatpush3.msra.mxu0 %v2969_v19 }
0x1412   : > { %7338 = vmatprep.subr.mxu0 %v7813_v5 }
0x1415   : > { %v7735_v20 = vpop.eup %7734 }
0x1416   : > { %v2967_v24 = vmul.f32 %v7735_v20, %v7727_v2  ;;  %v7737_v14 = vpop.eup %7736 }
0x1417   : > { %v3132_v23 = vmul.f32 %v7737_v14, %v7729_v3 }
0x1418   : > { %7331 = vmatmul.mubr.msk.f32.vlgmr.msra.gmra.mxu0 %vm926_vm2, %v2967_v24 }
0x1419   : > { %7339 = vmatpush3.msra.mxu0 %v3134_v22  ;;  %7340 = vmatprep.mubr.msk.f32.mxu0 %vm7814_vm1, %v7813_v5  ;;  %v6863_v22 = vld [vmem:[%s9052_s18] ss:$0 sm:$0xff] }
0x141a   : > { %7348 = vmatprep.subr.mxu0 %v7813_v5  ;;  %v7739_v25 = vpop.eup %7738 }
0x141b   : > { %v3297_v27 = vmul.f32 %v7739_v25, %v7731_v7 }
0x141c   : > { %7341 = vmatmul.mubr.msk.f32.vlgmr.msra.gmra.mxu0 %vm926_vm2, %v3132_v23 }
0x141d   : > { %7349 = vmatpush3.msra.mxu0 %v3299_v26  ;;  %7350 = vmatprep.mubr.msk.f32.mxu0 %vm7814_vm1, %v7813_v5 }
0x141e   : > { %7358 = vmatprep.subr.mxu0 %v7813_v5 }
0x1420   : > { %7351 = vmatmul.mubr.msk.f32.vlgmr.msra.gmra.mxu0 %vm926_vm2, %v3297_v27 }
0x1421   : > { %7360 = vmatprep.mubr.msk.f32.mxu0 %vm7814_vm1, %v7813_v5 }
0x1441   : > { %v3460_v28 = vpop.xlane.xlu1 %3459 }
0x1442   : > { %7740 = vrcp.f32 %v3460_v28 }
0x1445   : > { %v3464_v29 = vpop.permute.xlu1 %3463 }
0x1446   : > { %7359 = vmatpush3.msra.mxu0 %v3464_v29 }
0x1447   : > { %7371 = vmatprep.subr.bf16.mxu0 %v7813_v5 }
0x144f   : > { %v7741_v30 = vpop.eup %7740 }
0x1450   : > { %v3462_v31 = vmul.f32 %v7741_v30, %v7733_v13 }
0x1452   : > { %7361 = vmatmul.mubr.msk.f32.vlgmr.msra.gmra.mxu0 %vm926_vm2, %v3462_v31 }
0x1453   : > { %7375 = vmatprep.mubr.msk.bf16.mxu0 %vm7814_vm1, %v7813_v5  ;;  %7372 = vmatpush3.bf16.msra.mxu0 %v7646_v9 }
0x1454   : > { %7373 = vmatprep.subr.bf16.mxu0 %v7813_v5 }
0x1457   : > { %7374 = vmatpush3.bf16.msra.mxu0 %v7647_v11 }
0x1458   : > { %7387 = vmatprep.subr.mxu0 %v7813_v5 }
0x14d8   : > { %v3040_v34 = vpop.f32.mrf.mxu0 }
0x14da   : > { %v7332_v35 = vpop.f32.mrf.mxu0 }
0x14dc   : > { %v3205_v36 = vpop.f32.mrf.mxu0 }
0x14dd   : > { %3540 = vrot.lane.b32.xlu0 %v3205_v36, %s9045_s23  ;;  %v8529_v36 = vld [vmem:[%s9053_s29] ss:$0 sm:$0xff] }
0x14de   : > { %v7342_v39 = vpop.f32.mrf.mxu0 }
0x14e0   : > { %v3370_v40 = vpop.f32.mrf.mxu0 }
0x14e1   : > { %3544 = vrot.lane.b32.xlu1 %v3370_v40, %s9046_s19 }
0x14e2   : > { %v7352_v41 = vpop.f32.mrf.mxu0 }
0x1505   : > { %2786 = vadd.xlane.f32.xlu1 %v2785_v46 }
0x1512   : > { %v3535_v42 = vpop.f32.mrf.mxu0 }
0x1513   : > { %3548 = vrot.lane.b32.xlu0 %v3535_v42, %s9047_s22 }
0x1514   : > { %v7362_v52 = vpop.f32.mrf.mxu0 }
0x154f   : > { %v3541_v21 = vpop.permute.xlu0 %3540 }
0x1550   : > { %v3551_v53 = vsel %vm926_vm2, %v3040_v34, %v3541_v21 }
0x1553   : > { %v3545_v0 = vpop.permute.xlu1 %3544 }
0x1554   : > { %v3552_v51 = vsel %vm1596_vm3, %v3551_v53, %v3545_v0 }
0x1585   : > { %v3549_v33 = vpop.permute.xlu0 %3548 }
0x1586   : > { %v3553_v55 = vsel %vm1598_vm4, %v3552_v51, %v3549_v33 }
0x1587   : > { %v3554_v10 = vpack.c.bf16 %v3553_v55, %v3553_v55 }
0x1589   : > { %7368 = vmatmul.mubr.msk.bf16.vlgmr.msra.gmra.mxu1 %vm843_vm0, %v3554_v10 }
0x158a   : > { %7380 = vmatpush3.bf16.msra.mxu1 %v7644_v56  ;;  %7383 = vmatprep.mubr.msk.bf16.mxu1 %vm7814_vm1, %v7813_v5 }
0x158b   : > { %7381 = vmatprep.subr.bf16.mxu1 %v7813_v5 }
0x158e   : > { %v2787_v58 = vpop.xlane.xlu1 %2786  ;;  %7382 = vmatpush3.bf16.msra.mxu1 %v7645_v57 }
0x158f   : > { %v2788_v59 = vmul.f32 0.03125, %v2787_v58  ;;  %7397 = vmatprep.subr.mxu1 %v7813_v5 }
0x1591   : > { %v2789_v60 = vadd.f32 1e-06, %v2788_v59 }
0x1593   : > { %7742 = vrsqrt.f32 %v2789_v60 }
0x15a0   : > { %v7743_v48 = vpop.eup %7742 }
0x15a1   : > { %v2791_v62 = vmul.f32 %v7743_v48, %v2782_v44 }
0x15a3   : > { %v2798_v63 = vmul.f32 %v6843_v61, %v2791_v62 }
0x15a5   : > { %v8469_v54 = vpack.c.bf16 %v2798_v63, %v2798_v63 }
0x15a7   : > { %7384 = vmatmul.mubr.msk.bf16.vlgmr.msra.gmra.mxu1 %vm843_vm0, %v8469_v54 }
0x15a8   : > { %7399 = vmatprep.mubr.msk.f32.mxu1 %vm7814_vm1, %v7813_v5 }
0x1649   : > { %v3604_v1 = vpop.f32.mrf.mxu1 }
0x164a   : > { %v8476_v2 = vadd.f32 %v3604_v1, %v8283_v47 }
0x164b   : > { %v7369_v3 = vpop.f32.mrf.mxu1 }
0x164c   : > { %v3612_v4 = vmul.f32 %v8476_v2, %v8476_v2 }
0x164d   : > { %v3607_v6 = vpop.f32.mrf.mxu1 }
0x164e   : > { %v3613_v7 = vsel %vm843_vm0, %v3612_v4, 0.0 }
0x164f   : > { %3614 = vadd.xlane.f32.xlu0 %v3613_v7  ;;  %v7370_v8 = vpop.f32.mrf.mxu1 }
0x1667   : > { %v8489_v47 = vpop.f32.mrf.mxu1 }
0x1668   : > { %3916 = vrot.lane.b32.xlu0 %v8489_v47, %s9036_s4 }
0x1669   : > { %v7385_v12 = vpop.f32.mrf.mxu1 }
0x166b   : > { %v3744_v13 = vpop.f32.mrf.mxu1 }
0x166d   : > { %v7386_v15 = vpop.f32.mrf.mxu1 }
0x16d8   : > { %v3615_v16 = vpop.xlane.xlu0 %3614 }
0x16d9   : > { %v3616_v17 = vmul.f32 0.03125, %v3615_v16 }
0x16db   : > { %v3617_v18 = vadd.f32 1e-06, %v3616_v17 }
0x16dc   : > { %v3917_v19 = vpop.permute.xlu0 %3916 }
0x16dd   : > { %7744 = vrsqrt.f32 %v3617_v18  ;;  %7398 = vmatpush3.xpose.msk.msra.mxu1 %vm926_vm2, %v3917_v19 }
0x16de   : > { %7407 = vmatprep.subr.mxu1 %v7813_v5 }
0x16ea   : > { %v7745_v20 = vpop.eup %7744 }
0x16eb   : > { %v3619_v24 = vmul.f32 %v7745_v20, %v8476_v2 }
0x16ed   : > { %v3626_v14 = vmul.f32 %v6863_v22, %v3619_v24 }
0x16ef   : > { %v3631_v23 = vpack.c.bf16 %v3626_v14, %v3626_v14 }
0x16f1   : > { %7376 = vmatmul.mubr.msk.bf16.vlgmr.msra.gmra.mxu0 %vm843_vm0, %v3631_v23 }
0x16f2   : > { %7388 = vmatpush3.xpose.msk.msra.mxu0 %vm926_vm2, %v8489_v47  ;;  %7389 = vmatprep.mubr.msk.f32.mxu0 %vm7814_vm1, %v7813_v5 }
0x16f3   : > { %7392 = vmatprep.subr.mxu0 %v7813_v5 }
0x17b1   : > { %v3681_v25 = vpop.f32.mrf.mxu0 }
0x17b2   : > { %4079 = vrot.lane.b32.xlu0 %v3681_v25, %s9038_s28  ;;  %3914 = vrot.lane.b32.xlu1 %v3681_v25, %s9036_s4 }
0x17b3   : > { %7390 = vmatmul.mubr.msk.f32.vlgmr.msra.gmra.mxu0 %vm926_vm2, %v3681_v25  ;;  %v7377_v26 = vpop.f32.mrf.mxu0 }
0x17b4   : > { %7394 = vmatprep.mubr.msk.f32.mxu0 %vm7814_vm1, %v7813_v5 }
0x17b5   : > { %v3684_v27 = vpop.f32.mrf.mxu0 }
0x17b6   : > { %4244 = vrot.lane.b32.xlu0 %v3681_v25, %s9040_s2  ;;  %4081 = vrot.lane.b32.xlu1 %v8489_v47, %s9038_s28 }
0x17b7   : > { %v7378_v28 = vpop.f32.mrf.mxu0 }
0x17ba   : > { %4246 = vrot.lane.b32.xlu1 %v8489_v47, %s9040_s2 }
0x1824   : > { %v3915_v29 = vpop.permute.xlu1 %3914  ;;  %v4080_v31 = vpop.permute.xlu0 %4079 }
0x1825   : > { %7400 = vmatmul.mubr.msk.f32.vlgmr.msra.gmra.mxu1 %vm926_vm2, %v3915_v29 }
0x1826   : > { %7409 = vmatprep.mubr.msk.f32.mxu1 %vm7814_vm1, %v7813_v5 }
0x1828   : > { %v4082_v30 = vpop.permute.xlu1 %4081  ;;  %v4245_v34 = vpop.permute.xlu0 %4244 }
0x1829   : > { %7408 = vmatpush3.xpose.msk.msra.mxu1 %vm926_vm2, %v4082_v30 }
0x182a   : > { %7417 = vmatprep.subr.mxu1 %v7813_v5 }
0x182c   : > { %7410 = vmatmul.mubr.msk.f32.vlgmr.msra.gmra.mxu1 %vm926_vm2, %v4080_v31  ;;  %v4247_v32 = vpop.permute.xlu1 %4246 }
0x182d   : > { %7418 = vmatpush3.xpose.msk.msra.mxu1 %vm926_vm2, %v4247_v32  ;;  %7419 = vmatprep.mubr.msk.f32.mxu1 %vm7814_vm1, %v7813_v5  ;;  %v7648_v32 = vld [vmem:[%s9054_s5 + $0x8] sm:$0xff]  }
0x182e   : > { %7427 = vmatprep.subr.bf16.mxu1 %v7813_v5 }
0x1830   : > { %7420 = vmatmul.mubr.msk.f32.vlgmr.msra.gmra.mxu1 %vm926_vm2, %v4245_v34  ;;  %v7649_v34 = vld [vmem:[%s9054_s5] sm:$0xff]  }
0x1831   : > { %7431 = vmatprep.mubr.msk.bf16.mxu1 %vm7814_vm1, %v7813_v5  ;;  %7428 = vmatpush3.bf16.msra.mxu1 %v7648_v32 }
0x1832   : > { %7429 = vmatprep.subr.bf16.mxu1 %v7813_v5 }
0x1835   : > { %7430 = vmatpush3.bf16.msra.mxu1 %v7649_v34 }
0x1836   : > { %7443 = vmatprep.subr.bf16.mxu1 %v7813_v5 }
0x1873   : > { %v3823_v35 = vpop.f32.mrf.mxu0 }
0x1874   : > { %v3824_v39 = vadd.f32 %v8529_v36, %v3823_v35 }
0x1875   : > { %v7391_v40 = vpop.f32.mrf.mxu0 }
0x1876   : > { %v3827_v41 = vsel %vm926_vm2, %v3824_v39, -inf }
0x1877   : > { %3828 = vmax.xlane.f32.xlu1 %v3827_v41 }
0x1888   : > { %3838 = vrot.lane.b32.xlu1 %v8489_v47, %s9035_s10 }
0x18e5   : > { %v3988_v44 = vpop.f32.mrf.mxu1 }
0x18e6   : > { %v3989_v45 = vadd.f32 %v8529_v36, %v3988_v44 }
0x18e7   : > { %v7401_v46 = vpop.f32.mrf.mxu1 }
0x18e8   : > { %v3992_v49 = vsel %vm926_vm2, %v3989_v45, -inf }
0x18e9   : > { %3993 = vmax.xlane.f32.xlu0 %v3992_v49 }
0x18ec   : > { %v4153_v42 = vpop.f32.mrf.mxu1 }
0x18ed   : > { %v4154_v52 = vadd.f32 %v8529_v36, %v4153_v42 }
0x18ee   : > { %v7411_v21 = vpop.f32.mrf.mxu1 }
0x18ef   : > { %v4157_v0 = vsel %vm926_vm2, %v4154_v52, -inf }
0x18f0   : > { %4158 = vmax.xlane.f32.xlu0 %v4157_v0  ;;  %v4318_v53 = vpop.f32.mrf.mxu1 }
0x18f1   : > { %v4319_v51 = vadd.f32 %v8529_v36, %v4318_v53 }
0x18f2   : > { %v7421_v33 = vpop.f32.mrf.mxu1 }
0x18f3   : > { %v4322_v55 = vsel %vm926_vm2, %v4319_v51, -inf }
0x18f4   : > { %4323 = vmax.xlane.f32.xlu0 %v4322_v55 }
0x1900   : > { %v3829_v56 = vpop.xlane.xlu1 %3828 }
0x1901   : > { %v3830_v10 = vsub.f32 %v3824_v39, %v3829_v56 }
0x1903   : > { %v3831_v57 = vmul.f32 1.442695, %v3830_v10 }
0x1904   : > { %v3839_v58 = vpop.permute.xlu1 %3838 }
0x1905   : > { %7746 = vpow2.f32 %v3831_v57  ;;  %7393 = vmatpush3.msra.mxu0 %v3839_v58 }
0x1906   : > { %7402 = vmatprep.subr.mxu0 %v7813_v5 }
0x1912   : > { %v7747_v59 = vpop.eup %7746 }
0x1913   : > { %v3833_v60 = vsel %vm926_vm2, %v7747_v59, 0.0 }
0x1914   : > { %3834 = vadd.xlane.f32.xlu1 %v3833_v60  ;;  %v7651_v60 = vld [vmem:[%s9055_s3] sm:$0xff]  }
0x1972   : > { %v3994_v48 = vpop.xlane.xlu0 %3993 }
0x1973   : > { %v3995_v61 = vsub.f32 %v3989_v45, %v3994_v48  ;;  %v7653_v48 = vld [vmem:[%s9056_s9 + $0x10] sm:$0xff]  }
0x1975   : > { %v3996_v62 = vmul.f32 1.442695, %v3995_v61  ;;  %v7654_v61 = vld [vmem:[%s9056_s9 + $0x8] sm:$0xff]  }
0x1977   : > { %7748 = vpow2.f32 %v3996_v62 }
0x1979   : > { %v4159_v63 = vpop.xlane.xlu0 %4158 }
0x197a   : > { %v4160_v1 = vsub.f32 %v4154_v52, %v4159_v63 }
0x197c   : > { %v4161_v3 = vmul.f32 1.442695, %v4160_v1 }
0x197d   : > { %v4324_v4 = vpop.xlane.xlu0 %4323 }
0x197e   : > { %7750 = vpow2.f32 %v4161_v3  ;;  %v4325_v6 = vsub.f32 %v4319_v51, %v4324_v4  ;;  %v6885_v4 = vld [vmem:[%s9057_s7] ss:$0 sm:$0xff] }
0x1980   : > { %v4326_v7 = vmul.f32 1.442695, %v4325_v6 }
0x1982   : > { %7752 = vpow2.f32 %v4326_v7 }
0x1984   : > { %v7749_v8 = vpop.eup %7748 }
0x1985   : > { %v3998_v9 = vsel %vm926_vm2, %v7749_v8, 0.0 }
0x1986   : > { %3999 = vadd.xlane.f32.xlu0 %v3998_v9  ;;  %v7655_v9 = vld [vmem:[%s9056_s9] sm:$0xff]  }
0x198b   : > { %v7751_v11 = vpop.eup %7750 }
0x198c   : > { %v4163_v12 = vsel %vm926_vm2, %v7751_v11, 0.0 }
0x198d   : > { %4164 = vadd.xlane.f32.xlu1 %v4163_v12 }
0x198f   : > { %v7753_v13 = vpop.eup %7752 }
0x1990   : > { %v4328_v15 = vsel %vm926_vm2, %v7753_v13, 0.0 }
0x1991   : > { %4329 = vadd.xlane.f32.xlu0 %v4328_v15 }
0x199d   : > { %v3835_v16 = vpop.xlane.xlu1 %3834 }
0x199e   : > { %7754 = vrcp.f32 %v3835_v16  ;;  %4168 = vrot.lane.b32.xlu1 %v8489_v47, %s9037_s8 }
0x19a2   : > { %4333 = vrot.lane.b32.xlu1 %v8489_v47, %s9039_s27 }
0x19a7   : > { %4003 = vrot.lane.b32.xlu0 %v8489_v47, %s9034_s6 }
0x19ab   : > { %v7755_v17 = vpop.eup %7754 }
0x19ac   : > { %v3837_v18 = vmul.f32 %v7755_v17, %v7747_v59  ;;  %v7650_v59 = vld [vmem:[%s9055_s3 + $0x8] sm:$0xff]  }
0x19ae   : > { %7395 = vmatmul.mubr.msk.f32.vlgmr.msra.gmra.mxu0 %vm926_vm2, %v3837_v18 }
0x19af   : > { %7404 = vmatprep.mubr.msk.f32.mxu0 %vm7814_vm1, %v7813_v5 }
0x1a0f   : > { %v4000_v19 = vpop.xlane.xlu0 %3999 }
0x1a10   : > { %7756 = vrcp.f32 %v4000_v19 }
0x1a16   : > { %v4165_v20 = vpop.xlane.xlu1 %4164 }
0x1a17   : > { %7758 = vrcp.f32 %v4165_v20 }
0x1a1a   : > { %v4330_v22 = vpop.xlane.xlu0 %4329  ;;  %v4169_v25 = vpop.permute.xlu1 %4168 }
0x1a1b   : > { %7760 = vrcp.f32 %v4330_v22 }
0x1a1d   : > { %v7757_v24 = vpop.eup %7756 }
0x1a1e   : > { %v4004_v14 = vpop.permute.xlu0 %4003  ;;  %v4002_v23 = vmul.f32 %v7757_v24, %v7749_v8  ;;  %v4334_v27 = vpop.permute.xlu1 %4333 }
0x1a1f   : > { %7403 = vmatpush3.msra.mxu0 %v4004_v14 }
0x1a20   : > { %7405 = vmatmul.mubr.msk.f32.vlgmr.msra.gmra.mxu0 %vm926_vm2, %v4002_v23  ;;  %7412 = vmatprep.subr.mxu0 %v7813_v5 }
0x1a21   : > { %7413 = vmatpush3.msra.mxu0 %v4169_v25  ;;  %7414 = vmatprep.mubr.msk.f32.mxu0 %vm7814_vm1, %v7813_v5  ;;  %v7656_v25 = vld [vmem:[%s8932_s13 + $0x18] sm:$0xff]  }
0x1a22   : > { %7422 = vmatprep.subr.mxu0 %v7813_v5 }
0x1a24   : > { %v7759_v47 = vpop.eup %7758 }
0x1a25   : > { %v4167_v26 = vmul.f32 %v7759_v47, %v7751_v11  ;;  %v7657_v47 = vld [vmem:[%s8932_s13 + $0x10] sm:$0xff]  }
0x1a27   : > { %7415 = vmatmul.mubr.msk.f32.vlgmr.msra.gmra.mxu0 %vm926_vm2, %v4167_v26 }
0x1a28   : > { %v7761_v28 = vpop.eup %7760  ;;  %7423 = vmatpush3.msra.mxu0 %v4334_v27  ;;  %7424 = vmatprep.mubr.msk.f32.mxu0 %vm7814_vm1, %v7813_v5 }
0x1a29   : > { %v4332_v29 = vmul.f32 %v7761_v28, %v7753_v13  ;;  %7435 = vmatprep.subr.bf16.mxu0 %v7813_v5 }
0x1a2b   : > { %7425 = vmatmul.mubr.msk.f32.vlgmr.msra.gmra.mxu0 %vm926_vm2, %v4332_v29 }
0x1a2c   : > { %7439 = vmatprep.mubr.msk.bf16.mxu0 %vm7814_vm1, %v7813_v5  ;;  %7436 = vmatpush3.bf16.msra.mxu0 %v7650_v59 }
0x1a2d   : > { %7437 = vmatprep.subr.bf16.mxu0 %v7813_v5 }
0x1a30   : > { %7438 = vmatpush3.bf16.msra.mxu0 %v7651_v60 }
0x1a31   : > { %7455 = vmatprep.subr.bf16.mxu0 %v7813_v5 }
0x1a6e   : > { %v3910_v30 = vpop.f32.mrf.mxu0 }
0x1a70   : > { %v7396_v31 = vpop.f32.mrf.mxu0 }
0x1ae0   : > { %v4075_v35 = vpop.f32.mrf.mxu0 }
0x1ae1   : > { %4410 = vrot.lane.b32.xlu1 %v4075_v35, %s9045_s23 }
0x1ae2   : > { %v7406_v39 = vpop.f32.mrf.mxu0 }
0x1ae7   : > { %v4240_v40 = vpop.f32.mrf.mxu0 }
0x1ae8   : > { %4414 = vrot.lane.b32.xlu0 %v4240_v40, %s9046_s19 }
0x1ae9   : > { %v7416_v41 = vpop.f32.mrf.mxu0 }
0x1aeb   : > { %v4405_v44 = vpop.f32.mrf.mxu0 }
0x1aec   : > { %4418 = vrot.lane.b32.xlu1 %v4405_v44, %s9047_s22 }
0x1aed   : > { %v7426_v45 = vpop.f32.mrf.mxu0 }
0x1b53   : > { %v4411_v46 = vpop.permute.xlu1 %4410 }
0x1b54   : > { %v4421_v42 = vsel %vm926_vm2, %v3910_v30, %v4411_v46  ;;  %v6895_v30 = vld [vmem:[%s8931_s12 + $0x1] ss:$0 sm:$0xff] }
0x1b5a   : > { %v4415_v49 = vpop.permute.xlu0 %4414 }
0x1b5b   : > { %v4422_v52 = vsel %vm1596_vm3, %v4421_v42, %v4415_v49 }
0x1b5e   : > { %v4419_v21 = vpop.permute.xlu1 %4418 }
0x1b5f   : > { %v4423_v0 = vsel %vm1598_vm4, %v4422_v52, %v4419_v21 }
0x1b60   : > { %v4424_v53 = vpack.c.bf16 %v4423_v0, %v4423_v0 }
0x1b62   : > { %7432 = vmatmul.mubr.msk.bf16.vlgmr.msra.gmra.mxu1 %vm843_vm0, %v4424_v53 }
0x1b63   : > { %7451 = vmatprep.mubr.msk.bf16.mxu1 %vm7814_vm1, %v7813_v5 }
0x1c22   : > { %v4474_v51 = vpop.f32.mrf.mxu1 }
0x1c23   : > { %v4480_v33 = vadd.f32 %v4474_v51, %v8476_v2  ;;  %v7652_v2 = vld [vmem:[%s9056_s9 + $0x18] sm:$0xff]  }
0x1c24   : > { %v7433_v55 = vpop.f32.mrf.mxu1  ;;  %7444 = vmatpush3.bf16.msra.mxu1 %v7652_v2 }
0x1c25   : > { %v4482_v56 = vmul.f32 %v4480_v33, %v4480_v33  ;;  %7445 = vmatprep.subr.bf16.mxu1 %v7813_v5 }
0x1c26   : > { %v4477_v10 = vpop.f32.mrf.mxu1 }
0x1c27   : > { %v4483_v57 = vsel %vm843_vm0, %v4482_v56, 0.0 }
0x1c28   : > { %4484 = vadd.xlane.f32.xlu0 %v4483_v57  ;;  %v7434_v58 = vpop.f32.mrf.mxu1  ;;  %7446 = vmatpush3.bf16.msra.mxu1 %v7653_v48 }
0x1c29   : > { %7447 = vmatprep.subr.bf16.mxu1 %v7813_v5 }
0x1c2c   : > { %7448 = vmatpush3.bf16.msra.mxu1 %v7654_v61 }
0x1c2d   : > { %7449 = vmatprep.subr.bf16.mxu1 %v7813_v5 }
0x1c30   : > { %7450 = vmatpush3.bf16.msra.mxu1 %v7655_v9 }
0x1c31   : > { %7473 = vmatprep.subr.mxu1 %v7813_v5 }
0x1cb1   : > { %v4485_v62 = vpop.xlane.xlu0 %4484 }
0x1cb2   : > { %v4486_v63 = vmul.f32 0.03125, %v4485_v62 }
0x1cb4   : > { %v4487_v1 = vadd.f32 1e-06, %v4486_v63 }
0x1cb6   : > { %7762 = vrsqrt.f32 %v4487_v1 }
0x1cc3   : > { %v7763_v3 = vpop.eup %7762 }
0x1cc4   : > { %v4489_v6 = vmul.f32 %v7763_v3, %v4480_v33 }
0x1cc6   : > { %v4496_v7 = vmul.f32 %v6885_v4, %v4489_v6 }
0x1cc8   : > { %v4501_v8 = vpack.c.bf16 %v4496_v7, %v4496_v7 }
0x1cca   : > { %7440 = vmatmul.mubr.msk.bf16.vlgmr.msra.gmra.mxu0 %vm843_vm0, %v4501_v8 }
0x1ccb   : > { %7459 = vmatprep.mubr.msk.bf16.mxu0 %vm7814_vm1, %v7813_v5  ;;  %7456 = vmatpush3.bf16.msra.mxu0 %v7656_v25 }
0x1ccc   : > { %7457 = vmatprep.subr.bf16.mxu0 %v7813_v5 }
0x1ccf   : > { %7458 = vmatpush3.bf16.msra.mxu0 %v7657_v47 }
0x1cd0   : > { %7463 = vmatprep.subr.mxu0 %v7813_v5 }
0x1d8a   : > { %v4551_v11 = vpop.f32.mrf.mxu0 }
0x1d8b   : > { %v4557_v12 = vmax.f32 %v4551_v11, 0.0 }
0x1d8c   : > { %v7441_v13 = vpop.f32.mrf.mxu0 }
0x1d8d   : > { %v4566_v15 = vpack.c.bf16 %v4557_v12, %v4557_v12 }
0x1d8e   : > { %v4554_v16 = vpop.f32.mrf.mxu0 }
0x1d8f   : > { %7452 = vmatmul.mubr.msk.bf16.vlgmr.msra.gmra.mxu1 %vm1767_vm5, %v4566_v15 }
0x1d90   : > { %v7442_v17 = vpop.f32.mrf.mxu0  ;;  %7475 = vmatprep.mubr.msk.f32.mxu1 %vm7814_vm1, %v7813_v5 }
0x1e4f   : > { %v4628_v18 = vpop.f32.mrf.mxu1 }
0x1e50   : > { %v8619_v19 = vadd.f32 %v4628_v18, %v4480_v33 }
0x1e51   : > { %v7453_v20 = vpop.f32.mrf.mxu1 }
0x1e52   : > { %v4637_v22 = vmul.f32 %v8619_v19, %v8619_v19 }
0x1e53   : > { %v4631_v24 = vpop.f32.mrf.mxu1 }
0x1e54   : > { %v4638_v14 = vsel %vm843_vm0, %v4637_v22, 0.0 }
0x1e55   : > { %4639 = vadd.xlane.f32.xlu1 %v4638_v14  ;;  %v7454_v23 = vpop.f32.mrf.mxu1 }
0x1ede   : > { %v4640_v26 = vpop.xlane.xlu1 %4639 }
0x1edf   : > { %v4641_v27 = vmul.f32 0.03125, %v4640_v26 }
0x1ee1   : > { %v4642_v28 = vadd.f32 1e-06, %v4641_v27 }
0x1ee3   : > { %7764 = vrsqrt.f32 %v4642_v28 }
0x1ef0   : > { %v7765_v29 = vpop.eup %7764 }
0x1ef1   : > { %v4644_v31 = vmul.f32 %v7765_v29, %v8619_v19 }
0x1ef3   : > { %v4651_v32 = vmul.f32 %v6895_v30, %v4644_v31 }
0x1ef5   : > { %v4657_v34 = vpack.c.bf16 %v4651_v32, %v4651_v32 }
0x1ef7   : > { %7460 = vmatmul.mubr.msk.bf16.vlgmr.msra.gmra.mxu0 %vm843_vm0, %v4657_v34 }
0x1ef8   : > { %7465 = vmatprep.mubr.msk.f32.mxu0 %vm7814_vm1, %v7813_v5 }
0x1fb7   : > { %v8639_v35 = vpop.f32.mrf.mxu0 }
0x1fb8   : > { %4884 = vrot.lane.b32.xlu1 %v8639_v35, %s9034_s6  ;;  %4719 = vrot.lane.b32.xlu0 %v8639_v35, %s9035_s10 }
0x1fb9   : > { %v7461_v39 = vpop.f32.mrf.mxu0 }
0x1fbb   : > { %v4710_v40 = vpop.f32.mrf.mxu0 }
0x1fbc   : > { %5049 = vrot.lane.b32.xlu1 %v8639_v35, %s9037_s8  ;;  %4882 = vrot.lane.b32.xlu0 %v8639_v35, %s9036_s4 }
0x1fbd   : > { %v7462_v41 = vpop.f32.mrf.mxu0 }
0x1fbe   : > { %v7658_v41 = vld [vmem:[%s8933_s14 + $0x18] sm:$0xff]  }
0x1fc0   : > { %5214 = vrot.lane.b32.xlu1 %v8639_v35, %s9039_s27  ;;  %5047 = vrot.lane.b32.xlu0 %v8639_v35, %s9038_s28 }
0x1fc4   : > { %5212 = vrot.lane.b32.xlu0 %v8639_v35, %s9040_s2 }
0x202a   : > { %v4885_v44 = vpop.permute.xlu1 %4884  ;;  %v4720_v45 = vpop.permute.xlu0 %4719 }
0x202b   : > { %7464 = vmatpush3.xpose.msk.msra.mxu0 %vm926_vm2, %v4720_v45  ;;  %7474 = vmatpush3.xpose.msk.msra.mxu1 %vm926_vm2, %v4885_v44  ;;  %v7659_v44 = vld [vmem:[%s8933_s14 + $0x10] sm:$0xff]  }
0x202c   : > { %7483 = vmatprep.subr.mxu1 %v7813_v5  ;;  %7468 = vmatprep.subr.mxu0 %v7813_v5 }
0x202e   : > { %v5050_v46 = vpop.permute.xlu1 %5049  ;;  %7466 = vmatmul.mubr.msk.f32.vlgmr.msra.gmra.mxu0 %vm926_vm2, %v8639_v35  ;;  %v4883_v49 = vpop.permute.xlu0 %4882 }
0x202f   : > { %7476 = vmatmul.mubr.msk.f32.vlgmr.msra.gmra.mxu1 %vm926_vm2, %v4883_v49  ;;  %7470 = vmatprep.mubr.msk.f32.mxu0 %vm7814_vm1, %v7813_v5 }
0x2030   : > { %7484 = vmatpush3.xpose.msk.msra.mxu1 %vm926_vm2, %v5050_v46  ;;  %7485 = vmatprep.mubr.msk.f32.mxu1 %vm7814_vm1, %v7813_v5 }
0x2031   : > { %7493 = vmatprep.subr.mxu1 %v7813_v5 }
0x2032   : > { %v5215_v42 = vpop.permute.xlu1 %5214  ;;  %v5048_v52 = vpop.permute.xlu0 %5047 }
0x2033   : > { %7486 = vmatmul.mubr.msk.f32.vlgmr.msra.gmra.mxu1 %vm926_vm2, %v5048_v52 }
0x2034   : > { %7494 = vmatpush3.xpose.msk.msra.mxu1 %vm926_vm2, %v5215_v42  ;;  %7495 = vmatprep.mubr.msk.f32.mxu1 %vm7814_vm1, %v7813_v5 }
0x2035   : > { %7503 = vmatprep.subr.bf16.mxu1 %v7813_v5 }
0x2036   : > { %v5213_v21 = vpop.permute.xlu0 %5212 }
0x2037   : > { %7496 = vmatmul.mubr.msk.f32.vlgmr.msra.gmra.mxu1 %vm926_vm2, %v5213_v21 }
0x2038   : > { %7507 = vmatprep.mubr.msk.bf16.mxu1 %vm7814_vm1, %v7813_v5  ;;  %7504 = vmatpush3.bf16.msra.mxu1 %v7658_v41 }
0x2039   : > { %7505 = vmatprep.subr.bf16.mxu1 %v7813_v5 }
0x203c   : > { %7506 = vmatpush3.bf16.msra.mxu1 %v7659_v44 }
0x203d   : > { %7519 = vmatprep.subr.bf16.mxu1 %v7813_v5 }
0x20ee   : > { %v4791_v0 = vpop.f32.mrf.mxu0 }
0x20ef   : > { %v4792_v53 = vadd.f32 %v4791_v0, %v8385_v37  ;;  %v4956_v51 = vpop.f32.mrf.mxu1 }
0x20f0   : > { %v4957_v33 = vadd.f32 %v4956_v51, %v8390_v38  ;;  %v7467_v55 = vpop.f32.mrf.mxu0 }
0x20f1   : > { %v7477_v56 = vpop.f32.mrf.mxu1  ;;  %v4795_v10 = vsel %vm926_vm2, %v4792_v53, -inf }
0x20f2   : > { %4796 = vmax.xlane.f32.xlu1 %v4795_v10  ;;  %v4960_v57 = vsel %vm926_vm2, %v4957_v33, -inf }
0x20f3   : > { %4961 = vmax.xlane.f32.xlu0 %v4960_v57  ;;  %v5121_v58 = vpop.f32.mrf.mxu1 }
0x20f4   : > { %v5122_v59 = vadd.f32 %v5121_v58, %v8398_v50  ;;  %v7660_v58 = vld [vmem:[%s8936_s17 + $0x18] sm:$0xff]  }
0x20f5   : > { %v7487_v60 = vpop.f32.mrf.mxu1 }
0x20f6   : > { %v5125_v2 = vsel %vm926_vm2, %v5122_v59, -inf  ;;  %v7661_v60 = vld [vmem:[%s8936_s17 + $0x10] sm:$0xff]  }
0x20f7   : > { %5126 = vmax.xlane.f32.xlu0 %v5125_v2  ;;  %v5286_v48 = vpop.f32.mrf.mxu1 }
0x20f8   : > { %v5287_v37 = vadd.f32 %v5286_v48, %v8405_v43 }
0x20f9   : > { %v7497_v61 = vpop.f32.mrf.mxu1 }
0x20fa   : > { %v5290_v38 = vsel %vm926_vm2, %v5287_v37, -inf }
0x20fb   : > { %5291 = vmax.xlane.f32.xlu0 %v5290_v38 }
0x2103   : > { %4806 = vrot.lane.b32.xlu1 %v8639_v35, %s9043_s26 }
0x217b   : > { %v4797_v62 = vpop.xlane.xlu1 %4796 }
0x217c   : > { %v4798_v63 = vsub.f32 %v4792_v53, %v4797_v62  ;;  %v4962_v1 = vpop.xlane.xlu0 %4961 }
0x217d   : > { %v4963_v3 = vsub.f32 %v4957_v33, %v4962_v1 }
0x217e   : > { %v4799_v4 = vmul.f32 1.442695, %v4798_v63 }
0x217f   : > { %v4964_v50 = vmul.f32 1.442695, %v4963_v3  ;;  %v4807_v6 = vpop.permute.xlu1 %4806 }
0x2180   : > { %7766 = vpow2.f32 %v4799_v4  ;;  %v5127_v7 = vpop.xlane.xlu0 %5126  ;;  %7469 = vmatpush3.msra.mxu0 %v4807_v6  ;;  %v7662_v4 = vld [vmem:[%s8935_s16 + $0x18] sm:$0xff]  }
0x2181   : > { %7768 = vpow2.f32 %v4964_v50  ;;  %v5128_v8 = vsub.f32 %v5122_v59, %v5127_v7  ;;  %7478 = vmatprep.subr.mxu0 %v7813_v5  ;;  %v7663_v50 = vld [vmem:[%s8935_s16 + $0x10] sm:$0xff]  }
0x2183   : > { %v5129_v43 = vmul.f32 1.442695, %v5128_v8 }
0x2184   : > { %v5292_v9 = vpop.xlane.xlu0 %5291 }
0x2185   : > { %7770 = vpow2.f32 %v5129_v43  ;;  %v5293_v11 = vsub.f32 %v5287_v37, %v5292_v9 }
0x2187   : > { %v5294_v12 = vmul.f32 1.442695, %v5293_v11  ;;  %v6923_v11 = vld [vmem:[%s9052_s18 + $0x1] ss:$0 sm:$0xff] }
0x2189   : > { %7772 = vpow2.f32 %v5294_v12 }
0x218d   : > { %v7767_v13 = vpop.eup %7766 }
0x218e   : > { %v7769_v15 = vpop.eup %7768  ;;  %v4801_v16 = vsel %vm926_vm2, %v7767_v13, 0.0 }
0x218f   : > { %4802 = vadd.xlane.f32.xlu1 %v4801_v16  ;;  %v4966_v17 = vsel %vm926_vm2, %v7769_v15, 0.0 }
0x2190   : > { %4967 = vadd.xlane.f32.xlu0 %v4966_v17 }
0x2192   : > { %v7771_v18 = vpop.eup %7770 }
0x2193   : > { %v5131_v20 = vsel %vm926_vm2, %v7771_v18, 0.0 }
0x2194   : > { %5132 = vadd.xlane.f32.xlu1 %v5131_v20 }
0x2196   : > { %v7773_v22 = vpop.eup %7772 }
0x2197   : > { %v5296_v24 = vsel %vm926_vm2, %v7773_v22, 0.0 }
0x2198   : > { %5297 = vadd.xlane.f32.xlu0 %v5296_v24 }
0x21a5   : > { %5136 = vrot.lane.b32.xlu1 %v8639_v35, %s9042_s30  ;;  %s9058_s30 = sld [smem:[#allocation23_spill]] }
0x21a9   : > { %5301 = vrot.lane.b32.xlu1 %v8639_v35, %s9044_s24 }
0x21ae   : > { %4971 = vrot.lane.b32.xlu0 %v8639_v35, %s9041_s1  ;;  %s9059_s1 = sld [smem:[#allocation22_spill]] }
0x2218   : > { %v4803_v14 = vpop.xlane.xlu1 %4802 }
0x2219   : > { %7774 = vrcp.f32 %v4803_v14  ;;  %v4968_v23 = vpop.xlane.xlu0 %4967 }
0x221a   : > { %7776 = vrcp.f32 %v4968_v23 }
0x221d   : > { %v5133_v25 = vpop.xlane.xlu1 %5132 }
0x221e   : > { %7778 = vrcp.f32 %v5133_v25 }
0x2221   : > { %v5298_v47 = vpop.xlane.xlu0 %5297  ;;  %v5137_v30 = vpop.permute.xlu1 %5136 }
0x2222   : > { %7780 = vrcp.f32 %v5298_v47 }
0x2225   : > { %v4972_v29 = vpop.permute.xlu0 %4971  ;;  %v5302_v39 = vpop.permute.xlu1 %5301 }
0x2226   : > { %v7775_v26 = vpop.eup %7774 }
0x2227   : > { %v4805_v27 = vmul.f32 %v7775_v26, %v7767_v13  ;;  %v7777_v28 = vpop.eup %7776 }
0x2228   : > { %v4970_v31 = vmul.f32 %v7777_v28, %v7769_v15 }
0x2229   : > { %7471 = vmatmul.mubr.msk.f32.vlgmr.msra.gmra.mxu0 %vm926_vm2, %v4805_v27 }
0x222a   : > { %7479 = vmatpush3.msra.mxu0 %v4972_v29  ;;  %7480 = vmatprep.mubr.msk.f32.mxu0 %vm7814_vm1, %v7813_v5 }
0x222b   : > { %7488 = vmatprep.subr.mxu0 %v7813_v5  ;;  %v7779_v32 = vpop.eup %7778 }
0x222c   : > { %v5135_v34 = vmul.f32 %v7779_v32, %v7771_v18 }
0x222d   : > { %7481 = vmatmul.mubr.msk.f32.vlgmr.msra.gmra.mxu0 %vm926_vm2, %v4970_v31 }
0x222e   : > { %7489 = vmatpush3.msra.mxu0 %v5137_v30  ;;  %7490 = vmatprep.mubr.msk.f32.mxu0 %vm7814_vm1, %v7813_v5 }
0x222f   : > { %7498 = vmatprep.subr.mxu0 %v7813_v5  ;;  %v7781_v35 = vpop.eup %7780 }
0x2230   : > { %v5300_v40 = vmul.f32 %v7781_v35, %v7773_v22 }
0x2231   : > { %7491 = vmatmul.mubr.msk.f32.vlgmr.msra.gmra.mxu0 %vm926_vm2, %v5135_v34 }
0x2232   : > { %7499 = vmatpush3.msra.mxu0 %v5302_v39  ;;  %7500 = vmatprep.mubr.msk.f32.mxu0 %vm7814_vm1, %v7813_v5 }
0x2233   : > { %7511 = vmatprep.subr.bf16.mxu0 %v7813_v5 }
0x2235   : > { %7501 = vmatmul.mubr.msk.f32.vlgmr.msra.gmra.mxu0 %vm926_vm2, %v5300_v40 }
0x2236   : > { %7515 = vmatprep.mubr.msk.bf16.mxu0 %vm7814_vm1, %v7813_v5  ;;  %7512 = vmatpush3.bf16.msra.mxu0 %v7662_v4 }
0x2237   : > { %7513 = vmatprep.subr.bf16.mxu0 %v7813_v5 }
0x223a   : > { %7514 = vmatpush3.bf16.msra.mxu0 %v7663_v50 }
0x223b   : > { %7527 = vmatprep.subr.mxu0 %v7813_v5 }
0x22e9   : > { %v4878_v45 = vpop.f32.mrf.mxu0 }
0x22eb   : > { %v7472_v46 = vpop.f32.mrf.mxu0 }
0x22ed   : > { %v5043_v49 = vpop.f32.mrf.mxu0 }
0x22ee   : > { %5378 = vrot.lane.b32.xlu1 %v5043_v49, %s9045_s23 }
0x22ef   : > { %v7482_v42 = vpop.f32.mrf.mxu0 }
0x22f1   : > { %v5208_v52 = vpop.f32.mrf.mxu0 }
0x22f2   : > { %5382 = vrot.lane.b32.xlu0 %v5208_v52, %s9046_s19 }
0x22f3   : > { %v7492_v21 = vpop.f32.mrf.mxu0 }
0x22f5   : > { %v5373_v0 = vpop.f32.mrf.mxu0 }
0x22f6   : > { %5386 = vrot.lane.b32.xlu1 %v5373_v0, %s9047_s22 }
0x22f7   : > { %v7502_v53 = vpop.f32.mrf.mxu0 }
0x2360   : > { %v5379_v51 = vpop.permute.xlu1 %5378 }
0x2361   : > { %v5389_v55 = vsel %vm926_vm2, %v4878_v45, %v5379_v51 }
0x2364   : > { %v5383_v33 = vpop.permute.xlu0 %5382 }
0x2365   : > { %v5390_v56 = vsel %vm1596_vm3, %v5389_v55, %v5383_v33 }
0x2368   : > { %v5387_v10 = vpop.permute.xlu1 %5386 }
0x2369   : > { %v5391_v57 = vsel %vm1598_vm4, %v5390_v56, %v5387_v10 }
0x236a   : > { %v5392_v59 = vpack.c.bf16 %v5391_v57, %v5391_v57 }
0x236c   : > { %7508 = vmatmul.mubr.msk.bf16.vlgmr.msra.gmra.mxu1 %vm843_vm0, %v5392_v59 }
0x236d   : > { %7520 = vmatpush3.bf16.msra.mxu1 %v7660_v58  ;;  %7523 = vmatprep.mubr.msk.bf16.mxu1 %vm7814_vm1, %v7813_v5 }
0x236e   : > { %7521 = vmatprep.subr.bf16.mxu1 %v7813_v5 }
0x2371   : > { %7522 = vmatpush3.bf16.msra.mxu1 %v7661_v60 }
0x2372   : > { %7537 = vmatprep.subr.mxu1 %v7813_v5 }
0x2374   : > { %7524 = vmatmul.mubr.msk.bf16.vlgmr.msra.gmra.mxu1 %vm843_vm0, %v8469_v54 }
0x2375   : > { %7539 = vmatprep.mubr.msk.f32.mxu1 %vm7814_vm1, %v7813_v5 }
0x242c   : > { %v5442_v2 = vpop.f32.mrf.mxu1 }
0x242d   : > { %v8742_v48 = vadd.f32 %v5442_v2, %v8619_v19 }
0x242e   : > { %v7509_v37 = vpop.f32.mrf.mxu1 }
0x242f   : > { %v5451_v61 = vmul.f32 %v8742_v48, %v8742_v48 }
0x2430   : > { %v5445_v38 = vpop.f32.mrf.mxu1 }
0x2431   : > { %v5452_v62 = vsel %vm843_vm0, %v5451_v61, 0.0 }
0x2432   : > { %5453 = vadd.xlane.f32.xlu0 %v5452_v62  ;;  %v7510_v63 = vpop.f32.mrf.mxu1 }
0x2434   : > { %v8747_v1 = vpop.f32.mrf.mxu1 }
0x2435   : > { %5754 = vrot.lane.b32.xlu1 %v8747_v1, %s9036_s4 }
0x2436   : > { %v7525_v54 = vpop.f32.mrf.mxu1 }
0x2438   : > { %v5581_v3 = vpop.f32.mrf.mxu1 }
0x2439   : > { %5919 = vrot.lane.b32.xlu1 %v8747_v1, %s9038_s28 }
0x243a   : > { %v7526_v19 = vpop.f32.mrf.mxu1 }
0x243d   : > { %6084 = vrot.lane.b32.xlu1 %v8747_v1, %s9040_s2 }
0x24a7   : > { %v5755_v6 = vpop.permute.xlu1 %5754 }
0x24a8   : > { %7538 = vmatpush3.xpose.msk.msra.mxu1 %vm926_vm2, %v5755_v6 }
0x24a9   : > { %7547 = vmatprep.subr.mxu1 %v7813_v5 }
0x24ab   : > { %v5920_v22 = vpop.permute.xlu1 %5919 }
0x24af   : > { %v6085_v24 = vpop.permute.xlu1 %6084 }
0x24bb   : > { %v5454_v7 = vpop.xlane.xlu0 %5453 }
0x24bc   : > { %v5455_v8 = vmul.f32 0.03125, %v5454_v7 }
0x24be   : > { %v5456_v43 = vadd.f32 1e-06, %v5455_v8 }
0x24c0   : > { %7782 = vrsqrt.f32 %v5456_v43 }
0x24cd   : > { %v7783_v9 = vpop.eup %7782 }
0x24ce   : > { %v5458_v12 = vmul.f32 %v7783_v9, %v8742_v48 }
0x24d0   : > { %v5465_v13 = vmul.f32 %v6923_v11, %v5458_v12 }
0x24d2   : > { %v5471_v15 = vpack.c.bf16 %v5465_v13, %v5465_v13 }
0x24d4   : > { %7516 = vmatmul.mubr.msk.bf16.vlgmr.msra.gmra.mxu0 %vm843_vm0, %v5471_v15 }
0x24d5   : > { %7528 = vmatpush3.xpose.msk.msra.mxu0 %vm926_vm2, %v8747_v1  ;;  %7529 = vmatprep.mubr.msk.f32.mxu0 %vm7814_vm1, %v7813_v5 }
0x24d6   : > { %7532 = vmatprep.subr.mxu0 %v7813_v5 }
0x2594   : > { %v5521_v16 = vpop.f32.mrf.mxu0 }
0x2595   : > { %5752 = vrot.lane.b32.xlu1 %v5521_v16, %s9036_s4  ;;  %7530 = vmatmul.mubr.msk.f32.vlgmr.msra.gmra.mxu0 %vm926_vm2, %v5521_v16 }
0x2596   : > { %v7517_v17 = vpop.f32.mrf.mxu0  ;;  %7534 = vmatprep.mubr.msk.f32.mxu0 %vm7814_vm1, %v7813_v5 }
0x2597   : > { %v7664_v17 = vld [vmem:[%s9054_s5 + $0x18] sm:$0xff]  }
0x2598   : > { %v5524_v18 = vpop.f32.mrf.mxu0 }
0x2599   : > { %5917 = vrot.lane.b32.xlu1 %v5521_v16, %s9038_s28  ;;  %v7665_v18 = vld [vmem:[%s9054_s5 + $0x10] sm:$0xff]  }
0x259a   : > { %v7518_v20 = vpop.f32.mrf.mxu0 }
0x259d   : > { %6082 = vrot.lane.b32.xlu1 %v5521_v16, %s9040_s2 }
0x2607   : > { %v5753_v14 = vpop.permute.xlu1 %5752 }
0x2608   : > { %7540 = vmatmul.mubr.msk.f32.vlgmr.msra.gmra.mxu1 %vm926_vm2, %v5753_v14 }
0x2609   : > { %7548 = vmatpush3.xpose.msk.msra.mxu1 %vm926_vm2, %v5920_v22  ;;  %7549 = vmatprep.mubr.msk.f32.mxu1 %vm7814_vm1, %v7813_v5 }
0x260a   : > { %7557 = vmatprep.subr.mxu1 %v7813_v5 }
0x260b   : > { %v5918_v23 = vpop.permute.xlu1 %5917 }
0x260c   : > { %7550 = vmatmul.mubr.msk.f32.vlgmr.msra.gmra.mxu1 %vm926_vm2, %v5918_v23 }
0x260d   : > { %7558 = vmatpush3.xpose.msk.msra.mxu1 %vm926_vm2, %v6085_v24  ;;  %7559 = vmatprep.mubr.msk.f32.mxu1 %vm7814_vm1, %v7813_v5 }
0x260e   : > { %7567 = vmatprep.subr.bf16.mxu1 %v7813_v5 }
0x260f   : > { %v6083_v25 = vpop.permute.xlu1 %6082 }
0x2610   : > { %7560 = vmatmul.mubr.msk.f32.vlgmr.msra.gmra.mxu1 %vm926_vm2, %v6083_v25 }
0x2611   : > { %7571 = vmatprep.mubr.msk.bf16.mxu1 %vm7814_vm1, %v7813_v5  ;;  %7568 = vmatpush3.bf16.msra.mxu1 %v7664_v17  ;;  %v7683_v17 = vld [vmem:[%s9058_s30 + $0xc] ss:$16 sps:$4 sm:$0xff]  }
0x2612   : > { %7569 = vmatprep.subr.bf16.mxu1 %v7813_v5 }
0x2615   : > { %7570 = vmatpush3.bf16.msra.mxu1 %v7665_v18  ;;  %v7681_v18 = vld [vmem:[%s9058_s30 + $0x8] ss:$16 sps:$4 sm:$0xff]  }
0x2616   : > { %7583 = vmatprep.subr.bf16.mxu1 %v7813_v5 }
0x2655   : > { %v5661_v47 = vpop.f32.mrf.mxu0 }
0x2656   : > { %v5662_v26 = vadd.f32 %v8529_v36, %v5661_v47 }
0x2657   : > { %v7531_v27 = vpop.f32.mrf.mxu0 }
0x2658   : > { %v5665_v28 = vsel %vm926_vm2, %v5662_v26, -inf }
0x2659   : > { %5666 = vmax.xlane.f32.xlu1 %v5665_v28 }
0x266a   : > { %5841 = vrot.lane.b32.xlu1 %v8747_v1, %s9034_s6  ;;  %s9061_s6 = sld [smem:[#allocation25_spill]] }
0x266e   : > { %6006 = vrot.lane.b32.xlu1 %v8747_v1, %s9037_s8  ;;  %s9062_s8 = sld [smem:[#allocation24_spill]] }
0x26c8   : > { %v5826_v29 = vpop.f32.mrf.mxu1 }
0x26c9   : > { %v5827_v30 = vadd.f32 %v8529_v36, %v5826_v29 }
0x26ca   : > { %v7541_v31 = vpop.f32.mrf.mxu1 }
0x26cb   : > { %v5830_v32 = vsel %vm926_vm2, %v5827_v30, -inf }
0x26cc   : > { %5831 = vmax.xlane.f32.xlu0 %v5830_v32  ;;  %v5991_v34 = vpop.f32.mrf.mxu1 }
0x26cd   : > { %v5992_v35 = vadd.f32 %v8529_v36, %v5991_v34 }
0x26ce   : > { %v7551_v39 = vpop.f32.mrf.mxu1 }
0x26cf   : > { %v5995_v40 = vsel %vm926_vm2, %v5992_v35, -inf }
0x26d0   : > { %5996 = vmax.xlane.f32.xlu0 %v5995_v40  ;;  %v6156_v41 = vpop.f32.mrf.mxu1 }
0x26d1   : > { %v6157_v44 = vadd.f32 %v8529_v36, %v6156_v41 }
0x26d2   : > { %v7561_v45 = vpop.f32.mrf.mxu1 }
0x26d3   : > { %v6160_v46 = vsel %vm926_vm2, %v6157_v44, -inf  ;;  %v7666_v45 = vld [vmem:[%s9055_s3 + $0x18] sm:$0xff]  }
0x26d4   : > { %6161 = vmax.xlane.f32.xlu0 %v6160_v46  ;;  %v7667_v46 = vld [vmem:[%s9055_s3 + $0x10] sm:$0xff]  }
0x26e2   : > { %v5667_v49 = vpop.xlane.xlu1 %5666 }
0x26e3   : > { %v5668_v42 = vsub.f32 %v5662_v26, %v5667_v49  ;;  %v7669_v49 = vld [vmem:[%s9056_s9 + $0x30] sm:$0xff]  }
0x26e5   : > { %v5669_v52 = vmul.f32 1.442695, %v5668_v42  ;;  %v7670_v42 = vld [vmem:[%s9056_s9 + $0x28] sm:$0xff]  }
0x26e6   : > { %v5842_v19 = vpop.permute.xlu1 %5841 }
0x26e7   : > { %7784 = vpow2.f32 %v5669_v52 }
0x26ea   : > { %5676 = vrot.lane.b32.xlu0 %v8747_v1, %s9035_s10  ;;  %v6007_v8 = vpop.permute.xlu1 %6006 }
0x26f4   : > { %v7785_v21 = vpop.eup %7784 }
0x26f5   : > { %v5671_v0 = vsel %vm926_vm2, %v7785_v21, 0.0 }
0x2709   : > { %5672 = vadd.xlane.f32.xlu0 %v5671_v0 }
0x2755   : > { %v5832_v53 = vpop.xlane.xlu0 %5831 }
0x2756   : > { %v5833_v51 = vsub.f32 %v5827_v30, %v5832_v53 }
0x2758   : > { %v5834_v33 = vmul.f32 1.442695, %v5833_v51  ;;  %v6958_v51 = vld [vmem:[%s9057_s7 + $0x1] ss:$0 sm:$0xff] }
0x2759   : > { %v5997_v55 = vpop.xlane.xlu0 %5996 }
0x275a   : > { %7786 = vpow2.f32 %v5834_v33  ;;  %v5998_v36 = vsub.f32 %v5992_v35, %v5997_v55 }
0x275c   : > { %v5999_v56 = vmul.f32 1.442695, %v5998_v36 }
0x275d   : > { %v6162_v10 = vpop.xlane.xlu0 %6161 }
0x275e   : > { %7788 = vpow2.f32 %v5999_v56  ;;  %v6163_v57 = vsub.f32 %v6157_v44, %v6162_v10  ;;  %v7671_v56 = vld [vmem:[%s9056_s9 + $0x20] sm:$0xff]  }
0x2760   : > { %v6164_v58 = vmul.f32 1.442695, %v6163_v57 }
0x2761   : > { %v5677_v59 = vpop.permute.xlu0 %5676 }
0x2762   : > { %7790 = vpow2.f32 %v6164_v58  ;;  %7533 = vmatpush3.msra.mxu0 %v5677_v59 }
0x2763   : > { %7542 = vmatprep.subr.mxu0 %v7813_v5 }
0x2767   : > { %v7787_v60 = vpop.eup %7786 }
0x2768   : > { %v5836_v2 = vsel %vm926_vm2, %v7787_v60, 0.0 }
0x2769   : > { %5837 = vadd.xlane.f32.xlu0 %v5836_v2 }
0x276b   : > { %v7789_v37 = vpop.eup %7788 }
0x276c   : > { %v6001_v61 = vsel %vm926_vm2, %v7789_v37, 0.0 }
0x276d   : > { %6002 = vadd.xlane.f32.xlu0 %v6001_v61 }
0x276f   : > { %v7791_v38 = vpop.eup %7790 }
0x2770   : > { %v6166_v62 = vsel %vm926_vm2, %v7791_v38, 0.0 }
0x2771   : > { %6167 = vadd.xlane.f32.xlu0 %v6166_v62 }
0x2787   : > { %6171 = vrot.lane.b32.xlu0 %v8747_v1, %s9039_s27  ;;  %s9063_s27 = sld [smem:[#allocation26_spill]] }
0x2792   : > { %v5673_v63 = vpop.xlane.xlu0 %5672 }
0x2793   : > { %7792 = vrcp.f32 %v5673_v63 }
0x27a0   : > { %v7793_v54 = vpop.eup %7792 }
0x27a1   : > { %v5675_v3 = vmul.f32 %v7793_v54, %v7785_v21 }
0x27a3   : > { %7535 = vmatmul.mubr.msk.f32.vlgmr.msra.gmra.mxu0 %vm926_vm2, %v5675_v3  ;;  %v7672_v3 = vld [vmem:[%s9058_s30 + $0x20] ss:$16 sps:$4 sm:$0xff]  }
0x27a4   : > { %7543 = vmatpush3.msra.mxu0 %v5842_v19  ;;  %7544 = vmatprep.mubr.msk.f32.mxu0 %vm7814_vm1, %v7813_v5  ;;  %v7674_v19 = vld [vmem:[%s9058_s30 + $0x24] ss:$16 sps:$4 sm:$0xff]  }
0x27a5   : > { %7552 = vmatprep.subr.mxu0 %v7813_v5 }
0x27f2   : > { %v5838_v4 = vpop.xlane.xlu0 %5837 }
0x27f3   : > { %7794 = vrcp.f32 %v5838_v4  ;;  %v7677_v4 = vld [vmem:[%s9058_s30 + $0x4] ss:$16 sps:$4 sm:$0xff]  }
0x27f6   : > { %v6003_v50 = vpop.xlane.xlu0 %6002 }
0x27f7   : > { %7796 = vrcp.f32 %v6003_v50  ;;  %v7829_v50 = vmov 0  }
0x27fa   : > { %v6168_v6 = vpop.xlane.xlu0 %6167 }
0x27fb   : > { %7798 = vrcp.f32 %v6168_v6  ;;  %v7675_v6 = vld [vmem:[%s9058_s30] ss:$16 sps:$4 sm:$0xff]  }
0x27fe   : > { %v6172_v11 = vpop.permute.xlu0 %6171 }
0x2800   : > { %v7795_v1 = vpop.eup %7794 }
0x2801   : > { %v5840_v7 = vmul.f32 %v7795_v1, %v7787_v60  ;;  %v7680_v1 = vld [vmem:[%s9058_s30 + $0x2c] ss:$16 sps:$4 sm:$0xff]  }
0x2803   : > { %7545 = vmatmul.mubr.msk.f32.vlgmr.msra.gmra.mxu0 %vm926_vm2, %v5840_v7 }
0x2804   : > { %v7797_v43 = vpop.eup %7796  ;;  %7553 = vmatpush3.msra.mxu0 %v6007_v8  ;;  %7554 = vmatprep.mubr.msk.f32.mxu0 %vm7814_vm1, %v7813_v5 }
0x2805   : > { %7562 = vmatprep.subr.mxu0 %v7813_v5  ;;  %v6005_v9 = vmul.f32 %v7797_v43, %v7789_v37 }
0x2807   : > { %7555 = vmatmul.mubr.msk.f32.vlgmr.msra.gmra.mxu0 %vm926_vm2, %v6005_v9 }
0x2808   : > { %v7799_v12 = vpop.eup %7798  ;;  %7563 = vmatpush3.msra.mxu0 %v6172_v11  ;;  %7564 = vmatprep.mubr.msk.f32.mxu0 %vm7814_vm1, %v7813_v5  ;;  %v6979_v11 = vld [vmem:[%s9059_s1] ss:$0 sm:$0xff] }
0x2809   : > { %v6170_v13 = vmul.f32 %v7799_v12, %v7791_v38  ;;  %7575 = vmatprep.subr.bf16.mxu0 %v7813_v5 }
0x280b   : > { %7565 = vmatmul.mubr.msk.f32.vlgmr.msra.gmra.mxu0 %vm926_vm2, %v6170_v13 }
0x280c   : > { %7579 = vmatprep.mubr.msk.bf16.mxu0 %vm7814_vm1, %v7813_v5  ;;  %7576 = vmatpush3.bf16.msra.mxu0 %v7666_v45 }
0x280d   : > { %7577 = vmatprep.subr.bf16.mxu0 %v7813_v5 }
0x2810   : > { %7578 = vmatpush3.bf16.msra.mxu0 %v7667_v46 }
0x2811   : > { %6578 = vmatprep.subr.bf16.mxu0 %v7674_v19 }
0x2863   : > { %v5748_v15 = vpop.f32.mrf.mxu0 }
0x2865   : > { %v7536_v16 = vpop.f32.mrf.mxu0 }
0x28c3   : > { %v5913_v20 = vpop.f32.mrf.mxu0 }
0x28c4   : > { %6248 = vrot.lane.b32.xlu1 %v5913_v20, %s9045_s23  ;;  %v6503_v20 = vlaneseq }
0x28c5   : > { %v7546_v22 = vpop.f32.mrf.mxu0 }
0x28c6   : > { %v6648_v22 = vld [vmem:[%s9061_s6] sm:$0xf] }
0x28c7   : > { %v6078_v24 = vpop.f32.mrf.mxu0  ;;  %vm6649_vm6 = vcmp.ne.s32.totalorder %v6648_v22, 0 }
0x28c8   : > { %6252 = vrot.lane.b32.xlu0 %v6078_v24, %s9046_s19  ;;  %v6504_v24 = vshrl.u32 %v6503_v20, 7  ;;  %s6992_s19 = sshll.u32 %s9060_s21, 5 }
0x28c9   : > { %v7556_v14 = vpop.f32.mrf.mxu0  ;;  %s819_s2 = scalar_lea.vmem %s9063_s27, %s6992_s19 }
0x28ca   : > { %v6505_v14 = vsub.s32 0, %v6504_v24 }
0x28cb   : > { %v6243_v23 = vpop.f32.mrf.mxu0 }
0x28cc   : > { %6256 = vrot.lane.b32.xlu1 %v6243_v23, %s9047_s22  ;;  %v6650_v23 = vsel %vm6649_vm6, 1, %v7829_v50 }
0x28cd   : > { %v7566_v25 = vpop.f32.mrf.mxu0 }
0x28ce   : > { %v6501_v25 = vld [vmem:[%s9062_s8] sm:$0xf] }
0x2936   : > { %v6249_v47 = vpop.permute.xlu1 %6248 }
0x2937   : > { %v6259_v27 = vsel %vm926_vm2, %v5748_v15, %v6249_v47  ;;  %v7678_v15 = vld [vmem:[%s9058_s30 + $0x28] ss:$16 sps:$4 sm:$0xff]   ;;  %v6509_v47 = vsub.s32 1, %v6504_v24 }
0x293a   : > { %v6253_v26 = vpop.permute.xlu0 %6252 }
0x293b   : > { %v6260_v28 = vsel %vm1596_vm3, %v6259_v27, %v6253_v26  ;;  %v6654_v26 = vrot.slane %v6650_v23, %v6505_v14  ;;  %v6506_v27 = vrot.slane %v6501_v25, %v6505_v14 }
0x293d   : > { %vm6667_vm7 = vcmp.eq.s32.totalorder %v6654_v26, 1 }
0x293e   : > { %v6257_v29 = vpop.permute.xlu1 %6256 }
0x293f   : > { %v6261_v30 = vsel %vm1598_vm4, %v6260_v28, %v6257_v29  ;;  %v6658_v28 = vrot.slane %v6650_v23, %v6509_v47  ;;  %v6510_v29 = vrot.slane %v6501_v25, %v6509_v47 }
0x2940   : > { %v6262_v31 = vpack.c.bf16 %v6261_v30, %v6261_v30 }
0x2941   : > { %vm6668_vm8 = vcmp.eq.s32.totalorder %v6658_v28, 1 }
0x2942   : > { %7572 = vmatmul.mubr.msk.bf16.vlgmr.msra.gmra.mxu1 %vm843_vm0, %v6262_v31  ;;  %v6513_v31 = vsub.s32 2, %v6504_v24 }
0x2943   : > { %7591 = vmatprep.mubr.msk.bf16.mxu1 %vm7814_vm1, %v7813_v5 }
0x2944   : > { %v6514_v46 = vrot.slane %v6501_v25, %v6513_v31 }
0x2a02   : > { %v6312_v32 = vpop.f32.mrf.mxu1 }
0x2a03   : > { %v6318_v34 = vadd.f32 %v6312_v32, %v8742_v48  ;;  %v7668_v48 = vld [vmem:[%s9056_s9 + $0x38] sm:$0xff]  }
0x2a04   : > { %v7573_v35 = vpop.f32.mrf.mxu1  ;;  %7584 = vmatpush3.bf16.msra.mxu1 %v7668_v48 }
0x2a05   : > { %v6321_v39 = vmul.f32 %v6318_v34, %v6318_v34  ;;  %7585 = vmatprep.subr.bf16.mxu1 %v7813_v5  ;;  %v6517_v35 = vsub.s32 3, %v6504_v24 }
0x2a06   : > { %v6315_v40 = vpop.f32.mrf.mxu1 }
0x2a07   : > { %v6322_v41 = vsel %vm843_vm0, %v6321_v39, 0.0 }
0x2a08   : > { %6323 = vadd.xlane.f32.xlu0 %v6322_v41  ;;  %v7574_v44 = vpop.f32.mrf.mxu1  ;;  %7586 = vmatpush3.bf16.msra.mxu1 %v7669_v49  ;;  %v6666_v49 = vrot.slane %v6650_v23, %v6517_v35 }
0x2a09   : > { %7587 = vmatprep.subr.bf16.mxu1 %v7813_v5  ;;  %v6662_v44 = vrot.slane %v6650_v23, %v6513_v31 }
0x2a0a   : > { %vm6670_vm10 = vcmp.eq.s32.totalorder %v6666_v49, 1 }
0x2a0b   : > { %vm6669_vm9 = vcmp.eq.s32.totalorder %v6662_v44, 1 }
0x2a0c   : > { %7588 = vmatpush3.bf16.msra.mxu1 %v7670_v42  ;;  %v6518_v42 = vrot.slane %v6501_v25, %v6517_v35 }
0x2a0d   : > { %7589 = vmatprep.subr.bf16.mxu1 %v7813_v5 }
0x2a10   : > { %7590 = vmatpush3.bf16.msra.mxu1 %v7671_v56 }
0x2a91   : > { %v6324_v52 = vpop.xlane.xlu0 %6323 }
0x2a92   : > { %v6325_v21 = vmul.f32 0.03125, %v6324_v52 }
0x2a94   : > { %v6326_v0 = vadd.f32 1e-06, %v6325_v21 }
0x2a96   : > { %7800 = vrsqrt.f32 %v6326_v0 }
0x2aa3   : > { %v7801_v53 = vpop.eup %7800 }
0x2aa4   : > { %v6328_v33 = vmul.f32 %v7801_v53, %v6318_v34 }
0x2aa6   : > { %v6335_v55 = vmul.f32 %v6958_v51, %v6328_v33 }
0x2aa8   : > { %v6341_v36 = vpack.c.bf16 %v6335_v55, %v6335_v55 }
0x2aaa   : > { %7580 = vmatmul.mubr.msk.bf16.vlgmr.msra.gmra.mxu0 %vm843_vm0, %v6341_v36 }
0x2aab   : > { %6598 = vmatprep.mubr.bf16.mxu0 %v7829_v50  ;;  %6579 = vmatpush1.bf16.msra.mxu0 %v7672_v3 }
0x2aac   : > { %6580 = vmatprep.subr.bf16.mxu0 %v7677_v4 }
0x2aaf   : > { %6581 = vmatpush1.bf16.msra.mxu0 %v7675_v6 }
0x2ab0   : > { %6619 = vmatprep.subr.bf16.mxu0 %v7680_v1 }
0x2b6a   : > { %v6391_v5 = vpop.f32.mrf.mxu0 }
0x2b6b   : > { %v6397_v10 = vmax.f32 %v6391_v5, 0.0 }
0x2b6c   : > { %v7581_v57 = vpop.f32.mrf.mxu0 }
0x2b6d   : > { %v6407_v58 = vpack.c.bf16 %v6397_v10, %v6397_v10 }
0x2b6e   : > { %v6394_v59 = vpop.f32.mrf.mxu0 }
0x2b6f   : > { %7592 = vmatmul.mubr.msk.bf16.vlgmr.msra.gmra.mxu1 %vm1767_vm5, %v6407_v58 }
0x2b70   : > { %v7582_v60 = vpop.f32.mrf.mxu0 }
0x2c2f   : > { %v6469_v2 = vpop.f32.mrf.mxu1 }
0x2c30   : > { %v6475_v37 = vadd.f32 %v6469_v2, %v6318_v34 }
0x2c31   : > { %v7593_v61 = vpop.f32.mrf.mxu1 }
0x2c32   : > { %v6477_v38 = vmul.f32 %v6475_v37, %v6475_v37 }
0x2c33   : > { %v6472_v62 = vpop.f32.mrf.mxu1 }
0x2c34   : > { %v6478_v63 = vsel %vm843_vm0, %v6477_v38, 0.0 }
0x2c35   : > { %6479 = vadd.xlane.f32.xlu1 %v6478_v63  ;;  %v7594_v54 = vpop.f32.mrf.mxu1 }
0x2cbe   : > { %v6480_v7 = vpop.xlane.xlu1 %6479 }
0x2cbf   : > { %v6481_v8 = vmul.f32 0.03125, %v6480_v7 }
0x2cc1   : > { %v6482_v43 = vadd.f32 1e-06, %v6481_v8 }
0x2cc3   : > { %7802 = vrsqrt.f32 %v6482_v43 }
0x2cd0   : > { %v7803_v9 = vpop.eup %7802 }
0x2cd1   : > { %v6484_v12 = vmul.f32 %v7803_v9, %v6475_v37 }
0x2cd3   : > { %v6491_v13 = vmul.f32 %v6979_v11, %v6484_v12 }
0x2cd5   : > { %v6500_v16 = vpack.c.bf16 %v6491_v13, %v6491_v13 }
0x2cd7   : > { %6988 = vmatmul.mubr.msk.bf16.vlgmr.msra.gmra.mxu0 %vm843_vm0, %v6500_v16 }
0x2cd8   : > { %6620 = vmatpush1.bf16.msra.mxu0 %v7678_v15  ;;  %6639 = vmatprep.mubr.bf16.mxu0 %v7829_v50 }
0x2cd9   : > { %6621 = vmatprep.subr.bf16.mxu0 %v7683_v17 }
0x2cdc   : > { %6622 = vmatpush1.bf16.msra.mxu0 %v7681_v18 }
0x2cdf   : > { %6989 = vmatmul.mubr.msk.bf16.vlgmr.msra.gmra.mxu0 %vm843_vm0, %v6500_v16 }
0x2d97   : > { %v6600_v30 = vpop.f32.mrf.mxu0 }
0x2d98   : > { %v6601_v32 = vadd.f32 %v6600_v30, %v6506_v27 }
0x2d99   : > { %v6602_v34 = vpop.f32.mrf.mxu0 }
0x2d9a   : > { %v6671_v39 = vsel %vm6667_vm7, %v6601_v32, -1e+09  ;;  %v6603_v40 = vadd.f32 %v6602_v34, %v6510_v29 }
0x2d9b   : > { %6675 = vst [vmem:[%s819_s2] sm:$0xff] %v6671_v39  ;;  %v6604_v41 = vpop.f32.mrf.mxu0 }
0x2d9c   : > { %v6672_v45 = vsel %vm6668_vm8, %v6603_v40, -1e+09 }
0x2d9d   : > { %6676 = vst [vmem:[%s819_s2 + $0x8] sm:$0xff] %v6672_v45  ;;  %v6605_v48 = vpop.f32.mrf.mxu0 }
0x2d9f   : > { %v6641_v52 = vpop.f32.mrf.mxu0 }
0x2da0   : > { %v6642_v21 = vadd.f32 %v6641_v52, %v6514_v46 }
0x2da1   : > { %v6643_v0 = vpop.f32.mrf.mxu0 }
0x2da2   : > { %v6673_v53 = vsel %vm6669_vm9, %v6642_v21, -1e+09  ;;  %v6644_v51 = vadd.f32 %v6643_v0, %v6518_v42 }
0x2da3   : > { %6677 = vst [vmem:[%s819_s2 + $0x10] sm:$0xff] %v6673_v53  ;;  %v6645_v33 = vpop.f32.mrf.mxu0 }
0x2da4   : > { %v6674_v55 = vsel %vm6670_vm10, %v6644_v51, -1e+09 }
0x2da5   : > { %6678 = vst [vmem:[%s819_s2 + $0x18] sm:$0xff] %v6674_v55  ;;  %v6646_v36 = vpop.f32.mrf.mxu0 }
0x2da6 PF: > { %s9064_s22 = sld [smem:[#allocation2_spill]] }
0x2dac   : > { %s36_s27 = sadd.s32 1, %s9064_s22  }
0x2dad   : > { %p33_p4 = scmp.ge.s32.totalorder %s36_s27, 4  }
0x2daf   :  { %35 = sbr.rel (!%p33_p4) target bundleno = 23 (0x17), region = 176 }

</bundles_post_ra>
